<compile_context>
chip_gen: v7x
topology: tpu7x:2x2x1
jax: 0.10.0
libtpu: 0.0.40
codegen_flags: <defaults>
</compile_context>

<pallas_src>
import functools

import jax
import jax.numpy as jnp
import numpy as np
from jax.experimental import pallas as pl
from jax.experimental.pallas import tpu as pltpu


def _xcorr_kernel(x_ref, z_ref, o_ref, xp_ref, *, h, w, p, wp, zh, zw, oh,
                  out_scale, roll_mode):
    """One grid step: `bo` groups of `nz` search images vs. the resident template bank.

    x_ref : (bo, nz, c, h*w)        search images, native dtype, spatial on lanes
    z_ref : (zh*zw, nz, c, 1)       templates, tap-major (constant block index)
    o_ref : (bo, nz, oh*wp)         response maps on a width-`wp` canvas (lane-dense)
    xp_ref: (bo, nz, c, hp*wp + wp) zero-padded, flattened search images (VMEM scratch)
    """
    L = oh * wp

    # Zero the padded canvas. Halo-only zeroing was evaluated and rejected: with
    # wp << 128 the halo decomposes into ~h sub-vreg masked stores (2p lanes each),
    # which costs MORE vst slots than this single dense store, and the interior
    # rewrite it would avoid is < 1/(zh*zw) of the kernel's VMEM traffic.
    xp_ref[...] = jnp.zeros_like(xp_ref)

    # In-kernel zero padding with the f32 cast fused into the row copy, so no full
    # (bo, nz, c, h*w) f32 temporary is ever materialized.
    for y in range(h):
        dst = (p + y) * wp + p
        xp_ref[:, :, :, dst:dst + w] = (
            x_ref[:, :, :, y * w:(y + 1) * w].astype(jnp.float32))

    # Template bank: tiny and resident; load + cast once per step and fold the
    # output scale in so no final (bo, nz, L) multiply is needed.
    zf = z_ref[...].astype(jnp.float32) * out_scale          # (zh*zw, nz, c, 1)

    def advanced(win0, d):
        # Return v with v[..., i] == win0[..., (i + d) % L].  Wrapped elements
        # (i >= L - d) land in output columns xo >= wp - d >= ow, i.e. in the junk
        # columns the wrapper strips, so the wrap is numerically harmless.
        if roll_mode == "jnp":            # pltpu.roll(x, s)[i] == x[(i - s) % L]
            return pltpu.roll(win0, shift=L - d, axis=3)
        return pltpu.roll(win0, shift=d, axis=3)              # opposite convention

    # Shift-and-accumulate over the zh*zw taps with a SINGLE accumulator; the channel
    # reduction is deferred to one sublane reduce at the end (c on sublanes, L on
    # lanes).  Static Python loops are fine for the small tap counts of this head.
    # TODO(synk): for very large templates (zh*zw >> 49) wrap dy in
    # lax.fori_loop(..., unroll=True) with pl.ds offsets to bound code size.
    acc = None
    if roll_mode is not None:
        # One lane-misaligned window load per template ROW; the zw column shifts are
        # derived on the (otherwise idle) XLU via roll instead of zw more misaligned
        # VMEM reads per row.
        for dy in range(zh):
            win0 = xp_ref[:, :, :, dy * wp:dy * wp + L]       # (bo, nz, c, L)
            for dx in range(zw):
                win = win0 if dx == 0 else advanced(win0, dx)
                term = win * zf[dy * zw + dx]
                acc = term if acc is None else acc + term
    else:
        # Fallback: direct per-tap window reads (one misaligned load per tap).
        for dy in range(zh):
            for dx in range(zw):
                off = dy * wp + dx
                win = xp_ref[:, :, :, off:off + L]
                term = win * zf[dy * zw + dx]
                acc = term if acc is None else acc + term

    out = jnp.sum(acc, axis=2)                                # (bo, nz, L)
    o_ref[...] = out.astype(o_ref.dtype)


@functools.lru_cache(maxsize=None)
def _roll_advance_mode():
    """Pin down pltpu.roll's rotation direction on this backend.

    Returns "jnp" if pltpu.roll matches jnp.roll (result[i] = x[(i - shift) % N]),
    "opposite" if it rotates the other way, or None if roll is unusable (the main
    kernel then falls back to direct per-tap slicing)."""
    def probe_kernel(o_ref):
        v = jax.lax.broadcasted_iota(jnp.int32, (8, 128), 1)
        o_ref[...] = pltpu.roll(v, shift=1, axis=1)

    try:
        r = pl.pallas_call(
            probe_kernel,
            out_shape=jax.ShapeDtypeStruct((8, 128), jnp.int32),
        )()
        first = int(jax.device_get(r)[0, 0])
    except Exception:
        return None
    if first == 127:
        return "jnp"
    if first == 1:
        return "opposite"
    return None


def _vmem_capacity_bytes():
    try:
        info = pltpu.get_tpu_info()
        for attr in ("vmem_capacity_bytes", "vmem_bytes", "vmem_size_bytes"):
            v = getattr(info, attr, None)
            if isinstance(v, int) and v > 0:
                return v
    except Exception:
        pass
    return 64 * 1024 * 1024          # conservative fallback: v7x physical VMEM


def _prefer_multi_step():
    """True if the grid should have >= 2 steps so megacore can shard it (v7x)."""
    try:
        info = pltpu.get_tpu_info()
        for attr in ("num_cores", "num_tensorcores", "tensorcore_count",
                     "cores_per_chip", "core_count"):
            v = getattr(info, attr, None)
            if isinstance(v, int) and v >= 1:
                return v >= 2
    except Exception:
        pass
    # Unknown core count: one extra ~0.35us grid step is cheap insurance against
    # leaving a v7x TensorCore idle; v5e/v6e lose essentially nothing.
    return True


def _pick_groups_per_step(nxg, nz, c, h, w, hp, wp, oh, x_itemsize, out_itemsize,
                          z_block_bytes, budget_bytes, prefer_multi_step):
    """Largest number of nz-image groups per grid step whose full live VMEM footprint
    (double-buffered input/output blocks, resident z, padded scratch, accumulator and
    the per-row window temporaries) fits the budget; prefers a >= 2-step grid when the
    chip has (or may have) two TensorCores."""
    L = oh * wp

    def footprint(bo):
        x_blk = bo * nz * c * h * w * x_itemsize             # input block
        out_blk = bo * nz * L * out_itemsize                  # output block
        scratch = bo * nz * c * (hp * wp + wp) * 4            # padded canvas
        live = 3 * bo * nz * c * L * 4                        # acc + window + rolled window
        return 2 * x_blk + 2 * out_blk + 2 * z_block_bytes + scratch + live

    fitting = [d for d in range(1, nxg + 1)
               if nxg % d == 0 and footprint(d) <= budget_bytes]
    if not fitting:
        # Even a single group exceeds the modeled budget; bo=1 is the smallest unit
        # this grid can address, so proceed and rely on the raised vmem_limit.
        return 1
    if prefer_multi_step:
        multi = [d for d in fitting if nxg // d >= 2]
        if multi:
            return max(multi)
    return max(fitting)


def single_group_fusion_head(z, x, out_scale=0.001, groups_per_step=None):
    nz, zc, zh, zw = z.shape
    nx, c, h, w = x.shape
    assert zc == c and nx % nz == 0
    p = zh // 2                        # F.conv2d(padding=zh//2): same pad on H and W
    hp, wp = h + 2 * p, w + 2 * p
    oh, ow = hp - zh + 1, wp - zw + 1
    assert oh >= 1 and ow >= 1
    nxg = nx // nz
    L = oh * wp
    out_dtype = jnp.promote_types(z.dtype, x.dtype)

    # Free, contiguous reshapes only (no padding / casting / per-image z gather in HBM):
    #   x: (nx, c, h, w)   -> (nx/nz, nz, c, h*w)  spatial flattened onto the lane axis
    #   z: (nz, c, zh, zw) -> (zh*zw, nz, c, 1)    tap-major; each tap broadcasts along
    #                                              lanes with no in-kernel relayout.
    # TODO(synk): for very large nz*c the trailing size-1 lane dim of z wastes VMEM
    # (128x pad); a (nz, c, zh*zw) layout + per-tap lane broadcast would be leaner.
    x_flat = x.reshape(nxg, nz, c, h * w)
    z_taps = jnp.transpose(z, (2, 3, 0, 1)).reshape(zh * zw, nz, c, 1)

    # Per-generation VMEM budget: v5e/v6e have 128 MiB physical, v7x only 64 MiB.
    vmem_phys = _vmem_capacity_bytes()
    vmem_limit = min(vmem_phys * 3 // 4, 96 * 1024 * 1024)
    budget = int(vmem_limit * 0.6)

    if groups_per_step is None:
        groups_per_step = _pick_groups_per_step(
            nxg, nz, c, h, w, hp, wp, oh,
            jnp.dtype(x.dtype).itemsize, jnp.dtype(out_dtype).itemsize,
            zh * zw * nz * c * jnp.dtype(z.dtype).itemsize,
            budget, _prefer_multi_step())
    assert nxg % groups_per_step == 0
    bo = groups_per_step

    def run(roll_mode):
        kernel = functools.partial(
            _xcorr_kernel, h=h, w=w, p=p, wp=wp, zh=zh, zw=zw, oh=oh,
            out_scale=out_scale, roll_mode=roll_mode)
        return pl.pallas_call(
            kernel,
            out_shape=jax.ShapeDtypeStruct((nxg, nz, L), out_dtype),
            grid_spec=pltpu.PrefetchScalarGridSpec(
                num_scalar_prefetch=0,
                grid=(nxg // bo,),
                in_specs=[
                    pl.BlockSpec((bo, nz, c, h * w), lambda i: (i, 0, 0, 0)),
                    # Constant block index: the template bank is DMA'd once and stays
                    # resident in VMEM for the whole grid (no per-step re-fetch).
                    # (pipeline_mode=pl.Buffered(1) would drop its redundant second
                    # buffer, but z is tiny; not worth the compile-compat risk.)
                    pl.BlockSpec((zh * zw, nz, c, 1), lambda i: (0, 0, 0, 0)),
                ],
                out_specs=pl.BlockSpec((bo, nz, L), lambda i: (i, 0, 0)),
                scratch_shapes=[pltpu.VMEM((bo, nz, c, hp * wp + wp), jnp.float32)],
            ),
            compiler_params=pltpu.CompilerParams(
                dimension_semantics=("parallel",),     # batch axis -> both TCs on v7x
                vmem_limit_bytes=int(vmem_limit),
            ),
        )(x_flat, z_taps)

    roll_mode = _roll_advance_mode()
    if roll_mode is not None:
        try:
            out_canvas = run(roll_mode)
        except Exception:
            out_canvas = run(None)      # roll failed to lower for this shape
    else:
        out_canvas = run(None)

    # Strip the (wp - ow) junk columns kept for lane-dense stores and restore the
    # PyTorch output layout (nx, 1, oh, ow).
    out = out_canvas.reshape(nxg, nz, oh, wp)[:, :, :, :ow]
    return out.reshape(nx, 1, oh, ow)


if __name__ == "__main__":
    key = jax.random.PRNGKey(0)
    kz, kx = jax.random.split(key)

    # Small shapes consistent with the module's forward: nx % nz == 0 (here 4 search
    # images per template), square odd template.
    nz, c, zh, zw = 2, 4, 5, 5
    nx, h, w = 8, 16, 16
    out_scale = 0.001

    z = jax.random.normal(kz, (nz, c, zh, zw), dtype=jnp.float32)
    x = jax.random.normal(kx, (nx, c, h, w), dtype=jnp.float32)

    # Pure-JAX reference mirroring the exact PyTorch grouped-conv formulation.
    p = zh // 2
    ref = jax.lax.conv_general_dilated(
        x.reshape(nx // nz, nz * c, h, w), z, (1, 1),
        [(p, p), (p, p)], feature_group_count=nz,
        dimension_numbers=("NCHW", "OIHW", "NCHW"),
    ).reshape(nx, 1, h + 2 * p - zh + 1, w + 2 * p - zw + 1) * out_scale

    # Auto block size: prefers a 2-step grid (nxg=4 -> bo=2) so v7x megacore shards it.
    out = jax.block_until_ready(single_group_fusion_head(z, x, out_scale=out_scale))
    np.testing.assert_allclose(np.asarray(out), np.asarray(ref), rtol=1e-5, atol=1e-5)

    # Forced smaller block -> 4-step grid; exercises the resident-z and scratch reuse
    # paths across grid iterations.
    out2 = jax.block_until_ready(
        single_group_fusion_head(z, x, out_scale=out_scale, groups_per_step=1))
    np.testing.assert_allclose(np.asarray(out2), np.asarray(ref), rtol=1e-5, atol=1e-5)

    print("KERNEL_OK")
</pallas_src>

<mosaic_0001>
module attributes {stable_mosaic.version = 11 : i64} {
  func.func @_xcorr_kernel(%arg0: i32, %arg1: memref<2x2x4x256xf32, #tpu.memory_space<vmem>>, %arg2: memref<25x2x4x1xf32, #tpu.memory_space<vmem>>, %arg3: memref<2x2x320xf32, #tpu.memory_space<vmem>>, %arg4: memref<2x2x4x420xf32, #tpu.memory_space<vmem>>) attributes {dimension_semantics = [#tpu.dimension_semantics<parallel>], iteration_bounds = array<i64: 2>, scalar_prefetch = 0 : i64, scratch_operands = 1 : i64, tpu.core_type = #tpu.core_type<tc>, window_params = [{transform_indices = @transform_0, window_bounds = array<i64: 2, 2, 4, 256>}, {pipeline_mode = #tpu.pipeline_mode<synchronous>, transform_indices = @transform_1, window_bounds = array<i64: 25, 2, 4, 1>}, {transform_indices = @transform_2, window_bounds = array<i64: 2, 2, 320>}]} {
    %cst = arith.constant 0.000000e+00 : f32
    %0 = vector.broadcast %cst : f32 to vector<2x2x4x420xf32>
    %c0 = arith.constant 0 : index
    %c0_0 = arith.constant 0 : index
    %c0_1 = arith.constant 0 : index
    %c0_2 = arith.constant 0 : index
    %1 = vector.load %arg4[%c0, %c0_0, %c0_1, %c0_2] : memref<2x2x4x420xf32, #tpu.memory_space<vmem>>, vector<2x2x4x420xf32>
    tpu.vector_store %arg4[%c0, %c0_0, %c0_1, %c0_2], %0 {strides = array<i32>} : memref<2x2x4x420xf32, #tpu.memory_space<vmem>>, vector<2x2x4x420xf32>,
    %c0_3 = arith.constant 0 : index
    %c0_4 = arith.constant 0 : index
    %c0_5 = arith.constant 0 : index
    %c0_6 = arith.constant 0 : index
    %2 = vector.load %arg1[%c0_3, %c0_4, %c0_5, %c0_6] : memref<2x2x4x256xf32, #tpu.memory_space<vmem>>, vector<2x2x4x16xf32>
    %c0_7 = arith.constant 0 : index
    %c0_8 = arith.constant 0 : index
    %c0_9 = arith.constant 0 : index
    %c42 = arith.constant 42 : index
    %3 = vector.load %arg4[%c0_7, %c0_8, %c0_9, %c42] : memref<2x2x4x420xf32, #tpu.memory_space<vmem>>, vector<2x2x4x16xf32>
    tpu.vector_store %arg4[%c0_7, %c0_8, %c0_9, %c42], %2 {strides = array<i32>} : memref<2x2x4x420xf32, #tpu.memory_space<vmem>>, vector<2x2x4x16xf32>,
    %c0_10 = arith.constant 0 : index
    %c0_11 = arith.constant 0 : index
    %c0_12 = arith.constant 0 : index
    %c16 = arith.constant 16 : index
    %4 = vector.load %arg1[%c0_10, %c0_11, %c0_12, %c16] : memref<2x2x4x256xf32, #tpu.memory_space<vmem>>, vector<2x2x4x16xf32>
    %c0_13 = arith.constant 0 : index
    %c0_14 = arith.constant 0 : index
    %c0_15 = arith.constant 0 : index
    %c62 = arith.constant 62 : index
    %5 = vector.load %arg4[%c0_13, %c0_14, %c0_15, %c62] : memref<2x2x4x420xf32, #tpu.memory_space<vmem>>, vector<2x2x4x16xf32>
    tpu.vector_store %arg4[%c0_13, %c0_14, %c0_15, %c62], %4 {strides = array<i32>} : memref<2x2x4x420xf32, #tpu.memory_space<vmem>>, vector<2x2x4x16xf32>,
    %c0_16 = arith.constant 0 : index
    %c0_17 = arith.constant 0 : index
    %c0_18 = arith.constant 0 : index
    %c32 = arith.constant 32 : index
    %6 = vector.load %arg1[%c0_16, %c0_17, %c0_18, %c32] : memref<2x2x4x256xf32, #tpu.memory_space<vmem>>, vector<2x2x4x16xf32>
    %c0_19 = arith.constant 0 : index
    %c0_20 = arith.constant 0 : index
    %c0_21 = arith.constant 0 : index
    %c82 = arith.constant 82 : index
    %7 = vector.load %arg4[%c0_19, %c0_20, %c0_21, %c82] : memref<2x2x4x420xf32, #tpu.memory_space<vmem>>, vector<2x2x4x16xf32>
    tpu.vector_store %arg4[%c0_19, %c0_20, %c0_21, %c82], %6 {strides = array<i32>} : memref<2x2x4x420xf32, #tpu.memory_space<vmem>>, vector<2x2x4x16xf32>,
    %c0_22 = arith.constant 0 : index
    %c0_23 = arith.constant 0 : index
    %c0_24 = arith.constant 0 : index
    %c48 = arith.constant 48 : index
    %8 = vector.load %arg1[%c0_22, %c0_23, %c0_24, %c48] : memref<2x2x4x256xf32, #tpu.memory_space<vmem>>, vector<2x2x4x16xf32>
    %c0_25 = arith.constant 0 : index
    %c0_26 = arith.constant 0 : index
    %c0_27 = arith.constant 0 : index
    %c102 = arith.constant 102 : index
    %9 = vector.load %arg4[%c0_25, %c0_26, %c0_27, %c102] : memref<2x2x4x420xf32, #tpu.memory_space<vmem>>, vector<2x2x4x16xf32>
    tpu.vector_store %arg4[%c0_25, %c0_26, %c0_27, %c102], %8 {strides = array<i32>} : memref<2x2x4x420xf32, #tpu.memory_space<vmem>>, vector<2x2x4x16xf32>,
    %c0_28 = arith.constant 0 : index
    %c0_29 = arith.constant 0 : index
    %c0_30 = arith.constant 0 : index
    %c64 = arith.constant 64 : index
    %10 = vector.load %arg1[%c0_28, %c0_29, %c0_30, %c64] : memref<2x2x4x256xf32, #tpu.memory_space<vmem>>, vector<2x2x4x16xf32>
    %c0_31 = arith.constant 0 : index
    %c0_32 = arith.constant 0 : index
    %c0_33 = arith.constant 0 : index
    %c122 = arith.constant 122 : index
    %11 = vector.load %arg4[%c0_31, %c0_32, %c0_33, %c122] : memref<2x2x4x420xf32, #tpu.memory_space<vmem>>, vector<2x2x4x16xf32>
    tpu.vector_store %arg4[%c0_31, %c0_32, %c0_33, %c122], %10 {strides = array<i32>} : memref<2x2x4x420xf32, #tpu.memory_space<vmem>>, vector<2x2x4x16xf32>,
    %c0_34 = arith.constant 0 : index
    %c0_35 = arith.constant 0 : index
    %c0_36 = arith.constant 0 : index
    %c80 = arith.constant 80 : index
    %12 = vector.load %arg1[%c0_34, %c0_35, %c0_36, %c80] : memref<2x2x4x256xf32, #tpu.memory_space<vmem>>, vector<2x2x4x16xf32>
    %c0_37 = arith.constant 0 : index
    %c0_38 = arith.constant 0 : index
    %c0_39 = arith.constant 0 : index
    %c142 = arith.constant 142 : index
    %13 = vector.load %arg4[%c0_37, %c0_38, %c0_39, %c142] : memref<2x2x4x420xf32, #tpu.memory_space<vmem>>, vector<2x2x4x16xf32>
    tpu.vector_store %arg4[%c0_37, %c0_38, %c0_39, %c142], %12 {strides = array<i32>} : memref<2x2x4x420xf32, #tpu.memory_space<vmem>>, vector<2x2x4x16xf32>,
    %c0_40 = arith.constant 0 : index
    %c0_41 = arith.constant 0 : index
    %c0_42 = arith.constant 0 : index
    %c96 = arith.constant 96 : index
    %14 = vector.load %arg1[%c0_40, %c0_41, %c0_42, %c96] : memref<2x2x4x256xf32, #tpu.memory_space<vmem>>, vector<2x2x4x16xf32>
    %c0_43 = arith.constant 0 : index
    %c0_44 = arith.constant 0 : index
    %c0_45 = arith.constant 0 : index
    %c162 = arith.constant 162 : index
    %15 = vector.load %arg4[%c0_43, %c0_44, %c0_45, %c162] : memref<2x2x4x420xf32, #tpu.memory_space<vmem>>, vector<2x2x4x16xf32>
    tpu.vector_store %arg4[%c0_43, %c0_44, %c0_45, %c162], %14 {strides = array<i32>} : memref<2x2x4x420xf32, #tpu.memory_space<vmem>>, vector<2x2x4x16xf32>,
    %c0_46 = arith.constant 0 : index
    %c0_47 = arith.constant 0 : index
    %c0_48 = arith.constant 0 : index
    %c112 = arith.constant 112 : index
    %16 = vector.load %arg1[%c0_46, %c0_47, %c0_48, %c112] : memref<2x2x4x256xf32, #tpu.memory_space<vmem>>, vector<2x2x4x16xf32>
    %c0_49 = arith.constant 0 : index
    %c0_50 = arith.constant 0 : index
    %c0_51 = arith.constant 0 : index
    %c182 = arith.constant 182 : index
    %17 = vector.load %arg4[%c0_49, %c0_50, %c0_51, %c182] : memref<2x2x4x420xf32, #tpu.memory_space<vmem>>, vector<2x2x4x16xf32>
    tpu.vector_store %arg4[%c0_49, %c0_50, %c0_51, %c182], %16 {strides = array<i32>} : memref<2x2x4x420xf32, #tpu.memory_space<vmem>>, vector<2x2x4x16xf32>,
    %c0_52 = arith.constant 0 : index
    %c0_53 = arith.constant 0 : index
    %c0_54 = arith.constant 0 : index
    %c128 = arith.constant 128 : index
    %18 = vector.load %arg1[%c0_52, %c0_53, %c0_54, %c128] : memref<2x2x4x256xf32, #tpu.memory_space<vmem>>, vector<2x2x4x16xf32>
    %c0_55 = arith.constant 0 : index
    %c0_56 = arith.constant 0 : index
    %c0_57 = arith.constant 0 : index
    %c202 = arith.constant 202 : index
    %19 = vector.load %arg4[%c0_55, %c0_56, %c0_57, %c202] : memref<2x2x4x420xf32, #tpu.memory_space<vmem>>, vector<2x2x4x16xf32>
    tpu.vector_store %arg4[%c0_55, %c0_56, %c0_57, %c202], %18 {strides = array<i32>} : memref<2x2x4x420xf32, #tpu.memory_space<vmem>>, vector<2x2x4x16xf32>,
    %c0_58 = arith.constant 0 : index
    %c0_59 = arith.constant 0 : index
    %c0_60 = arith.constant 0 : index
    %c144 = arith.constant 144 : index
    %20 = vector.load %arg1[%c0_58, %c0_59, %c0_60, %c144] : memref<2x2x4x256xf32, #tpu.memory_space<vmem>>, vector<2x2x4x16xf32>
    %c0_61 = arith.constant 0 : index
    %c0_62 = arith.constant 0 : index
    %c0_63 = arith.constant 0 : index
    %c222 = arith.constant 222 : index
    %21 = vector.load %arg4[%c0_61, %c0_62, %c0_63, %c222] : memref<2x2x4x420xf32, #tpu.memory_space<vmem>>, vector<2x2x4x16xf32>
    tpu.vector_store %arg4[%c0_61, %c0_62, %c0_63, %c222], %20 {strides = array<i32>} : memref<2x2x4x420xf32, #tpu.memory_space<vmem>>, vector<2x2x4x16xf32>,
    %c0_64 = arith.constant 0 : index
    %c0_65 = arith.constant 0 : index
    %c0_66 = arith.constant 0 : index
    %c160 = arith.constant 160 : index
    %22 = vector.load %arg1[%c0_64, %c0_65, %c0_66, %c160] : memref<2x2x4x256xf32, #tpu.memory_space<vmem>>, vector<2x2x4x16xf32>
    %c0_67 = arith.constant 0 : index
    %c0_68 = arith.constant 0 : index
    %c0_69 = arith.constant 0 : index
    %c242 = arith.constant 242 : index
    %23 = vector.load %arg4[%c0_67, %c0_68, %c0_69, %c242] : memref<2x2x4x420xf32, #tpu.memory_space<vmem>>, vector<2x2x4x16xf32>
    tpu.vector_store %arg4[%c0_67, %c0_68, %c0_69, %c242], %22 {strides = array<i32>} : memref<2x2x4x420xf32, #tpu.memory_space<vmem>>, vector<2x2x4x16xf32>,
    %c0_70 = arith.constant 0 : index
    %c0_71 = arith.constant 0 : index
    %c0_72 = arith.constant 0 : index
    %c176 = arith.constant 176 : index
    %24 = vector.load %arg1[%c0_70, %c0_71, %c0_72, %c176] : memref<2x2x4x256xf32, #tpu.memory_space<vmem>>, vector<2x2x4x16xf32>
    %c0_73 = arith.constant 0 : index
    %c0_74 = arith.constant 0 : index
    %c0_75 = arith.constant 0 : index
    %c262 = arith.constant 262 : index
    %25 = vector.load %arg4[%c0_73, %c0_74, %c0_75, %c262] : memref<2x2x4x420xf32, #tpu.memory_space<vmem>>, vector<2x2x4x16xf32>
    tpu.vector_store %arg4[%c0_73, %c0_74, %c0_75, %c262], %24 {strides = array<i32>} : memref<2x2x4x420xf32, #tpu.memory_space<vmem>>, vector<2x2x4x16xf32>,
    %c0_76 = arith.constant 0 : index
    %c0_77 = arith.constant 0 : index
    %c0_78 = arith.constant 0 : index
    %c192 = arith.constant 192 : index
    %26 = vector.load %arg1[%c0_76, %c0_77, %c0_78, %c192] : memref<2x2x4x256xf32, #tpu.memory_space<vmem>>, vector<2x2x4x16xf32>
    %c0_79 = arith.constant 0 : index
    %c0_80 = arith.constant 0 : index
    %c0_81 = arith.constant 0 : index
    %c282 = arith.constant 282 : index
    %27 = vector.load %arg4[%c0_79, %c0_80, %c0_81, %c282] : memref<2x2x4x420xf32, #tpu.memory_space<vmem>>, vector<2x2x4x16xf32>
    tpu.vector_store %arg4[%c0_79, %c0_80, %c0_81, %c282], %26 {strides = array<i32>} : memref<2x2x4x420xf32, #tpu.memory_space<vmem>>, vector<2x2x4x16xf32>,
    %c0_82 = arith.constant 0 : index
    %c0_83 = arith.constant 0 : index
    %c0_84 = arith.constant 0 : index
    %c208 = arith.constant 208 : index
    %28 = vector.load %arg1[%c0_82, %c0_83, %c0_84, %c208] : memref<2x2x4x256xf32, #tpu.memory_space<vmem>>, vector<2x2x4x16xf32>
    %c0_85 = arith.constant 0 : index
    %c0_86 = arith.constant 0 : index
    %c0_87 = arith.constant 0 : index
    %c302 = arith.constant 302 : index
    %29 = vector.load %arg4[%c0_85, %c0_86, %c0_87, %c302] : memref<2x2x4x420xf32, #tpu.memory_space<vmem>>, vector<2x2x4x16xf32>
    tpu.vector_store %arg4[%c0_85, %c0_86, %c0_87, %c302], %28 {strides = array<i32>} : memref<2x2x4x420xf32, #tpu.memory_space<vmem>>, vector<2x2x4x16xf32>,
    %c0_88 = arith.constant 0 : index
    %c0_89 = arith.constant 0 : index
    %c0_90 = arith.constant 0 : index
    %c224 = arith.constant 224 : index
    %30 = vector.load %arg1[%c0_88, %c0_89, %c0_90, %c224] : memref<2x2x4x256xf32, #tpu.memory_space<vmem>>, vector<2x2x4x16xf32>
    %c0_91 = arith.constant 0 : index
    %c0_92 = arith.constant 0 : index
    %c0_93 = arith.constant 0 : index
    %c322 = arith.constant 322 : index
    %31 = vector.load %arg4[%c0_91, %c0_92, %c0_93, %c322] : memref<2x2x4x420xf32, #tpu.memory_space<vmem>>, vector<2x2x4x16xf32>
    tpu.vector_store %arg4[%c0_91, %c0_92, %c0_93, %c322], %30 {strides = array<i32>} : memref<2x2x4x420xf32, #tpu.memory_space<vmem>>, vector<2x2x4x16xf32>,
    %c0_94 = arith.constant 0 : index
    %c0_95 = arith.constant 0 : index
    %c0_96 = arith.constant 0 : index
    %c240 = arith.constant 240 : index
    %32 = vector.load %arg1[%c0_94, %c0_95, %c0_96, %c240] : memref<2x2x4x256xf32, #tpu.memory_space<vmem>>, vector<2x2x4x16xf32>
    %c0_97 = arith.constant 0 : index
    %c0_98 = arith.constant 0 : index
    %c0_99 = arith.constant 0 : index
    %c342 = arith.constant 342 : index
    %33 = vector.load %arg4[%c0_97, %c0_98, %c0_99, %c342] : memref<2x2x4x420xf32, #tpu.memory_space<vmem>>, vector<2x2x4x16xf32>
    tpu.vector_store %arg4[%c0_97, %c0_98, %c0_99, %c342], %32 {strides = array<i32>} : memref<2x2x4x420xf32, #tpu.memory_space<vmem>>, vector<2x2x4x16xf32>,
    %c0_100 = arith.constant 0 : index
    %c0_101 = arith.constant 0 : index
    %c0_102 = arith.constant 0 : index
    %c0_103 = arith.constant 0 : index
    %34 = vector.load %arg2[%c0_100, %c0_101, %c0_102, %c0_103] : memref<25x2x4x1xf32, #tpu.memory_space<vmem>>, vector<25x2x4x1xf32>
    %cst_104 = arith.constant 1.000000e-03 : f32
    %35 = vector.broadcast %cst_104 : f32 to vector<25x2x4x1xf32>
    %36 = arith.mulf %34, %35 : vector<25x2x4x1xf32>
    %c0_105 = arith.constant 0 : index
    %c0_106 = arith.constant 0 : index
    %c0_107 = arith.constant 0 : index
    %c0_108 = arith.constant 0 : index
    %37 = vector.load %arg4[%c0_105, %c0_106, %c0_107, %c0_108] : memref<2x2x4x420xf32, #tpu.memory_space<vmem>>, vector<2x2x4x320xf32>
    %38 = vector.extract_strided_slice %36 {offsets = [0, 0, 0, 0], sizes = [1, 2, 4, 1], strides = [1, 1, 1, 1]} : vector<25x2x4x1xf32> to vector<1x2x4x1xf32>
    %39 = vector.shape_cast %38 : vector<1x2x4x1xf32> to vector<2x4x1xf32>
    %40 = vector.shape_cast %39 : vector<2x4x1xf32> to vector<1x2x4x1xf32>
    %41 = vector.broadcast %40 : vector<1x2x4x1xf32> to vector<2x2x4x320xf32>
    %42 = arith.mulf %37, %41 : vector<2x2x4x320xf32>
    %c0_109 = arith.constant 0 : index
    %c0_110 = arith.constant 0 : index
    %c0_111 = arith.constant 0 : index
    %c1 = arith.constant 1 : index
    %43 = vector.load %arg4[%c0_109, %c0_110, %c0_111, %c1] : memref<2x2x4x420xf32, #tpu.memory_space<vmem>>, vector<2x2x4x320xf32>
    %44 = vector.extract_strided_slice %36 {offsets = [1, 0, 0, 0], sizes = [1, 2, 4, 1], strides = [1, 1, 1, 1]} : vector<25x2x4x1xf32> to vector<1x2x4x1xf32>
    %45 = vector.shape_cast %44 : vector<1x2x4x1xf32> to vector<2x4x1xf32>
    %46 = vector.shape_cast %45 : vector<2x4x1xf32> to vector<1x2x4x1xf32>
    %47 = vector.broadcast %46 : vector<1x2x4x1xf32> to vector<2x2x4x320xf32>
    %48 = arith.mulf %43, %47 : vector<2x2x4x320xf32>
    %49 = arith.addf %42, %48 : vector<2x2x4x320xf32>
    %c0_112 = arith.constant 0 : index
    %c0_113 = arith.constant 0 : index
    %c0_114 = arith.constant 0 : index
    %c2 = arith.constant 2 : index
    %50 = vector.load %arg4[%c0_112, %c0_113, %c0_114, %c2] : memref<2x2x4x420xf32, #tpu.memory_space<vmem>>, vector<2x2x4x320xf32>
    %51 = vector.extract_strided_slice %36 {offsets = [2, 0, 0, 0], sizes = [1, 2, 4, 1], strides = [1, 1, 1, 1]} : vector<25x2x4x1xf32> to vector<1x2x4x1xf32>
    %52 = vector.shape_cast %51 : vector<1x2x4x1xf32> to vector<2x4x1xf32>
    %53 = vector.shape_cast %52 : vector<2x4x1xf32> to vector<1x2x4x1xf32>
    %54 = vector.broadcast %53 : vector<1x2x4x1xf32> to vector<2x2x4x320xf32>
    %55 = arith.mulf %50, %54 : vector<2x2x4x320xf32>
    %56 = arith.addf %49, %55 : vector<2x2x4x320xf32>
    %c0_115 = arith.constant 0 : index
    %c0_116 = arith.constant 0 : index
    %c0_117 = arith.constant 0 : index
    %c3 = arith.constant 3 : index
    %57 = vector.load %arg4[%c0_115, %c0_116, %c0_117, %c3] : memref<2x2x4x420xf32, #tpu.memory_space<vmem>>, vector<2x2x4x320xf32>
    %58 = vector.extract_strided_slice %36 {offsets = [3, 0, 0, 0], sizes = [1, 2, 4, 1], strides = [1, 1, 1, 1]} : vector<25x2x4x1xf32> to vector<1x2x4x1xf32>
    %59 = vector.shape_cast %58 : vector<1x2x4x1xf32> to vector<2x4x1xf32>
    %60 = vector.shape_cast %59 : vector<2x4x1xf32> to vector<1x2x4x1xf32>
    %61 = vector.broadcast %60 : vector<1x2x4x1xf32> to vector<2x2x4x320xf32>
    %62 = arith.mulf %57, %61 : vector<2x2x4x320xf32>
    %63 = arith.addf %56, %62 : vector<2x2x4x320xf32>
    %c0_118 = arith.constant 0 : index
    %c0_119 = arith.constant 0 : index
    %c0_120 = arith.constant 0 : index
    %c4 = arith.constant 4 : index
    %64 = vector.load %arg4[%c0_118, %c0_119, %c0_120, %c4] : memref<2x2x4x420xf32, #tpu.memory_space<vmem>>, vector<2x2x4x320xf32>
    %65 = vector.extract_strided_slice %36 {offsets = [4, 0, 0, 0], sizes = [1, 2, 4, 1], strides = [1, 1, 1, 1]} : vector<25x2x4x1xf32> to vector<1x2x4x1xf32>
    %66 = vector.shape_cast %65 : vector<1x2x4x1xf32> to vector<2x4x1xf32>
    %67 = vector.shape_cast %66 : vector<2x4x1xf32> to vector<1x2x4x1xf32>
    %68 = vector.broadcast %67 : vector<1x2x4x1xf32> to vector<2x2x4x320xf32>
    %69 = arith.mulf %64, %68 : vector<2x2x4x320xf32>
    %70 = arith.addf %63, %69 : vector<2x2x4x320xf32>
    %c0_121 = arith.constant 0 : index
    %c0_122 = arith.constant 0 : index
    %c0_123 = arith.constant 0 : index
    %c20 = arith.constant 20 : index
    %71 = vector.load %arg4[%c0_121, %c0_122, %c0_123, %c20] : memref<2x2x4x420xf32, #tpu.memory_space<vmem>>, vector<2x2x4x320xf32>
    %72 = vector.extract_strided_slice %36 {offsets = [5, 0, 0, 0], sizes = [1, 2, 4, 1], strides = [1, 1, 1, 1]} : vector<25x2x4x1xf32> to vector<1x2x4x1xf32>
    %73 = vector.shape_cast %72 : vector<1x2x4x1xf32> to vector<2x4x1xf32>
    %74 = vector.shape_cast %73 : vector<2x4x1xf32> to vector<1x2x4x1xf32>
    %75 = vector.broadcast %74 : vector<1x2x4x1xf32> to vector<2x2x4x320xf32>
    %76 = arith.mulf %71, %75 : vector<2x2x4x320xf32>
    %77 = arith.addf %70, %76 : vector<2x2x4x320xf32>
    %c0_124 = arith.constant 0 : index
    %c0_125 = arith.constant 0 : index
    %c0_126 = arith.constant 0 : index
    %c21 = arith.constant 21 : index
    %78 = vector.load %arg4[%c0_124, %c0_125, %c0_126, %c21] : memref<2x2x4x420xf32, #tpu.memory_space<vmem>>, vector<2x2x4x320xf32>
    %79 = vector.extract_strided_slice %36 {offsets = [6, 0, 0, 0], sizes = [1, 2, 4, 1], strides = [1, 1, 1, 1]} : vector<25x2x4x1xf32> to vector<1x2x4x1xf32>
    %80 = vector.shape_cast %79 : vector<1x2x4x1xf32> to vector<2x4x1xf32>
    %81 = vector.shape_cast %80 : vector<2x4x1xf32> to vector<1x2x4x1xf32>
    %82 = vector.broadcast %81 : vector<1x2x4x1xf32> to vector<2x2x4x320xf32>
    %83 = arith.mulf %78, %82 : vector<2x2x4x320xf32>
    %84 = arith.addf %77, %83 : vector<2x2x4x320xf32>
    %c0_127 = arith.constant 0 : index
    %c0_128 = arith.constant 0 : index
    %c0_129 = arith.constant 0 : index
    %c22 = arith.constant 22 : index
    %85 = vector.load %arg4[%c0_127, %c0_128, %c0_129, %c22] : memref<2x2x4x420xf32, #tpu.memory_space<vmem>>, vector<2x2x4x320xf32>
    %86 = vector.extract_strided_slice %36 {offsets = [7, 0, 0, 0], sizes = [1, 2, 4, 1], strides = [1, 1, 1, 1]} : vector<25x2x4x1xf32> to vector<1x2x4x1xf32>
    %87 = vector.shape_cast %86 : vector<1x2x4x1xf32> to vector<2x4x1xf32>
    %88 = vector.shape_cast %87 : vector<2x4x1xf32> to vector<1x2x4x1xf32>
    %89 = vector.broadcast %88 : vector<1x2x4x1xf32> to vector<2x2x4x320xf32>
    %90 = arith.mulf %85, %89 : vector<2x2x4x320xf32>
    %91 = arith.addf %84, %90 : vector<2x2x4x320xf32>
    %c0_130 = arith.constant 0 : index
    %c0_131 = arith.constant 0 : index
    %c0_132 = arith.constant 0 : index
    %c23 = arith.constant 23 : index
    %92 = vector.load %arg4[%c0_130, %c0_131, %c0_132, %c23] : memref<2x2x4x420xf32, #tpu.memory_space<vmem>>, vector<2x2x4x320xf32>
    %93 = vector.extract_strided_slice %36 {offsets = [8, 0, 0, 0], sizes = [1, 2, 4, 1], strides = [1, 1, 1, 1]} : vector<25x2x4x1xf32> to vector<1x2x4x1xf32>
    %94 = vector.shape_cast %93 : vector<1x2x4x1xf32> to vector<2x4x1xf32>
    %95 = vector.shape_cast %94 : vector<2x4x1xf32> to vector<1x2x4x1xf32>
    %96 = vector.broadcast %95 : vector<1x2x4x1xf32> to vector<2x2x4x320xf32>
    %97 = arith.mulf %92, %96 : vector<2x2x4x320xf32>
    %98 = arith.addf %91, %97 : vector<2x2x4x320xf32>
    %c0_133 = arith.constant 0 : index
    %c0_134 = arith.constant 0 : index
    %c0_135 = arith.constant 0 : index
    %c24 = arith.constant 24 : index
    %99 = vector.load %arg4[%c0_133, %c0_134, %c0_135, %c24] : memref<2x2x4x420xf32, #tpu.memory_space<vmem>>, vector<2x2x4x320xf32>
    %100 = vector.extract_strided_slice %36 {offsets = [9, 0, 0, 0], sizes = [1, 2, 4, 1], strides = [1, 1, 1, 1]} : vector<25x2x4x1xf32> to vector<1x2x4x1xf32>
    %101 = vector.shape_cast %100 : vector<1x2x4x1xf32> to vector<2x4x1xf32>
    %102 = vector.shape_cast %101 : vector<2x4x1xf32> to vector<1x2x4x1xf32>
    %103 = vector.broadcast %102 : vector<1x2x4x1xf32> to vector<2x2x4x320xf32>
    %104 = arith.mulf %99, %103 : vector<2x2x4x320xf32>
    %105 = arith.addf %98, %104 : vector<2x2x4x320xf32>
    %c0_136 = arith.constant 0 : index
    %c0_137 = arith.constant 0 : index
    %c0_138 = arith.constant 0 : index
    %c40 = arith.constant 40 : index
    %106 = vector.load %arg4[%c0_136, %c0_137, %c0_138, %c40] : memref<2x2x4x420xf32, #tpu.memory_space<vmem>>, vector<2x2x4x320xf32>
    %107 = vector.extract_strided_slice %36 {offsets = [10, 0, 0, 0], sizes = [1, 2, 4, 1], strides = [1, 1, 1, 1]} : vector<25x2x4x1xf32> to vector<1x2x4x1xf32>
    %108 = vector.shape_cast %107 : vector<1x2x4x1xf32> to vector<2x4x1xf32>
    %109 = vector.shape_cast %108 : vector<2x4x1xf32> to vector<1x2x4x1xf32>
    %110 = vector.broadcast %109 : vector<1x2x4x1xf32> to vector<2x2x4x320xf32>
    %111 = arith.mulf %106, %110 : vector<2x2x4x320xf32>
    %112 = arith.addf %105, %111 : vector<2x2x4x320xf32>
    %c0_139 = arith.constant 0 : index
    %c0_140 = arith.constant 0 : index
    %c0_141 = arith.constant 0 : index
    %c41 = arith.constant 41 : index
    %113 = vector.load %arg4[%c0_139, %c0_140, %c0_141, %c41] : memref<2x2x4x420xf32, #tpu.memory_space<vmem>>, vector<2x2x4x320xf32>
    %114 = vector.extract_strided_slice %36 {offsets = [11, 0, 0, 0], sizes = [1, 2, 4, 1], strides = [1, 1, 1, 1]} : vector<25x2x4x1xf32> to vector<1x2x4x1xf32>
    %115 = vector.shape_cast %114 : vector<1x2x4x1xf32> to vector<2x4x1xf32>
    %116 = vector.shape_cast %115 : vector<2x4x1xf32> to vector<1x2x4x1xf32>
    %117 = vector.broadcast %116 : vector<1x2x4x1xf32> to vector<2x2x4x320xf32>
    %118 = arith.mulf %113, %117 : vector<2x2x4x320xf32>
    %119 = arith.addf %112, %118 : vector<2x2x4x320xf32>
    %c0_142 = arith.constant 0 : index
    %c0_143 = arith.constant 0 : index
    %c0_144 = arith.constant 0 : index
    %c42_145 = arith.constant 42 : index
    %120 = vector.load %arg4[%c0_142, %c0_143, %c0_144, %c42_145] : memref<2x2x4x420xf32, #tpu.memory_space<vmem>>, vector<2x2x4x320xf32>
    %121 = vector.extract_strided_slice %36 {offsets = [12, 0, 0, 0], sizes = [1, 2, 4, 1], strides = [1, 1, 1, 1]} : vector<25x2x4x1xf32> to vector<1x2x4x1xf32>
    %122 = vector.shape_cast %121 : vector<1x2x4x1xf32> to vector<2x4x1xf32>
    %123 = vector.shape_cast %122 : vector<2x4x1xf32> to vector<1x2x4x1xf32>
    %124 = vector.broadcast %123 : vector<1x2x4x1xf32> to vector<2x2x4x320xf32>
    %125 = arith.mulf %120, %124 : vector<2x2x4x320xf32>
    %126 = arith.addf %119, %125 : vector<2x2x4x320xf32>
    %c0_146 = arith.constant 0 : index
    %c0_147 = arith.constant 0 : index
    %c0_148 = arith.constant 0 : index
    %c43 = arith.constant 43 : index
    %127 = vector.load %arg4[%c0_146, %c0_147, %c0_148, %c43] : memref<2x2x4x420xf32, #tpu.memory_space<vmem>>, vector<2x2x4x320xf32>
    %128 = vector.extract_strided_slice %36 {offsets = [13, 0, 0, 0], sizes = [1, 2, 4, 1], strides = [1, 1, 1, 1]} : vector<25x2x4x1xf32> to vector<1x2x4x1xf32>
    %129 = vector.shape_cast %128 : vector<1x2x4x1xf32> to vector<2x4x1xf32>
    %130 = vector.shape_cast %129 : vector<2x4x1xf32> to vector<1x2x4x1xf32>
    %131 = vector.broadcast %130 : vector<1x2x4x1xf32> to vector<2x2x4x320xf32>
    %132 = arith.mulf %127, %131 : vector<2x2x4x320xf32>
    %133 = arith.addf %126, %132 : vector<2x2x4x320xf32>
    %c0_149 = arith.constant 0 : index
    %c0_150 = arith.constant 0 : index
    %c0_151 = arith.constant 0 : index
    %c44 = arith.constant 44 : index
    %134 = vector.load %arg4[%c0_149, %c0_150, %c0_151, %c44] : memref<2x2x4x420xf32, #tpu.memory_space<vmem>>, vector<2x2x4x320xf32>
    %135 = vector.extract_strided_slice %36 {offsets = [14, 0, 0, 0], sizes = [1, 2, 4, 1], strides = [1, 1, 1, 1]} : vector<25x2x4x1xf32> to vector<1x2x4x1xf32>
    %136 = vector.shape_cast %135 : vector<1x2x4x1xf32> to vector<2x4x1xf32>
    %137 = vector.shape_cast %136 : vector<2x4x1xf32> to vector<1x2x4x1xf32>
    %138 = vector.broadcast %137 : vector<1x2x4x1xf32> to vector<2x2x4x320xf32>
    %139 = arith.mulf %134, %138 : vector<2x2x4x320xf32>
    %140 = arith.addf %133, %139 : vector<2x2x4x320xf32>
    %c0_152 = arith.constant 0 : index
    %c0_153 = arith.constant 0 : index
    %c0_154 = arith.constant 0 : index
    %c60 = arith.constant 60 : index
    %141 = vector.load %arg4[%c0_152, %c0_153, %c0_154, %c60] : memref<2x2x4x420xf32, #tpu.memory_space<vmem>>, vector<2x2x4x320xf32>
    %142 = vector.extract_strided_slice %36 {offsets = [15, 0, 0, 0], sizes = [1, 2, 4, 1], strides = [1, 1, 1, 1]} : vector<25x2x4x1xf32> to vector<1x2x4x1xf32>
    %143 = vector.shape_cast %142 : vector<1x2x4x1xf32> to vector<2x4x1xf32>
    %144 = vector.shape_cast %143 : vector<2x4x1xf32> to vector<1x2x4x1xf32>
    %145 = vector.broadcast %144 : vector<1x2x4x1xf32> to vector<2x2x4x320xf32>
    %146 = arith.mulf %141, %145 : vector<2x2x4x320xf32>
    %147 = arith.addf %140, %146 : vector<2x2x4x320xf32>
    %c0_155 = arith.constant 0 : index
    %c0_156 = arith.constant 0 : index
    %c0_157 = arith.constant 0 : index
    %c61 = arith.constant 61 : index
    %148 = vector.load %arg4[%c0_155, %c0_156, %c0_157, %c61] : memref<2x2x4x420xf32, #tpu.memory_space<vmem>>, vector<2x2x4x320xf32>
    %149 = vector.extract_strided_slice %36 {offsets = [16, 0, 0, 0], sizes = [1, 2, 4, 1], strides = [1, 1, 1, 1]} : vector<25x2x4x1xf32> to vector<1x2x4x1xf32>
    %150 = vector.shape_cast %149 : vector<1x2x4x1xf32> to vector<2x4x1xf32>
    %151 = vector.shape_cast %150 : vector<2x4x1xf32> to vector<1x2x4x1xf32>
    %152 = vector.broadcast %151 : vector<1x2x4x1xf32> to vector<2x2x4x320xf32>
    %153 = arith.mulf %148, %152 : vector<2x2x4x320xf32>
    %154 = arith.addf %147, %153 : vector<2x2x4x320xf32>
    %c0_158 = arith.constant 0 : index
    %c0_159 = arith.constant 0 : index
    %c0_160 = arith.constant 0 : index
    %c62_161 = arith.constant 62 : index
    %155 = vector.load %arg4[%c0_158, %c0_159, %c0_160, %c62_161] : memref<2x2x4x420xf32, #tpu.memory_space<vmem>>, vector<2x2x4x320xf32>
    %156 = vector.extract_strided_slice %36 {offsets = [17, 0, 0, 0], sizes = [1, 2, 4, 1], strides = [1, 1, 1, 1]} : vector<25x2x4x1xf32> to vector<1x2x4x1xf32>
    %157 = vector.shape_cast %156 : vector<1x2x4x1xf32> to vector<2x4x1xf32>
    %158 = vector.shape_cast %157 : vector<2x4x1xf32> to vector<1x2x4x1xf32>
    %159 = vector.broadcast %158 : vector<1x2x4x1xf32> to vector<2x2x4x320xf32>
    %160 = arith.mulf %155, %159 : vector<2x2x4x320xf32>
    %161 = arith.addf %154, %160 : vector<2x2x4x320xf32>
    %c0_162 = arith.constant 0 : index
    %c0_163 = arith.constant 0 : index
    %c0_164 = arith.constant 0 : index
    %c63 = arith.constant 63 : index
    %162 = vector.load %arg4[%c0_162, %c0_163, %c0_164, %c63] : memref<2x2x4x420xf32, #tpu.memory_space<vmem>>, vector<2x2x4x320xf32>
    %163 = vector.extract_strided_slice %36 {offsets = [18, 0, 0, 0], sizes = [1, 2, 4, 1], strides = [1, 1, 1, 1]} : vector<25x2x4x1xf32> to vector<1x2x4x1xf32>
    %164 = vector.shape_cast %163 : vector<1x2x4x1xf32> to vector<2x4x1xf32>
    %165 = vector.shape_cast %164 : vector<2x4x1xf32> to vector<1x2x4x1xf32>
    %166 = vector.broadcast %165 : vector<1x2x4x1xf32> to vector<2x2x4x320xf32>
    %167 = arith.mulf %162, %166 : vector<2x2x4x320xf32>
    %168 = arith.addf %161, %167 : vector<2x2x4x320xf32>
    %c0_165 = arith.constant 0 : index
    %c0_166 = arith.constant 0 : index
    %c0_167 = arith.constant 0 : index
    %c64_168 = arith.constant 64 : index
    %169 = vector.load %arg4[%c0_165, %c0_166, %c0_167, %c64_168] : memref<2x2x4x420xf32, #tpu.memory_space<vmem>>, vector<2x2x4x320xf32>
    %170 = vector.extract_strided_slice %36 {offsets = [19, 0, 0, 0], sizes = [1, 2, 4, 1], strides = [1, 1, 1, 1]} : vector<25x2x4x1xf32> to vector<1x2x4x1xf32>
    %171 = vector.shape_cast %170 : vector<1x2x4x1xf32> to vector<2x4x1xf32>
    %172 = vector.shape_cast %171 : vector<2x4x1xf32> to vector<1x2x4x1xf32>
    %173 = vector.broadcast %172 : vector<1x2x4x1xf32> to vector<2x2x4x320xf32>
    %174 = arith.mulf %169, %173 : vector<2x2x4x320xf32>
    %175 = arith.addf %168, %174 : vector<2x2x4x320xf32>
    %c0_169 = arith.constant 0 : index
    %c0_170 = arith.constant 0 : index
    %c0_171 = arith.constant 0 : index
    %c80_172 = arith.constant 80 : index
    %176 = vector.load %arg4[%c0_169, %c0_170, %c0_171, %c80_172] : memref<2x2x4x420xf32, #tpu.memory_space<vmem>>, vector<2x2x4x320xf32>
    %177 = vector.extract_strided_slice %36 {offsets = [20, 0, 0, 0], sizes = [1, 2, 4, 1], strides = [1, 1, 1, 1]} : vector<25x2x4x1xf32> to vector<1x2x4x1xf32>
    %178 = vector.shape_cast %177 : vector<1x2x4x1xf32> to vector<2x4x1xf32>
    %179 = vector.shape_cast %178 : vector<2x4x1xf32> to vector<1x2x4x1xf32>
    %180 = vector.broadcast %179 : vector<1x2x4x1xf32> to vector<2x2x4x320xf32>
    %181 = arith.mulf %176, %180 : vector<2x2x4x320xf32>
    %182 = arith.addf %175, %181 : vector<2x2x4x320xf32>
    %c0_173 = arith.constant 0 : index
    %c0_174 = arith.constant 0 : index
    %c0_175 = arith.constant 0 : index
    %c81 = arith.constant 81 : index
    %183 = vector.load %arg4[%c0_173, %c0_174, %c0_175, %c81] : memref<2x2x4x420xf32, #tpu.memory_space<vmem>>, vector<2x2x4x320xf32>
    %184 = vector.extract_strided_slice %36 {offsets = [21, 0, 0, 0], sizes = [1, 2, 4, 1], strides = [1, 1, 1, 1]} : vector<25x2x4x1xf32> to vector<1x2x4x1xf32>
    %185 = vector.shape_cast %184 : vector<1x2x4x1xf32> to vector<2x4x1xf32>
    %186 = vector.shape_cast %185 : vector<2x4x1xf32> to vector<1x2x4x1xf32>
    %187 = vector.broadcast %186 : vector<1x2x4x1xf32> to vector<2x2x4x320xf32>
    %188 = arith.mulf %183, %187 : vector<2x2x4x320xf32>
    %189 = arith.addf %182, %188 : vector<2x2x4x320xf32>
    %c0_176 = arith.constant 0 : index
    %c0_177 = arith.constant 0 : index
    %c0_178 = arith.constant 0 : index
    %c82_179 = arith.constant 82 : index
    %190 = vector.load %arg4[%c0_176, %c0_177, %c0_178, %c82_179] : memref<2x2x4x420xf32, #tpu.memory_space<vmem>>, vector<2x2x4x320xf32>
    %191 = vector.extract_strided_slice %36 {offsets = [22, 0, 0, 0], sizes = [1, 2, 4, 1], strides = [1, 1, 1, 1]} : vector<25x2x4x1xf32> to vector<1x2x4x1xf32>
    %192 = vector.shape_cast %191 : vector<1x2x4x1xf32> to vector<2x4x1xf32>
    %193 = vector.shape_cast %192 : vector<2x4x1xf32> to vector<1x2x4x1xf32>
    %194 = vector.broadcast %193 : vector<1x2x4x1xf32> to vector<2x2x4x320xf32>
    %195 = arith.mulf %190, %194 : vector<2x2x4x320xf32>
    %196 = arith.addf %189, %195 : vector<2x2x4x320xf32>
    %c0_180 = arith.constant 0 : index
    %c0_181 = arith.constant 0 : index
    %c0_182 = arith.constant 0 : index
    %c83 = arith.constant 83 : index
    %197 = vector.load %arg4[%c0_180, %c0_181, %c0_182, %c83] : memref<2x2x4x420xf32, #tpu.memory_space<vmem>>, vector<2x2x4x320xf32>
    %198 = vector.extract_strided_slice %36 {offsets = [23, 0, 0, 0], sizes = [1, 2, 4, 1], strides = [1, 1, 1, 1]} : vector<25x2x4x1xf32> to vector<1x2x4x1xf32>
    %199 = vector.shape_cast %198 : vector<1x2x4x1xf32> to vector<2x4x1xf32>
    %200 = vector.shape_cast %199 : vector<2x4x1xf32> to vector<1x2x4x1xf32>
    %201 = vector.broadcast %200 : vector<1x2x4x1xf32> to vector<2x2x4x320xf32>
    %202 = arith.mulf %197, %201 : vector<2x2x4x320xf32>
    %203 = arith.addf %196, %202 : vector<2x2x4x320xf32>
    %c0_183 = arith.constant 0 : index
    %c0_184 = arith.constant 0 : index
    %c0_185 = arith.constant 0 : index
    %c84 = arith.constant 84 : index
    %204 = vector.load %arg4[%c0_183, %c0_184, %c0_185, %c84] : memref<2x2x4x420xf32, #tpu.memory_space<vmem>>, vector<2x2x4x320xf32>
    %205 = vector.extract_strided_slice %36 {offsets = [24, 0, 0, 0], sizes = [1, 2, 4, 1], strides = [1, 1, 1, 1]} : vector<25x2x4x1xf32> to vector<1x2x4x1xf32>
    %206 = vector.shape_cast %205 : vector<1x2x4x1xf32> to vector<2x4x1xf32>
    %207 = vector.shape_cast %206 : vector<2x4x1xf32> to vector<1x2x4x1xf32>
    %208 = vector.broadcast %207 : vector<1x2x4x1xf32> to vector<2x2x4x320xf32>
    %209 = arith.mulf %204, %208 : vector<2x2x4x320xf32>
    %210 = arith.addf %203, %209 : vector<2x2x4x320xf32>
    %cst_186 = arith.constant dense<0.000000e+00> : vector<2x2x320xf32>
    %211 = vector.multi_reduction <add>, %210, %cst_186 [2] : vector<2x2x4x320xf32> to vector<2x2x320xf32>
    %c0_187 = arith.constant 0 : index
    %c0_188 = arith.constant 0 : index
    %c0_189 = arith.constant 0 : index
    %212 = vector.load %arg3[%c0_187, %c0_188, %c0_189] : memref<2x2x320xf32, #tpu.memory_space<vmem>>, vector<2x2x320xf32>
    tpu.vector_store %arg3[%c0_187, %c0_188, %c0_189], %211 {strides = array<i32>} : memref<2x2x320xf32, #tpu.memory_space<vmem>>, vector<2x2x320xf32>,
    return
  }
  func.func @transform_0(%arg0: i32) -> (i32, i32, i32, i32) {
    %c0_i32 = arith.constant 0 : i32
    %c0_i32_0 = arith.constant 0 : i32
    %c0_i32_1 = arith.constant 0 : i32
    %c0_i32_2 = arith.constant 0 : i32
    return %arg0, %c0_i32, %c0_i32_0, %c0_i32_1 : i32, i32, i32, i32
  }
  func.func @transform_1(%arg0: i32) -> (i32, i32, i32, i32) {
    %c0_i32 = arith.constant 0 : i32
    %c0_i32_0 = arith.constant 0 : i32
    %c0_i32_1 = arith.constant 0 : i32
    %c0_i32_2 = arith.constant 0 : i32
    %c0_i32_3 = arith.constant 0 : i32
    return %c0_i32, %c0_i32_0, %c0_i32_1, %c0_i32_2 : i32, i32, i32, i32
  }
  func.func @transform_2(%arg0: i32) -> (i32, i32, i32) {
    %c0_i32 = arith.constant 0 : i32
    %c0_i32_0 = arith.constant 0 : i32
    %c0_i32_1 = arith.constant 0 : i32
    return %arg0, %c0_i32, %c0_i32_0 : i32, i32, i32
  }
}

</mosaic_0001>

<bundles_post_ra>
// kernel: tpu_custom_call.1
= control target key start
LH: loop header
LB: loop body
LE: loop exit
PB: predicated region body
PF: predicated region fallthrough
CT: control target
= control target key end

     0   :  { %7 = vsyncpa [#allocation4], 0  ;;  %s4925_s0 = inlined_call_operand.vmem [shape: f32[4,2,4,256], index: 0, kind: input, shape index: {}]   ;;  %s4926_s1 = inlined_call_operand.vmem [shape: f32[25,2,4,1], index: 1, kind: input, shape index: {}]   ;;  %s4927_s2 = inlined_call_operand.hbm [shape: f32[4,2,320], index: 2, kind: output, shape index: {}]  }
   0x1   :  { %9 = vsyncpa [#allocation4 + $0x1], 0  ;;  %s3402_s9 = smov 0   ;;  %s3404_s10 = smov 0  }
   0x2   :  { %s3406_s11 = smov 0   ;;  %s3408_s12 = smov 0  }
   0x3 LB: > { %s3423_s13 = sadd.s32 4294967295, %s3341_s12   ;;  %s3164_s14 = sadd.s32 4294967294, %s3341_s12   ;;  %s3341_s12 = sphi %s3408_s12, %s5205_s12   ;;  %s3337_s11 = sphi %s3406_s11, %s5204_s11   ;;  %s3333_s10 = sphi %s3404_s10, %s5203_s10   ;;  %s3329_s9 = sphi %s3402_s9, %s5202_s9  }
   0x4   : > { %s3427_s15 = sadd.s32 1, %s3341_s12   ;;  %s69_s16 = sadd.s32 1, %s3337_s11 }
   0x5   : > { %s66_s17 = ssub.s32 %s3341_s12, %s3427_s15  ;;  %p79_p0 = scmp.ne.s32.totalorder %s3337_s11, %s3333_s10 }
   0x6   : > { %p67_p1 = scmp.eq.s32.totalorder %s66_s17, 0  ;;  %p80_p2 = scmp.eq.s32.totalorder %s3423_s13, 1 }
   0x7   : > { %p85_p3 = scmp.ne.s32.totalorder %s3333_s10, %s3329_s9  ;;  %p86_p4 = scmp.eq.s32.totalorder %s3164_s14, 1 }
   0x8   : > { %s3438_s18 = scalar_select %p67_p1, %s3337_s11, %s69_s16  }
   0x9   : > { %p3440_p5 = por %p80_p2, %p79_p0  ;;  %p3444_p6 = por %p86_p4, %p85_p3 }
   0xa   : > { %p3167_p7 = scmp.ge.s32.totalorder %s3341_s12, 1  ;;  %p117_p8 = scmp.lt.s32.totalorder %s3341_s12, 3 }
   0xc   : > { %p118_p9 = pnand %p3167_p7, %p117_p8 }
   0xe   : > { %121 = sbr.rel (%p118_p9) target bundleno = 3083 (0xc0b), region = 28 }
  0x15   : > { %s3168_s21 = sshll.u32 %s3423_s13, 1  ;;  %v3343_v0 = vmov 0.0   ;;  %v3344_v3 = vmov 0   ;;  %s3345_s26 = smov 42   ;;  %vm149_vm0 = vcmask 1043456   ;;  %vm150_vm1 = vcmask 293892  }
  0x16   : > { %p141_p10 = scmp.lt.s32.totalorder %s3168_s21, 3  ;;  %155 = vst [vmem:[#allocation2 + $0x20] sm:$0xff] %v3343_v0  ;;  %148 = vst [vmem:[#allocation2] sm:$0xff] %v3343_v0  ;;  %3262 = vset.pattern.permute.xlu1 %v3344_v3  ;;  %3261 = vset.pattern.permute.xlu0 %v3344_v3  ;;  %s3346_s27 = smov 46   ;;  %vm179_vm3 = vcmask 470352   ;;  %vm204_vm4 = vcmask 634352  }
  0x17   : > { %153 = vst [vmem:[#allocation2 + $0x10] sm:$0xff] %v3343_v0  ;;  %157 = vst [vmem:[#allocation2 + $0x30] sm:$0xff] %v3343_v0  ;;  %s3347_s28 = smov 50   ;;  %s3348_s29 = smov 54   ;;  %vm229_vm5 = vcmask 798352   ;;  %vm254_vm6 = vcmask 962352  }
  0x18   : > { %s5207_s21 = smov (!%p141_p10, %s3168_s21), 3  ;;  %s3349_s30 = smov 58   ;;  %vm151_vm2 = vmor %vm150_vm1, %vm149_vm0  ;;  %vm288_vm7 = vcmask 1044432   ;;  %vm289_vm8 = vcmask 80900   ;;  %vm279_vm9 = vcmask 474112   ;;  %vm315_vm11 = vcmask 240752  }
  0x19   : > { %s3176_s22 = sshll.u32 %s5207_s21, 4  ;;  %s3350_s3 = smov 62   ;;  %154 = vst.msk [vmem:[#allocation2 + $0x18] sm:$0xff] %vm151_vm2, %v3343_v0  ;;  %152 = vst.msk [vmem:[#allocation2 + $0x8] sm:$0xff] %vm151_vm2, %v3343_v0  ;;  %vm340_vm12 = vcmask 404752   ;;  %vm365_vm13 = vcmask 568752  }
  0x1a   : > { %s3458_s25 = scalar_lea.vmem %s4925_s0, %s3176_s22  ;;  %s3351_s4 = smov 66   ;;  %156 = vst.msk [vmem:[#allocation2 + $0x28] sm:$0xff] %vm151_vm2, %v3343_v0  ;;  %158 = vst.msk [vmem:[#allocation2 + $0x38] sm:$0xff] %vm151_vm2, %v3343_v0  ;;  %vm390_vm14 = vcmask 732752   ;;  %vm415_vm15 = vcmask 896752   ;;  %vm449_vm1 = vcmask 1044368  }
  0x1b   : > { %v161_v1 = vld [vmem:[%s3458_s25 + $0x10] sm:$0xf]  ;;  %v159_v2 = vld [vmem:[%s3458_s25] sm:$0xf]  ;;  %v162_v4 = vld [vmem:[%s3458_s25 + $0x18] sm:$0xf] }
  0x1c   : > { %171 = vrot.lane.b32.xlu1 %v161_v1, %s3345_s26  ;;  %167 = vrot.lane.b32.xlu0 %v159_v2, %s3345_s26  ;;  %v160_v5 = vld [vmem:[%s3458_s25 + $0x8] sm:$0xf]  ;;  %v184_v7 = vld [vmem:[%s3458_s25] sm:$0xf]  ;;  %s3352_s5 = smov 70   ;;  %s3353_s6 = smov 74   ;;  %vm290_vm10 = vmor %vm289_vm8, %vm288_vm7 }
  0x1d   : > { %v185_v6 = vld [vmem:[%s3458_s25 + $0x8] sm:$0xf]  ;;  %v187_v8 = vld [vmem:[%s3458_s25 + $0x18] sm:$0xf]  ;;  %v186_v9 = vld [vmem:[%s3458_s25 + $0x10] sm:$0xf] }
  0x1e   : > { %v210_v10 = vld [vmem:[%s3458_s25 + $0x8] sm:$0xf]  ;;  %v209_v11 = vld [vmem:[%s3458_s25] sm:$0xf]  ;;  %v212_v12 = vld [vmem:[%s3458_s25 + $0x18] sm:$0xf] }
  0x1f   : > { %v211_v13 = vld [vmem:[%s3458_s25 + $0x10] sm:$0xf]  ;;  %v235_v14 = vld [vmem:[%s3458_s25 + $0x8] sm:$0xf]  ;;  %v234_v15 = vld [vmem:[%s3458_s25] sm:$0xf] }
  0x20   : > { %173 = vrot.lane.b32.xlu1 %v162_v4, %s3345_s26  ;;  %169 = vrot.lane.b32.xlu0 %v160_v5, %s3345_s26  ;;  %v237_v16 = vld [vmem:[%s3458_s25 + $0x18] sm:$0xf]  ;;  %v236_v17 = vld [vmem:[%s3458_s25 + $0x10] sm:$0xf]  ;;  %s3354_s7 = smov 78   ;;  %s3355_s8 = smov 82  }
  0x21   : > { %v260_v18 = vld [vmem:[%s3458_s25 + $0x8] sm:$0xf]  ;;  %v259_v19 = vld [vmem:[%s3458_s25] sm:$0xf]  ;;  %v262_v20 = vld [vmem:[%s3458_s25 + $0x18] sm:$0xf] }
  0x22   : > { %v261_v21 = vld [vmem:[%s3458_s25 + $0x10] sm:$0xf]  ;;  %v296_v22 = vld [vmem:[%s3458_s25 + $0x8] sm:$0xf]  ;;  %v295_v23 = vld [vmem:[%s3458_s25] sm:$0xf] }
  0x23   : > { %v298_v24 = vld [vmem:[%s3458_s25 + $0x18] sm:$0xf]  ;;  %v297_v25 = vld [vmem:[%s3458_s25 + $0x10] sm:$0xf]  ;;  %v321_v26 = vld [vmem:[%s3458_s25 + $0x8] sm:$0xf] }
  0x24   : > { %194 = vrot.lane.b32.xlu1 %v185_v6, %s3346_s27  ;;  %192 = vrot.lane.b32.xlu0 %v184_v7, %s3346_s27  ;;  %v320_v27 = vld [vmem:[%s3458_s25] sm:$0xf]  ;;  %v323_v28 = vld [vmem:[%s3458_s25 + $0x18] sm:$0xf]  ;;  %s3356_s14 = smov 86   ;;  %s3357_s16 = smov 90  }
  0x25   : > { %v322_v29 = vld [vmem:[%s3458_s25 + $0x10] sm:$0xf]  ;;  %v346_v30 = vld [vmem:[%s3458_s25 + $0x8] sm:$0xf]  ;;  %v345_v31 = vld [vmem:[%s3458_s25] sm:$0xf] }
  0x26   : > { %v348_v32 = vld [vmem:[%s3458_s25 + $0x18] sm:$0xf]  ;;  %v347_v33 = vld [vmem:[%s3458_s25 + $0x10] sm:$0xf]  ;;  %v371_v34 = vld [vmem:[%s3458_s25 + $0xc] sm:$0xf] }
  0x27   : > { %v370_v35 = vld [vmem:[%s3458_s25 + $0x4] sm:$0xf]  ;;  %v373_v36 = vld [vmem:[%s3458_s25 + $0x1c] sm:$0xf]  ;;  %v372_v37 = vld [vmem:[%s3458_s25 + $0x14] sm:$0xf] }
  0x28   : > { %198 = vrot.lane.b32.xlu1 %v187_v8, %s3346_s27  ;;  %196 = vrot.lane.b32.xlu0 %v186_v9, %s3346_s27  ;;  %v396_v38 = vld [vmem:[%s3458_s25 + $0xc] sm:$0xf]  ;;  %v395_v39 = vld [vmem:[%s3458_s25 + $0x4] sm:$0xf]  ;;  %s3358_s17 = smov 94   ;;  %s3359_s21 = smov 98  }
  0x29   : > { %v398_v40 = vld [vmem:[%s3458_s25 + $0x1c] sm:$0xf]  ;;  %v397_v41 = vld [vmem:[%s3458_s25 + $0x14] sm:$0xf]  ;;  %v421_v42 = vld [vmem:[%s3458_s25 + $0xc] sm:$0xf] }
  0x2a   : > { %v420_v43 = vld [vmem:[%s3458_s25 + $0x4] sm:$0xf]  ;;  %v423_v44 = vld [vmem:[%s3458_s25 + $0x1c] sm:$0xf]  ;;  %v422_v45 = vld [vmem:[%s3458_s25 + $0x14] sm:$0xf] }
  0x2b   : > { %v457_v46 = vld [vmem:[%s3458_s25 + $0xc] sm:$0xf]  ;;  %v456_v47 = vld [vmem:[%s3458_s25 + $0x4] sm:$0xf]  ;;  %v459_v48 = vld [vmem:[%s3458_s25 + $0x1c] sm:$0xf] }
  0x2c   : > { %219 = vrot.lane.b32.xlu1 %v210_v10, %s3347_s28  ;;  %217 = vrot.lane.b32.xlu0 %v209_v11, %s3347_s28  ;;  %v458_v49 = vld [vmem:[%s3458_s25 + $0x14] sm:$0xf]  ;;  %v482_v50 = vld [vmem:[%s3458_s25 + $0xc] sm:$0xf]  ;;  %s3360_s22 = smov 102   ;;  %vm450_vm2 = vcmask 15364  }
  0x2d   : > { %v481_v51 = vld [vmem:[%s3458_s25 + $0x4] sm:$0xf]  ;;  %v484_v52 = vld [vmem:[%s3458_s25 + $0x1c] sm:$0xf]  ;;  %v483_v53 = vld [vmem:[%s3458_s25 + $0x14] sm:$0xf] }
  0x2e   : > { %v507_v54 = vld [vmem:[%s3458_s25 + $0xc] sm:$0xf]  ;;  %v506_v55 = vld [vmem:[%s3458_s25 + $0x4] sm:$0xf]  ;;  %v509_v56 = vld [vmem:[%s3458_s25 + $0x1c] sm:$0xf] }
  0x2f   : > { %v508_v57 = vld [vmem:[%s3458_s25 + $0x14] sm:$0xf]  ;;  %v532_v58 = vld [vmem:[%s3458_s25 + $0xc] sm:$0xf]  ;;  %v531_v59 = vld [vmem:[%s3458_s25 + $0x4] sm:$0xf] }
  0x30   : > { %223 = vrot.lane.b32.xlu1 %v212_v12, %s3347_s28  ;;  %221 = vrot.lane.b32.xlu0 %v211_v13, %s3347_s28  ;;  %v534_v60 = vld [vmem:[%s3458_s25 + $0x1c] sm:$0xf]  ;;  %v533_v61 = vld [vmem:[%s3458_s25 + $0x14] sm:$0xf]  ;;  %vm526_vm7 = vcmask 503152   ;;  %vm551_vm8 = vcmask 667152  }
  0x31   : > { %v557_v0 = vld [vmem:[%s3458_s25 + $0xc] sm:$0xf]  ;;  %v556_v1 = vld [vmem:[%s3458_s25 + $0x4] sm:$0xf]  ;;  %v559_v5 = vld [vmem:[%s3458_s25 + $0x1c] sm:$0xf] }
  0x32   : > { %v582_v4 = vld [vmem:[%s4926_s1 + $0x4] sm:$0xf]  ;;  %v558_v6 = vld [vmem:[%s3458_s25 + $0x14] sm:$0xf]  ;;  %v581_v7 = vld [vmem:[%s4926_s1] sm:$0xf] }
  0x33   : > { %v632_v10 = vmul.f32 0.001, %v582_v4  ;;  %v631_v11 = vmul.f32 0.001, %v581_v7  ;;  %v583_v12 = vld [vmem:[%s4926_s1 + $0x8] sm:$0xf] }
  0x34   : > { %244 = vrot.lane.b32.xlu1 %v235_v14, %s3348_s29  ;;  %242 = vrot.lane.b32.xlu0 %v234_v15, %s3348_s29  ;;  %v584_v13 = vld [vmem:[%s4926_s1 + $0xc] sm:$0xf]  ;;  %s3364_s26 = smov 125   ;;  %s3365_s25 = smov 124  }
  0x35   : > { %s3367_s24 = smov 107   ;;  %s3370_s23 = smov 104  }
  0x36   : > { %s137_s28 = sand.u32 1, %s3333_s10  }
  0x38   : > { %248 = vrot.lane.b32.xlu1 %v237_v16, %s3348_s29  ;;  %246 = vrot.lane.b32.xlu0 %v236_v17, %s3348_s29  ;;  %v633_v16 = vmul.f32 0.001, %v583_v12  ;;  %v634_v17 = vmul.f32 0.001, %v584_v13  ;;  %s3177_s29 = smul.u32 12, %s137_s28 }
  0x3c   : > { %269 = vrot.lane.b32.xlu1 %v260_v18, %s3349_s30  ;;  %267 = vrot.lane.b32.xlu0 %v259_v19, %s3349_s30 }
  0x40   : > { %273 = vrot.lane.b32.xlu1 %v262_v20, %s3349_s30  ;;  %271 = vrot.lane.b32.xlu0 %v261_v21, %s3349_s30  ;;  %s3371_s30 = smov 88  }
  0x44   : > { %305 = vrot.lane.b32.xlu1 %v296_v22, %s3350_s3  ;;  %303 = vrot.lane.b32.xlu0 %v295_v23, %s3350_s3 }
  0x48   : > { %309 = vrot.lane.b32.xlu1 %v298_v24, %s3350_s3  ;;  %307 = vrot.lane.b32.xlu0 %v297_v25, %s3350_s3  ;;  %s3368_s3 = smov 106  }
  0x4c   : > { %330 = vrot.lane.b32.xlu1 %v321_v26, %s3351_s4  ;;  %328 = vrot.lane.b32.xlu0 %v320_v27, %s3351_s4 }
  0x50   : > { %334 = vrot.lane.b32.xlu1 %v323_v28, %s3351_s4  ;;  %332 = vrot.lane.b32.xlu0 %v322_v29, %s3351_s4 }
  0x54   : > { %355 = vrot.lane.b32.xlu1 %v346_v30, %s3352_s5  ;;  %353 = vrot.lane.b32.xlu0 %v345_v31, %s3352_s5 }
  0x58   : > { %359 = vrot.lane.b32.xlu1 %v348_v32, %s3352_s5  ;;  %357 = vrot.lane.b32.xlu0 %v347_v33, %s3352_s5  ;;  %s3362_s5 = smov 127  }
  0x5c   : > { %380 = vrot.lane.b32.xlu1 %v371_v34, %s3353_s6  ;;  %378 = vrot.lane.b32.xlu0 %v370_v35, %s3353_s6 }
  0x60   : > { %384 = vrot.lane.b32.xlu1 %v373_v36, %s3353_s6  ;;  %382 = vrot.lane.b32.xlu0 %v372_v37, %s3353_s6 }
  0x64   : > { %405 = vrot.lane.b32.xlu1 %v396_v38, %s3354_s7  ;;  %403 = vrot.lane.b32.xlu0 %v395_v39, %s3354_s7 }
  0x68   : > { %409 = vrot.lane.b32.xlu1 %v398_v40, %s3354_s7  ;;  %407 = vrot.lane.b32.xlu0 %v397_v41, %s3354_s7  ;;  %s3372_s7 = smov 87  }
  0x6c   : > { %430 = vrot.lane.b32.xlu1 %v421_v42, %s3355_s8  ;;  %428 = vrot.lane.b32.xlu0 %v420_v43, %s3355_s8 }
  0x70   : > { %434 = vrot.lane.b32.xlu1 %v423_v44, %s3355_s8  ;;  %432 = vrot.lane.b32.xlu0 %v422_v45, %s3355_s8  ;;  %s3369_s8 = smov 105  }
  0x74   : > { %466 = vrot.lane.b32.xlu1 %v457_v46, %s3356_s14  ;;  %464 = vrot.lane.b32.xlu0 %v456_v47, %s3356_s14 }
  0x78   : > { %470 = vrot.lane.b32.xlu1 %v459_v48, %s3356_s14  ;;  %468 = vrot.lane.b32.xlu0 %v458_v49, %s3356_s14 }
  0x7c   : > { %491 = vrot.lane.b32.xlu1 %v482_v50, %s3357_s16  ;;  %489 = vrot.lane.b32.xlu0 %v481_v51, %s3357_s16 }
  0x80   : > { %495 = vrot.lane.b32.xlu1 %v484_v52, %s3357_s16  ;;  %493 = vrot.lane.b32.xlu0 %v483_v53, %s3357_s16  ;;  %s3366_s16 = smov 108  }
  0x84   : > { %516 = vrot.lane.b32.xlu1 %v507_v54, %s3358_s17  ;;  %514 = vrot.lane.b32.xlu0 %v506_v55, %s3358_s17 }
  0x88   : > { %520 = vrot.lane.b32.xlu1 %v509_v56, %s3358_s17  ;;  %518 = vrot.lane.b32.xlu0 %v508_v57, %s3358_s17  ;;  %s3363_s17 = smov 126  }
  0x8c   : > { %541 = vrot.lane.b32.xlu1 %v532_v58, %s3359_s21  ;;  %539 = vrot.lane.b32.xlu0 %v531_v59, %s3359_s21 }
  0x8e   : > { %v172_v62 = vpop.permute.xlu1 %171  ;;  %v168_v63 = vpop.permute.xlu0 %167 }
  0x8f   : > { %182 = vst.msk [vmem:[#allocation2 + $0x20] sm:$0xf] %vm179_vm3, %v172_v62  ;;  %180 = vst.msk [vmem:[#allocation2] sm:$0xf] %vm179_vm3, %v168_v63 }
  0x90   : > { %545 = vrot.lane.b32.xlu1 %v534_v60, %s3359_s21  ;;  %543 = vrot.lane.b32.xlu0 %v533_v61, %s3359_s21 }
  0x92   : > { %v174_v2 = vpop.permute.xlu1 %173  ;;  %v170_v3 = vpop.permute.xlu0 %169 }
  0x93   : > { %183 = vst.msk [vmem:[#allocation2 + $0x30] sm:$0xf] %vm179_vm3, %v174_v2  ;;  %181 = vst.msk [vmem:[#allocation2 + $0x10] sm:$0xf] %vm179_vm3, %v170_v3  ;;  %vm440_vm3 = vcmask 670720  }
  0x94   : > { %566 = vrot.lane.b32.xlu1 %v557_v0, %s3360_s22  ;;  %564 = vrot.lane.b32.xlu0 %v556_v1, %s3360_s22 }
  0x96   : > { %v195_v8 = vpop.permute.xlu1 %194  ;;  %v193_v9 = vpop.permute.xlu0 %192 }
  0x97   : > { %206 = vst.msk [vmem:[#allocation2 + $0x10] sm:$0xf] %vm204_vm4, %v195_v8  ;;  %205 = vst.msk [vmem:[#allocation2] sm:$0xf] %vm204_vm4, %v193_v9 }
  0x98   : > { %570 = vrot.lane.b32.xlu1 %v559_v5, %s3360_s22  ;;  %568 = vrot.lane.b32.xlu0 %v558_v6, %s3360_s22 }
  0x9a   : > { %v199_v14 = vpop.permute.xlu1 %198  ;;  %v197_v15 = vpop.permute.xlu0 %196 }
  0x9b   : > { %208 = vst.msk [vmem:[#allocation2 + $0x30] sm:$0xf] %vm204_vm4, %v199_v14  ;;  %207 = vst.msk [vmem:[#allocation2 + $0x20] sm:$0xf] %vm204_vm4, %v197_v15 }
  0x9c   : > { %695 = vperm.xlu1 %3262, %v632_v10   ;;  %691 = vperm.xlu0 %3261, %v631_v11   ;;  %vm451_vm4 = vmor %vm450_vm2, %vm449_vm1  ;;  %vm1231_vm1 = vcmask 875520   ;;  %vm1320_vm2 = vcmask 867328  }
  0x9e   : > { %v220_v18 = vpop.permute.xlu1 %219  ;;  %v218_v19 = vpop.permute.xlu0 %217 }
  0x9f   : > { %231 = vst.msk [vmem:[#allocation2 + $0x10] sm:$0xf] %vm229_vm5, %v220_v18  ;;  %230 = vst.msk [vmem:[#allocation2] sm:$0xf] %vm229_vm5, %v218_v19 }
  0xa0   : > { %723 = vperm.xlu1 %3262, %v633_v16   ;;  %727 = vperm.xlu0 %3261, %v634_v17  }
  0xa2   : > { %v224_v20 = vpop.permute.xlu1 %223  ;;  %v222_v21 = vpop.permute.xlu0 %221 }
  0xa3   : > { %233 = vst.msk [vmem:[#allocation2 + $0x30] sm:$0xf] %vm229_vm5, %v224_v20  ;;  %232 = vst.msk [vmem:[#allocation2 + $0x20] sm:$0xf] %vm229_vm5, %v222_v21  ;;  %vm476_vm5 = vcmask 175152  }
  0xa6   : > { %v245_v22 = vpop.permute.xlu1 %244  ;;  %v243_v23 = vpop.permute.xlu0 %242 }
  0xa7   : > { %256 = vst.msk [vmem:[#allocation2 + $0x10] sm:$0xf] %vm254_vm6, %v245_v22  ;;  %255 = vst.msk [vmem:[#allocation2] sm:$0xf] %vm254_vm6, %v243_v23 }
  0xaa   : > { %v249_v24 = vpop.permute.xlu1 %248  ;;  %v247_v25 = vpop.permute.xlu0 %246 }
  0xab   : > { %258 = vst.msk [vmem:[#allocation2 + $0x30] sm:$0xf] %vm254_vm6, %v249_v24  ;;  %257 = vst.msk [vmem:[#allocation2 + $0x20] sm:$0xf] %vm254_vm6, %v247_v25  ;;  %vm501_vm6 = vcmask 339152  }
  0xae   : > { %v270_v26 = vpop.permute.xlu1 %269  ;;  %v268_v27 = vpop.permute.xlu0 %267 }
  0xaf   : > { %v276_v28 = vrot.slane %v270_v26, 4  ;;  %v275_v29 = vrot.slane %v268_v27, 4 }
  0xb1   : > { %v281_v30 = vsel %vm279_vm9, %v276_v28, %v270_v26  ;;  %v280_v31 = vsel %vm279_vm9, %v275_v29, %v268_v27  ;;  %v3361_v26 = vmov 839922192   ;;  %v700_v28 = vlaneseq }
  0xb2   : > { %v274_v32 = vpop.permute.xlu1 %273  ;;  %v272_v33 = vpop.permute.xlu0 %271  ;;  %292 = vst.msk [vmem:[#allocation2 + $0x10] sm:$0xff] %vm290_vm10, %v281_v30  ;;  %291 = vst.msk [vmem:[#allocation2] sm:$0xff] %vm290_vm10, %v280_v31  ;;  %v698_v27 = vunpack.c.l.s4 %v3361_v26 }
  0xb3   : > { %v278_v34 = vrot.slane %v274_v32, 4  ;;  %v277_v35 = vrot.slane %v272_v33, 4  ;;  %v3565_v30 = vshrl.u32 %v700_v28, 7 }
  0xb4   : > { %v699_v29 = vunpack.c.0.s8 %v698_v27 }
  0xb5   : > { %v283_v36 = vsel %vm279_vm9, %v278_v34, %v274_v32  ;;  %v282_v37 = vsel %vm279_vm9, %v277_v35, %v272_v33  ;;  %vm576_vm9 = vcmask 831152   ;;  %5018 = vst [vmem:[#allocation6_spill] sm:$0xff] %v3565_v30 }
  0xb6   : > { %v306_v38 = vpop.permute.xlu1 %305  ;;  %293 = vst.msk [vmem:[#allocation2 + $0x20] sm:$0xff] %vm290_vm10, %v282_v37  ;;  %294 = vst.msk [vmem:[#allocation2 + $0x30] sm:$0xff] %vm290_vm10, %v283_v36  ;;  %v304_v39 = vpop.permute.xlu0 %303  ;;  %v3572_v33 = vsub.s32 %v699_v29, %v3565_v30  ;;  %vm2032_vm10 = vcmask 556032  }
  0xb7   : > { %317 = vst.msk [vmem:[#allocation2 + $0x14] sm:$0xf] %vm315_vm11, %v306_v38  ;;  %316 = vst.msk [vmem:[#allocation2 + $0x4] sm:$0xf] %vm315_vm11, %v304_v39 }
  0xb8   : > { %5019 = vst [vmem:[#allocation7_spill] sm:$0xff] %v3572_v33 }
  0xba   : > { %v310_v40 = vpop.permute.xlu1 %309  ;;  %v308_v41 = vpop.permute.xlu0 %307 }
  0xbb   : > { %319 = vst.msk [vmem:[#allocation2 + $0x34] sm:$0xf] %vm315_vm11, %v310_v40  ;;  %318 = vst.msk [vmem:[#allocation2 + $0x24] sm:$0xf] %vm315_vm11, %v308_v41  ;;  %vm786_vm11 = vcmask 1039360  }
  0xbe   : > { %v331_v42 = vpop.permute.xlu1 %330  ;;  %v329_v43 = vpop.permute.xlu0 %328 }
  0xbf   : > { %342 = vst.msk [vmem:[#allocation2 + $0x14] sm:$0xf] %vm340_vm12, %v331_v42  ;;  %341 = vst.msk [vmem:[#allocation2 + $0x4] sm:$0xf] %vm340_vm12, %v329_v43 }
  0xc2   : > { %v335_v44 = vpop.permute.xlu1 %334  ;;  %v333_v45 = vpop.permute.xlu0 %332 }
  0xc3   : > { %344 = vst.msk [vmem:[#allocation2 + $0x34] sm:$0xf] %vm340_vm12, %v335_v44  ;;  %343 = vst.msk [vmem:[#allocation2 + $0x24] sm:$0xf] %vm340_vm12, %v333_v45  ;;  %vm875_vm12 = vcmask 1031168  }
  0xc6   : > { %v356_v46 = vpop.permute.xlu1 %355  ;;  %v354_v47 = vpop.permute.xlu0 %353 }
  0xc7   : > { %367 = vst.msk [vmem:[#allocation2 + $0x14] sm:$0xf] %vm365_vm13, %v356_v46  ;;  %366 = vst.msk [vmem:[#allocation2 + $0x4] sm:$0xf] %vm365_vm13, %v354_v47 }
  0xca   : > { %v360_v48 = vpop.permute.xlu1 %359  ;;  %v358_v49 = vpop.permute.xlu0 %357 }
  0xcb   : > { %369 = vst.msk [vmem:[#allocation2 + $0x34] sm:$0xf] %vm365_vm13, %v360_v48  ;;  %368 = vst.msk [vmem:[#allocation2 + $0x24] sm:$0xf] %vm365_vm13, %v358_v49  ;;  %vm964_vm13 = vcmask 1022976  }
  0xce   : > { %v381_v50 = vpop.permute.xlu1 %380  ;;  %v379_v51 = vpop.permute.xlu0 %378 }
  0xcf   : > { %392 = vst.msk [vmem:[#allocation2 + $0x14] sm:$0xf] %vm390_vm14, %v381_v50  ;;  %391 = vst.msk [vmem:[#allocation2 + $0x4] sm:$0xf] %vm390_vm14, %v379_v51  ;;  %v586_v50 = vld [vmem:[%s4926_s1 + $0x14] sm:$0xf] }
  0xd2   : > { %v385_v52 = vpop.permute.xlu1 %384  ;;  %v383_v53 = vpop.permute.xlu0 %382 }
  0xd3   : > { %394 = vst.msk [vmem:[#allocation2 + $0x34] sm:$0xf] %vm390_vm14, %v385_v52  ;;  %393 = vst.msk [vmem:[#allocation2 + $0x24] sm:$0xf] %vm390_vm14, %v383_v53  ;;  %v585_v53 = vld [vmem:[%s4926_s1 + $0x10] sm:$0xf] }
  0xd4   : > { %vm1053_vm14 = vcmask 1014784  }
  0xd6   : > { %v406_v54 = vpop.permute.xlu1 %405  ;;  %v404_v55 = vpop.permute.xlu0 %403 }
  0xd7   : > { %417 = vst.msk [vmem:[#allocation2 + $0x14] sm:$0xf] %vm415_vm15, %v406_v54  ;;  %416 = vst.msk [vmem:[#allocation2 + $0x4] sm:$0xf] %vm415_vm15, %v404_v55 }
  0xda   : > { %v410_v56 = vpop.permute.xlu1 %409  ;;  %v408_v57 = vpop.permute.xlu0 %407 }
  0xdb   : > { %419 = vst.msk [vmem:[#allocation2 + $0x34] sm:$0xf] %vm415_vm15, %v410_v56  ;;  %418 = vst.msk [vmem:[#allocation2 + $0x24] sm:$0xf] %vm415_vm15, %v408_v57  ;;  %v636_v56 = vmul.f32 0.001, %v586_v50 }
  0xdc   : > { %v635_v57 = vmul.f32 0.001, %v585_v53  ;;  %vm1142_vm15 = vcmask 883712  }
  0xde   : > { %v431_v58 = vpop.permute.xlu1 %430  ;;  %v429_v59 = vpop.permute.xlu0 %428 }
  0xdf   : > { %v437_v60 = vrot.slane %v431_v58, 4  ;;  %v436_v61 = vrot.slane %v429_v59, 4 }
  0xe1   : > { %v442_v62 = vsel %vm440_vm3, %v437_v60, %v431_v58  ;;  %v441_v63 = vsel %vm440_vm3, %v436_v61, %v429_v59 }
  0xe2   : > { %v435_v0 = vpop.permute.xlu1 %434  ;;  %v433_v1 = vpop.permute.xlu0 %432  ;;  %453 = vst.msk [vmem:[#allocation2 + $0x14] sm:$0xff] %vm451_vm4, %v442_v62  ;;  %452 = vst.msk [vmem:[#allocation2 + $0x4] sm:$0xff] %vm451_vm4, %v441_v63 }
  0xe3   : > { %v439_v2 = vrot.slane %v435_v0, 4  ;;  %v438_v3 = vrot.slane %v433_v1, 4 }
  0xe5   : > { %v444_v4 = vsel %vm440_vm3, %v439_v2, %v435_v0  ;;  %v443_v5 = vsel %vm440_vm3, %v438_v3, %v433_v1  ;;  %vm1409_vm3 = vcmask 859136  }
  0xe6   : > { %v467_v6 = vpop.permute.xlu1 %466  ;;  %455 = vst.msk [vmem:[#allocation2 + $0x34] sm:$0xff] %vm451_vm4, %v444_v4  ;;  %454 = vst.msk [vmem:[#allocation2 + $0x24] sm:$0xff] %vm451_vm4, %v443_v5  ;;  %v465_v7 = vpop.permute.xlu0 %464  ;;  %vm1498_vm4 = vcmask 850944  }
  0xe7   : > { %478 = vst.msk [vmem:[#allocation2 + $0x18] sm:$0xf] %vm476_vm5, %v467_v6  ;;  %477 = vst.msk [vmem:[#allocation2 + $0x8] sm:$0xf] %vm476_vm5, %v465_v7 }
  0xe9   : > { %v3575_v37 = vld [vmem:[#allocation2] sm:$0xff]  ;;  %v3582_v42 = vld [vmem:[#allocation2 + $0x10] sm:$0xff] }
  0xea   : > { %v471_v8 = vpop.permute.xlu1 %470  ;;  %v469_v9 = vpop.permute.xlu0 %468 }
  0xeb   : > { %480 = vst.msk [vmem:[#allocation2 + $0x38] sm:$0xf] %vm476_vm5, %v471_v8  ;;  %479 = vst.msk [vmem:[#allocation2 + $0x28] sm:$0xf] %vm476_vm5, %v469_v9  ;;  %vm1587_vm5 = vcmask 719872  }
  0xed   : > { %v3588_v46 = vld [vmem:[#allocation2 + $0x20] sm:$0xff]  ;;  %v3597_v51 = vld [vmem:[#allocation2 + $0x30] sm:$0xff] }
  0xee   : > { %v492_v10 = vpop.permute.xlu1 %491  ;;  %v490_v11 = vpop.permute.xlu0 %489 }
  0xef   : > { %503 = vst.msk [vmem:[#allocation2 + $0x18] sm:$0xf] %vm501_vm6, %v492_v10  ;;  %502 = vst.msk [vmem:[#allocation2 + $0x8] sm:$0xf] %vm501_vm6, %v490_v11 }
  0xf2   : > { %v496_v12 = vpop.permute.xlu1 %495  ;;  %v494_v13 = vpop.permute.xlu0 %493 }
  0xf3   : > { %505 = vst.msk [vmem:[#allocation2 + $0x38] sm:$0xf] %vm501_vm6, %v496_v12  ;;  %504 = vst.msk [vmem:[#allocation2 + $0x28] sm:$0xf] %vm501_vm6, %v494_v13  ;;  %v588_v12 = vld [vmem:[%s4926_s1 + $0x1c] sm:$0xf] }
  0xf4   : > { %v587_v13 = vld [vmem:[%s4926_s1 + $0x18] sm:$0xf]  ;;  %vm1676_vm6 = vcmask 711680  }
  0xf6   : > { %v517_v14 = vpop.permute.xlu1 %516  ;;  %v515_v15 = vpop.permute.xlu0 %514 }
  0xf7   : > { %528 = vst.msk [vmem:[#allocation2 + $0x18] sm:$0xf] %vm526_vm7, %v517_v14  ;;  %527 = vst.msk [vmem:[#allocation2 + $0x8] sm:$0xf] %vm526_vm7, %v515_v15 }
  0xfa   : > { %v521_v16 = vpop.permute.xlu1 %520  ;;  %v519_v17 = vpop.permute.xlu0 %518 }
  0xfb   : > { %530 = vst.msk [vmem:[#allocation2 + $0x38] sm:$0xf] %vm526_vm7, %v521_v16  ;;  %529 = vst.msk [vmem:[#allocation2 + $0x28] sm:$0xf] %vm526_vm7, %v519_v17  ;;  %v638_v16 = vmul.f32 0.001, %v588_v12 }
  0xfc   : > { %v637_v17 = vmul.f32 0.001, %v587_v13  ;;  %vm1765_vm7 = vcmask 703488  }
  0xfe   : > { %v542_v18 = vpop.permute.xlu1 %541  ;;  %v540_v19 = vpop.permute.xlu0 %539 }
  0xff   : > { %553 = vst.msk [vmem:[#allocation2 + $0x18] sm:$0xf] %vm551_vm8, %v542_v18  ;;  %552 = vst.msk [vmem:[#allocation2 + $0x8] sm:$0xf] %vm551_vm8, %v540_v19 }
 0x102   : > { %v546_v20 = vpop.permute.xlu1 %545  ;;  %v544_v21 = vpop.permute.xlu0 %543 }
 0x103   : > { %555 = vst.msk [vmem:[#allocation2 + $0x38] sm:$0xf] %vm551_vm8, %v546_v20  ;;  %554 = vst.msk [vmem:[#allocation2 + $0x28] sm:$0xf] %vm551_vm8, %v544_v21  ;;  %vm1854_vm8 = vcmask 695296  }
 0x106   : > { %v567_v22 = vpop.permute.xlu1 %566  ;;  %v565_v23 = vpop.permute.xlu0 %564 }
 0x107   : > { %578 = vst.msk [vmem:[#allocation2 + $0x18] sm:$0xf] %vm576_vm9, %v567_v22  ;;  %577 = vst.msk [vmem:[#allocation2 + $0x8] sm:$0xf] %vm576_vm9, %v565_v23 }
 0x10a   : > { %v571_v24 = vpop.permute.xlu1 %570  ;;  %v569_v25 = vpop.permute.xlu0 %568 }
 0x10b   : > { %580 = vst.msk [vmem:[#allocation2 + $0x38] sm:$0xf] %vm576_vm9, %v571_v24  ;;  %579 = vst.msk [vmem:[#allocation2 + $0x28] sm:$0xf] %vm576_vm9, %v569_v25  ;;  %vm1943_vm9 = vcmask 687104  }
 0x10e   : > { %v3577_v38 = vld [vmem:[#allocation2 + $0x8] sm:$0xf]  ;;  %v3584_v43 = vld [vmem:[#allocation2 + $0x18] sm:$0xf] }
 0x112   : > { %v3590_v47 = vld [vmem:[#allocation2 + $0x28] sm:$0xf]  ;;  %v3599_v52 = vld [vmem:[#allocation2 + $0x38] sm:$0xf] }
 0x11b   : > { %v3567_v31 = vpop.permute.xlu1 %695  ;;  %v3569_v32 = vpop.permute.xlu0 %691 }
 0x11f   : > { %v724_v34 = vpop.permute.xlu1 %723  ;;  %v728_v35 = vpop.permute.xlu0 %727 }
 0x120   : > { %v735_v36 = vrot.slane %v724_v34, %v3572_v33  ;;  %v742_v39 = vrot.slane %v728_v35, %v3572_v33 }
 0x122   : > { %v745_v40 = vmul.f32 %v735_v36, %v3575_v37  ;;  %v746_v41 = vmul.f32 %v735_v36, %v3577_v38  ;;  %v748_v44 = vmul.f32 %v742_v39, %v3584_v43  ;;  %v747_v45 = vmul.f32 %v742_v39, %v3582_v42 }
 0x123   : > { %v750_v48 = vmul.f32 %v735_v36, %v3590_v47  ;;  %v749_v49 = vmul.f32 %v735_v36, %v3588_v46  ;;  %v752_v54 = vmul.f32 %v742_v39, %v3599_v52  ;;  %v751_v55 = vmul.f32 %v742_v39, %v3597_v51 }
 0x124   : > { %761 = vrot.lane.b32.xlu1 %v745_v40, %s3362_s5  ;;  %763 = vrot.lane.b32.xlu0 %v746_v41, %s3362_s5 }
 0x128   : > { %767 = vrot.lane.b32.xlu0 %v748_v44, %s3362_s5  ;;  %765 = vrot.lane.b32.xlu1 %v747_v45, %s3362_s5  ;;  %v590_v44 = vld [vmem:[%s4926_s1 + $0x24] sm:$0xf]  ;;  %v589_v45 = vld [vmem:[%s4926_s1 + $0x20] sm:$0xf] }
 0x129   : > { %v640_v50 = vmul.f32 0.001, %v590_v44  ;;  %v639_v53 = vmul.f32 0.001, %v589_v45 }
 0x12c   : > { %771 = vrot.lane.b32.xlu0 %v750_v48, %s3362_s5  ;;  %769 = vrot.lane.b32.xlu1 %v749_v49, %s3362_s5 }
 0x130   : > { %775 = vrot.lane.b32.xlu0 %v752_v54, %s3362_s5  ;;  %773 = vrot.lane.b32.xlu1 %v751_v55, %s3362_s5 }
 0x134   : > { %816 = vperm.xlu0 %3261, %v636_v56   ;;  %812 = vperm.xlu1 %3262, %v635_v57  }
 0x196   : > { %v3606_v58 = vpop.permute.xlu1 %761  ;;  %v3608_v59 = vpop.permute.xlu0 %763 }
 0x19a   : > { %v3610_v60 = vpop.permute.xlu1 %765  ;;  %v3612_v61 = vpop.permute.xlu0 %767 }
 0x19e   : > { %v3614_v62 = vpop.permute.xlu1 %769  ;;  %v3616_v63 = vpop.permute.xlu0 %771 }
 0x1a2   : > { %v3618_v0 = vpop.permute.xlu1 %773  ;;  %v3620_v1 = vpop.permute.xlu0 %775 }
 0x1b3   : > { %v813_v2 = vpop.permute.xlu1 %812  ;;  %v817_v3 = vpop.permute.xlu0 %816 }
 0x1b4   : > { %v824_v4 = vrot.slane %v813_v2, %v3572_v33  ;;  %v831_v5 = vrot.slane %v817_v3, %v3572_v33 }
 0x1b6   : > { %v835_v6 = vmul.f32 %v824_v4, %v3577_v38  ;;  %v834_v7 = vmul.f32 %v824_v4, %v3575_v37  ;;  %v837_v8 = vmul.f32 %v831_v5, %v3584_v43  ;;  %v836_v9 = vmul.f32 %v831_v5, %v3582_v42 }
 0x1b7   : > { %v839_v10 = vmul.f32 %v824_v4, %v3590_v47  ;;  %v838_v11 = vmul.f32 %v824_v4, %v3588_v46  ;;  %v841_v14 = vmul.f32 %v831_v5, %v3599_v52  ;;  %v840_v15 = vmul.f32 %v831_v5, %v3597_v51 }
 0x1b8   : > { %852 = vrot.lane.b32.xlu0 %v835_v6, %s3363_s17  ;;  %850 = vrot.lane.b32.xlu1 %v834_v7, %s3363_s17 }
 0x1bc   : > { %856 = vrot.lane.b32.xlu0 %v837_v8, %s3363_s17  ;;  %854 = vrot.lane.b32.xlu1 %v836_v9, %s3363_s17 }
 0x1c0   : > { %860 = vrot.lane.b32.xlu0 %v839_v10, %s3363_s17  ;;  %858 = vrot.lane.b32.xlu1 %v838_v11, %s3363_s17 }
 0x1c4   : > { %864 = vrot.lane.b32.xlu0 %v841_v14, %s3363_s17  ;;  %862 = vrot.lane.b32.xlu1 %v840_v15, %s3363_s17 }
 0x1c8   : > { %905 = vperm.xlu0 %3261, %v638_v16   ;;  %901 = vperm.xlu1 %3262, %v637_v17   ;;  %v592_v16 = vld [vmem:[%s4926_s1 + $0x2c] sm:$0xf]  ;;  %v591_v17 = vld [vmem:[%s4926_s1 + $0x28] sm:$0xf] }
 0x22a   : > { %v3638_v18 = vpop.permute.xlu1 %850  ;;  %v3640_v19 = vpop.permute.xlu0 %852 }
 0x22e   : > { %v3642_v20 = vpop.permute.xlu1 %854  ;;  %v3644_v21 = vpop.permute.xlu0 %856 }
 0x232   : > { %v3646_v22 = vpop.permute.xlu1 %858  ;;  %v3648_v23 = vpop.permute.xlu0 %860 }
 0x236   : > { %v3650_v24 = vpop.permute.xlu1 %862  ;;  %v3652_v25 = vpop.permute.xlu0 %864 }
 0x247   : > { %v902_v26 = vpop.permute.xlu1 %901  ;;  %v906_v27 = vpop.permute.xlu0 %905 }
 0x248   : > { %v913_v28 = vrot.slane %v902_v26, %v3572_v33  ;;  %v920_v29 = vrot.slane %v906_v27, %v3572_v33 }
 0x24a   : > { %v924_v34 = vmul.f32 %v913_v28, %v3577_v38  ;;  %v923_v35 = vmul.f32 %v913_v28, %v3575_v37  ;;  %v926_v36 = vmul.f32 %v920_v29, %v3584_v43  ;;  %v925_v39 = vmul.f32 %v920_v29, %v3582_v42 }
 0x24b   : > { %v928_v40 = vmul.f32 %v913_v28, %v3590_v47  ;;  %v927_v41 = vmul.f32 %v913_v28, %v3588_v46  ;;  %v930_v48 = vmul.f32 %v920_v29, %v3599_v52  ;;  %v929_v49 = vmul.f32 %v920_v29, %v3597_v51 }
 0x24c   : > { %941 = vrot.lane.b32.xlu0 %v924_v34, %s3364_s26  ;;  %939 = vrot.lane.b32.xlu1 %v923_v35, %s3364_s26  ;;  %v642_v28 = vmul.f32 0.001, %v592_v16  ;;  %v641_v29 = vmul.f32 0.001, %v591_v17 }
 0x250   : > { %945 = vrot.lane.b32.xlu0 %v926_v36, %s3364_s26  ;;  %943 = vrot.lane.b32.xlu1 %v925_v39, %s3364_s26 }
 0x254   : > { %949 = vrot.lane.b32.xlu0 %v928_v40, %s3364_s26  ;;  %947 = vrot.lane.b32.xlu1 %v927_v41, %s3364_s26 }
 0x258   : > { %953 = vrot.lane.b32.xlu0 %v930_v48, %s3364_s26  ;;  %951 = vrot.lane.b32.xlu1 %v929_v49, %s3364_s26  ;;  %s3380_s26 = smov 47  }
 0x25c   : > { %994 = vperm.xlu0 %3261, %v640_v50   ;;  %990 = vperm.xlu1 %3262, %v639_v53  }
 0x2be   : > { %v3670_v54 = vpop.permute.xlu1 %939  ;;  %v3672_v55 = vpop.permute.xlu0 %941 }
 0x2c2   : > { %v3674_v56 = vpop.permute.xlu1 %943  ;;  %v3676_v57 = vpop.permute.xlu0 %945 }
 0x2c6   : > { %v3678_v2 = vpop.permute.xlu1 %947  ;;  %v3680_v3 = vpop.permute.xlu0 %949 }
 0x2ca   : > { %v3682_v4 = vpop.permute.xlu1 %951  ;;  %v3684_v5 = vpop.permute.xlu0 %953 }
 0x2db   : > { %v991_v6 = vpop.permute.xlu1 %990  ;;  %v995_v7 = vpop.permute.xlu0 %994 }
 0x2dc   : > { %v1002_v8 = vrot.slane %v991_v6, %v3572_v33  ;;  %v1009_v9 = vrot.slane %v995_v7, %v3572_v33 }
 0x2de   : > { %v1013_v10 = vmul.f32 %v1002_v8, %v3577_v38  ;;  %v1012_v11 = vmul.f32 %v1002_v8, %v3575_v37  ;;  %v1015_v12 = vmul.f32 %v1009_v9, %v3584_v43  ;;  %v1014_v13 = vmul.f32 %v1009_v9, %v3582_v42 }
 0x2df   : > { %v1017_v14 = vmul.f32 %v1002_v8, %v3590_v47  ;;  %v1016_v15 = vmul.f32 %v1002_v8, %v3588_v46  ;;  %v1019_v26 = vmul.f32 %v1009_v9, %v3599_v52  ;;  %v1018_v27 = vmul.f32 %v1009_v9, %v3597_v51 }
 0x2e0   : > { %1030 = vrot.lane.b32.xlu0 %v1013_v10, %s3365_s25  ;;  %1028 = vrot.lane.b32.xlu1 %v1012_v11, %s3365_s25 }
 0x2e4   : > { %1034 = vrot.lane.b32.xlu0 %v1015_v12, %s3365_s25  ;;  %1032 = vrot.lane.b32.xlu1 %v1014_v13, %s3365_s25  ;;  %v594_v12 = vld [vmem:[%s4926_s1 + $0x34] sm:$0xf]  ;;  %v593_v13 = vld [vmem:[%s4926_s1 + $0x30] sm:$0xf] }
 0x2e5   : > { %v644_v16 = vmul.f32 0.001, %v594_v12  ;;  %v643_v17 = vmul.f32 0.001, %v593_v13 }
 0x2e8   : > { %1038 = vrot.lane.b32.xlu0 %v1017_v14, %s3365_s25  ;;  %1036 = vrot.lane.b32.xlu1 %v1016_v15, %s3365_s25 }
 0x2ec   : > { %1042 = vrot.lane.b32.xlu0 %v1019_v26, %s3365_s25  ;;  %1040 = vrot.lane.b32.xlu1 %v1018_v27, %s3365_s25  ;;  %s3374_s25 = smov 84  }
 0x2f0   : > { %1083 = vperm.xlu0 %3261, %v642_v28   ;;  %1079 = vperm.xlu1 %3262, %v641_v29  }
 0x352   : > { %v3702_v34 = vpop.permute.xlu1 %1028  ;;  %v3704_v35 = vpop.permute.xlu0 %1030 }
 0x356   : > { %v3706_v36 = vpop.permute.xlu1 %1032  ;;  %v3708_v39 = vpop.permute.xlu0 %1034 }
 0x35a   : > { %v3710_v40 = vpop.permute.xlu1 %1036  ;;  %v3712_v41 = vpop.permute.xlu0 %1038 }
 0x35e   : > { %v3714_v44 = vpop.permute.xlu1 %1040  ;;  %v3716_v45 = vpop.permute.xlu0 %1042 }
 0x36f   : > { %v1080_v48 = vpop.permute.xlu1 %1079  ;;  %v1084_v49 = vpop.permute.xlu0 %1083 }
 0x370   : > { %v1091_v50 = vrot.slane %v1080_v48, %v3572_v33  ;;  %v1098_v53 = vrot.slane %v1084_v49, %v3572_v33 }
 0x372   : > { %v1102_v6 = vmul.f32 %v1091_v50, %v3577_v38  ;;  %v1101_v7 = vmul.f32 %v1091_v50, %v3575_v37  ;;  %v1104_v8 = vmul.f32 %v1098_v53, %v3584_v43  ;;  %v1103_v9 = vmul.f32 %v1098_v53, %v3582_v42 }
 0x373   : > { %v1106_v10 = vmul.f32 %v1091_v50, %v3590_v47  ;;  %v1105_v11 = vmul.f32 %v1091_v50, %v3588_v46  ;;  %v1108_v14 = vmul.f32 %v1098_v53, %v3599_v52  ;;  %v1107_v15 = vmul.f32 %v1098_v53, %v3597_v51 }
 0x374   : > { %1119 = vrot.lane.b32.xlu0 %v1102_v6, %s3366_s16  ;;  %1117 = vrot.lane.b32.xlu1 %v1101_v7, %s3366_s16 }
 0x378   : > { %1123 = vrot.lane.b32.xlu0 %v1104_v8, %s3366_s16  ;;  %1121 = vrot.lane.b32.xlu1 %v1103_v9, %s3366_s16 }
 0x37c   : > { %1127 = vrot.lane.b32.xlu0 %v1106_v10, %s3366_s16  ;;  %1125 = vrot.lane.b32.xlu1 %v1105_v11, %s3366_s16 }
 0x380   : > { %1131 = vrot.lane.b32.xlu0 %v1108_v14, %s3366_s16  ;;  %1129 = vrot.lane.b32.xlu1 %v1107_v15, %s3366_s16  ;;  %s3375_s16 = smov 68  }
 0x384   : > { %1172 = vperm.xlu0 %3261, %v644_v16   ;;  %1168 = vperm.xlu1 %3262, %v643_v17   ;;  %v596_v16 = vld [vmem:[%s4926_s1 + $0x3c] sm:$0xf]  ;;  %v595_v17 = vld [vmem:[%s4926_s1 + $0x38] sm:$0xf] }
 0x3e6   : > { %v3734_v26 = vpop.permute.xlu1 %1117  ;;  %v3736_v27 = vpop.permute.xlu0 %1119 }
 0x3ea   : > { %v3738_v28 = vpop.permute.xlu1 %1121  ;;  %v3740_v29 = vpop.permute.xlu0 %1123 }
 0x3eb   : > { %5020 = vst [vmem:[#allocation8_spill] sm:$0xff] %v3740_v29 }
 0x3ee   : > { %v3742_v48 = vpop.permute.xlu1 %1125  ;;  %v3744_v49 = vpop.permute.xlu0 %1127 }
 0x3ef   : > { %5021 = vst [vmem:[#allocation9_spill] sm:$0xff] %v3742_v48  ;;  %5022 = vst [vmem:[#allocation10_spill] sm:$0xff] %v3744_v49 }
 0x3f2   : > { %v3746_v50 = vpop.permute.xlu1 %1129  ;;  %v3748_v53 = vpop.permute.xlu0 %1131 }
 0x3f3   : > { %5023 = vst [vmem:[#allocation11_spill] sm:$0xff] %v3746_v50  ;;  %5024 = vst [vmem:[#allocation12_spill] sm:$0xff] %v3748_v53 }
 0x403   : > { %v1169_v6 = vpop.permute.xlu1 %1168  ;;  %v1173_v7 = vpop.permute.xlu0 %1172 }
 0x404   : > { %v1180_v8 = vrot.slane %v1169_v6, %v3572_v33  ;;  %v1187_v9 = vrot.slane %v1173_v7, %v3572_v33 }
 0x406   : > { %v1191_v10 = vmul.f32 %v1180_v8, %v3577_v38  ;;  %v1190_v11 = vmul.f32 %v1180_v8, %v3575_v37  ;;  %v1193_v12 = vmul.f32 %v1187_v9, %v3584_v43  ;;  %v1192_v13 = vmul.f32 %v1187_v9, %v3582_v42 }
 0x407   : > { %v1195_v14 = vmul.f32 %v1180_v8, %v3590_v47  ;;  %v1194_v15 = vmul.f32 %v1180_v8, %v3588_v46  ;;  %v1197_v6 = vmul.f32 %v1187_v9, %v3599_v52  ;;  %v1196_v7 = vmul.f32 %v1187_v9, %v3597_v51 }
 0x408   : > { %1208 = vrot.lane.b32.xlu0 %v1191_v10, %s3367_s24  ;;  %1206 = vrot.lane.b32.xlu1 %v1190_v11, %s3367_s24  ;;  %v646_v10 = vmul.f32 0.001, %v596_v16  ;;  %v645_v11 = vmul.f32 0.001, %v595_v17 }
 0x40c   : > { %1212 = vrot.lane.b32.xlu0 %v1193_v12, %s3367_s24  ;;  %1210 = vrot.lane.b32.xlu1 %v1192_v13, %s3367_s24 }
 0x410   : > { %1216 = vrot.lane.b32.xlu0 %v1195_v14, %s3367_s24  ;;  %1214 = vrot.lane.b32.xlu1 %v1194_v15, %s3367_s24 }
 0x414   : > { %1220 = vrot.lane.b32.xlu0 %v1197_v6, %s3367_s24  ;;  %1218 = vrot.lane.b32.xlu1 %v1196_v7, %s3367_s24  ;;  %s3376_s24 = smov 67  }
 0x418   : > { %1261 = vperm.xlu0 %3261, %v646_v10   ;;  %1257 = vperm.xlu1 %3262, %v645_v11  }
 0x47a   : > { %v3766_v8 = vpop.permute.xlu1 %1206  ;;  %v3768_v12 = vpop.permute.xlu0 %1208 }
 0x47b   : > { %5025 = vst [vmem:[#allocation13_spill] sm:$0xff] %v3766_v8  ;;  %5026 = vst [vmem:[#allocation14_spill] sm:$0xff] %v3768_v12 }
 0x47e   : > { %v3770_v13 = vpop.permute.xlu1 %1210  ;;  %v3772_v14 = vpop.permute.xlu0 %1212 }
 0x47f   : > { %5027 = vst [vmem:[#allocation15_spill] sm:$0xff] %v3770_v13  ;;  %5028 = vst [vmem:[#allocation16_spill] sm:$0xff] %v3772_v14 }
 0x482   : > { %v3774_v15 = vpop.permute.xlu1 %1214  ;;  %v3776_v30 = vpop.permute.xlu0 %1216 }
 0x483   : > { %5029 = vst [vmem:[#allocation17_spill] sm:$0xff] %v3774_v15  ;;  %5030 = vst [vmem:[#allocation18_spill] sm:$0xff] %v3776_v30 }
 0x486   : > { %v3778_v53 = vpop.permute.xlu1 %1218  ;;  %v3780_v9 = vpop.permute.xlu0 %1220 }
 0x487   : > { %5031 = vst [vmem:[#allocation19_spill] sm:$0xff] %v3778_v53  ;;  %5032 = vst [vmem:[#allocation20_spill] sm:$0xff] %v3780_v9 }
 0x497   : > { %v1258_v16 = vpop.permute.xlu1 %1257  ;;  %v1262_v17 = vpop.permute.xlu0 %1261 }
 0x498   : > { %v1269_v6 = vrot.slane %v1258_v16, %v3572_v33  ;;  %v1276_v7 = vrot.slane %v1262_v17, %v3572_v33  ;;  %v598_v16 = vld [vmem:[%s4926_s1 + $0x44] sm:$0xf]  ;;  %v597_v17 = vld [vmem:[%s4926_s1 + $0x40] sm:$0xf] }
 0x49a   : > { %v1280_v10 = vmul.f32 %v1269_v6, %v3577_v38  ;;  %v1279_v11 = vmul.f32 %v1269_v6, %v3575_v37  ;;  %v1282_v15 = vmul.f32 %v1276_v7, %v3584_v43  ;;  %v1281_v30 = vmul.f32 %v1276_v7, %v3582_v42 }
 0x49b   : > { %v1284_v9 = vmul.f32 %v1269_v6, %v3590_v47  ;;  %v1283_v53 = vmul.f32 %v1269_v6, %v3588_v46 }
 0x49c   : > { %1297 = vrot.lane.b32.xlu0 %v1280_v10, %s3368_s3  ;;  %1295 = vrot.lane.b32.xlu1 %v1279_v11, %s3368_s3  ;;  %v1286_v10 = vmul.f32 %v1276_v7, %v3599_v52  ;;  %v1285_v11 = vmul.f32 %v1276_v7, %v3597_v51 }
 0x4a0   : > { %1301 = vrot.lane.b32.xlu0 %v1282_v15, %s3368_s3  ;;  %1299 = vrot.lane.b32.xlu1 %v1281_v30, %s3368_s3  ;;  %v648_v30 = vmul.f32 0.001, %v598_v16  ;;  %v647_v15 = vmul.f32 0.001, %v597_v17 }
 0x4a4   : > { %1305 = vrot.lane.b32.xlu0 %v1284_v9, %s3368_s3  ;;  %1303 = vrot.lane.b32.xlu1 %v1283_v53, %s3368_s3 }
 0x4a8   : > { %1309 = vrot.lane.b32.xlu0 %v1286_v10, %s3368_s3  ;;  %1307 = vrot.lane.b32.xlu1 %v1285_v11, %s3368_s3  ;;  %s3178_s3 = smul.u32 192, %s3423_s13  ;;  %s4884_s13 = scalar_lea.sflag [#allocation4], %s137_s28 }
 0x4ac   : > { %1350 = vperm.xlu0 %3261, %v648_v30   ;;  %1346 = vperm.xlu1 %3262, %v647_v15  }
 0x50e   : > { %v3798_v9 = vpop.permute.xlu1 %1295  ;;  %v3800_v53 = vpop.permute.xlu0 %1297 }
 0x50f   : > { %5033 = vst [vmem:[#allocation21_spill] sm:$0xff] %v3798_v9  ;;  %5034 = vst [vmem:[#allocation22_spill] sm:$0xff] %v3800_v53 }
 0x512   : > { %v3802_v6 = vpop.permute.xlu1 %1299  ;;  %v3804_v14 = vpop.permute.xlu0 %1301 }
 0x513   : > { %5035 = vst [vmem:[#allocation23_spill] sm:$0xff] %v3802_v6  ;;  %5036 = vst [vmem:[#allocation24_spill] sm:$0xff] %v3804_v14 }
 0x516   : > { %v3806_v13 = vpop.permute.xlu1 %1303  ;;  %v3808_v12 = vpop.permute.xlu0 %1305 }
 0x517   : > { %5037 = vst [vmem:[#allocation25_spill] sm:$0xff] %v3806_v13  ;;  %5038 = vst [vmem:[#allocation26_spill] sm:$0xff] %v3808_v12 }
 0x51a   : > { %v3810_v8 = vpop.permute.xlu1 %1307  ;;  %v3812_v7 = vpop.permute.xlu0 %1309 }
 0x51b   : > { %5039 = vst [vmem:[#allocation27_spill] sm:$0xff] %v3810_v8  ;;  %5040 = vst [vmem:[#allocation28_spill] sm:$0xff] %v3812_v7 }
 0x52b   : > { %v1347_v16 = vpop.permute.xlu1 %1346  ;;  %v1351_v17 = vpop.permute.xlu0 %1350 }
 0x52c   : > { %v1358_v10 = vrot.slane %v1347_v16, %v3572_v33  ;;  %v1365_v11 = vrot.slane %v1351_v17, %v3572_v33  ;;  %v600_v16 = vld [vmem:[%s4926_s1 + $0x4c] sm:$0xf]  ;;  %v599_v17 = vld [vmem:[%s4926_s1 + $0x48] sm:$0xf] }
 0x52e   : > { %v1369_v30 = vmul.f32 %v1358_v10, %v3577_v38  ;;  %v1368_v15 = vmul.f32 %v1358_v10, %v3575_v37  ;;  %v1371_v13 = vmul.f32 %v1365_v11, %v3584_v43  ;;  %v1370_v12 = vmul.f32 %v1365_v11, %v3582_v42 }
 0x52f   : > { %v1373_v7 = vmul.f32 %v1358_v10, %v3590_v47  ;;  %v1372_v8 = vmul.f32 %v1358_v10, %v3588_v46 }
 0x530   : > { %1386 = vrot.lane.b32.xlu0 %v1369_v30, %s3369_s8  ;;  %1384 = vrot.lane.b32.xlu1 %v1368_v15, %s3369_s8  ;;  %v1375_v30 = vmul.f32 %v1365_v11, %v3599_v52  ;;  %v1374_v15 = vmul.f32 %v1365_v11, %v3597_v51 }
 0x534   : > { %1390 = vrot.lane.b32.xlu0 %v1371_v13, %s3369_s8  ;;  %1388 = vrot.lane.b32.xlu1 %v1370_v12, %s3369_s8  ;;  %v650_v12 = vmul.f32 0.001, %v600_v16  ;;  %v649_v13 = vmul.f32 0.001, %v599_v17 }
 0x538   : > { %1394 = vrot.lane.b32.xlu0 %v1373_v7, %s3369_s8  ;;  %1392 = vrot.lane.b32.xlu1 %v1372_v8, %s3369_s8 }
 0x53c   : > { %1398 = vrot.lane.b32.xlu0 %v1375_v30, %s3369_s8  ;;  %1396 = vrot.lane.b32.xlu1 %v1374_v15, %s3369_s8 }
 0x540   : > { %1439 = vperm.xlu0 %3261, %v650_v12   ;;  %1435 = vperm.xlu1 %3262, %v649_v13  }
 0x5a2   : > { %v3830_v7 = vpop.permute.xlu1 %1384  ;;  %v3832_v8 = vpop.permute.xlu0 %1386 }
 0x5a3   : > { %5041 = vst [vmem:[#allocation29_spill] sm:$0xff] %v3830_v7  ;;  %5042 = vst [vmem:[#allocation30_spill] sm:$0xff] %v3832_v8 }
 0x5a6   : > { %v3834_v10 = vpop.permute.xlu1 %1388  ;;  %v3836_v14 = vpop.permute.xlu0 %1390 }
 0x5a7   : > { %5043 = vst [vmem:[#allocation31_spill] sm:$0xff] %v3834_v10  ;;  %5044 = vst [vmem:[#allocation32_spill] sm:$0xff] %v3836_v14 }
 0x5aa   : > { %v3838_v6 = vpop.permute.xlu1 %1392  ;;  %v3840_v53 = vpop.permute.xlu0 %1394 }
 0x5ab   : > { %5045 = vst [vmem:[#allocation33_spill] sm:$0xff] %v3838_v6  ;;  %5046 = vst [vmem:[#allocation34_spill] sm:$0xff] %v3840_v53 }
 0x5ae   : > { %v3842_v9 = vpop.permute.xlu1 %1396  ;;  %v3844_v11 = vpop.permute.xlu0 %1398 }
 0x5af   : > { %5047 = vst [vmem:[#allocation35_spill] sm:$0xff] %v3842_v9  ;;  %5048 = vst [vmem:[#allocation36_spill] sm:$0xff] %v3844_v11 }
 0x5bf   : > { %v1436_v16 = vpop.permute.xlu1 %1435  ;;  %v1440_v17 = vpop.permute.xlu0 %1439 }
 0x5c0   : > { %v1447_v30 = vrot.slane %v1436_v16, %v3572_v33  ;;  %v1454_v15 = vrot.slane %v1440_v17, %v3572_v33  ;;  %v602_v16 = vld [vmem:[%s4926_s1 + $0x54] sm:$0xf]  ;;  %v601_v17 = vld [vmem:[%s4926_s1 + $0x50] sm:$0xf] }
 0x5c2   : > { %v1458_v12 = vmul.f32 %v1447_v30, %v3577_v38  ;;  %v1457_v13 = vmul.f32 %v1447_v30, %v3575_v37  ;;  %v1460_v6 = vmul.f32 %v1454_v15, %v3584_v43  ;;  %v1459_v53 = vmul.f32 %v1454_v15, %v3582_v42 }
 0x5c3   : > { %v1462_v11 = vmul.f32 %v1447_v30, %v3590_v47  ;;  %v1461_v9 = vmul.f32 %v1447_v30, %v3588_v46 }
 0x5c4   : > { %1475 = vrot.lane.b32.xlu0 %v1458_v12, %s3370_s23  ;;  %1473 = vrot.lane.b32.xlu1 %v1457_v13, %s3370_s23  ;;  %v1464_v12 = vmul.f32 %v1454_v15, %v3599_v52  ;;  %v1463_v13 = vmul.f32 %v1454_v15, %v3597_v51 }
 0x5c8   : > { %1479 = vrot.lane.b32.xlu0 %v1460_v6, %s3370_s23  ;;  %1477 = vrot.lane.b32.xlu1 %v1459_v53, %s3370_s23  ;;  %v652_v53 = vmul.f32 0.001, %v602_v16  ;;  %v651_v6 = vmul.f32 0.001, %v601_v17 }
 0x5cc   : > { %1483 = vrot.lane.b32.xlu0 %v1462_v11, %s3370_s23  ;;  %1481 = vrot.lane.b32.xlu1 %v1461_v9, %s3370_s23 }
 0x5d0   : > { %1487 = vrot.lane.b32.xlu0 %v1464_v12, %s3370_s23  ;;  %1485 = vrot.lane.b32.xlu1 %v1463_v13, %s3370_s23  ;;  %s3378_s23 = smov 64  }
 0x5d4   : > { %1528 = vperm.xlu0 %3261, %v652_v53   ;;  %1524 = vperm.xlu1 %3262, %v651_v6  }
 0x636   : > { %v3862_v11 = vpop.permute.xlu1 %1473  ;;  %v3864_v9 = vpop.permute.xlu0 %1475 }
 0x637   : > { %5049 = vst [vmem:[#allocation37_spill] sm:$0xff] %v3862_v11  ;;  %5050 = vst [vmem:[#allocation38_spill] sm:$0xff] %v3864_v9 }
 0x63a   : > { %v3866_v30 = vpop.permute.xlu1 %1477  ;;  %v3868_v14 = vpop.permute.xlu0 %1479 }
 0x63b   : > { %5051 = vst [vmem:[#allocation39_spill] sm:$0xff] %v3866_v30  ;;  %5052 = vst [vmem:[#allocation40_spill] sm:$0xff] %v3868_v14 }
 0x63e   : > { %v3870_v10 = vpop.permute.xlu1 %1481  ;;  %v3872_v8 = vpop.permute.xlu0 %1483 }
 0x63f   : > { %5053 = vst [vmem:[#allocation41_spill] sm:$0xff] %v3870_v10  ;;  %5054 = vst [vmem:[#allocation42_spill] sm:$0xff] %v3872_v8 }
 0x642   : > { %v3874_v7 = vpop.permute.xlu1 %1485  ;;  %v3876_v15 = vpop.permute.xlu0 %1487 }
 0x643   : > { %5055 = vst [vmem:[#allocation43_spill] sm:$0xff] %v3874_v7  ;;  %5056 = vst [vmem:[#allocation44_spill] sm:$0xff] %v3876_v15 }
 0x653   : > { %v1525_v16 = vpop.permute.xlu1 %1524  ;;  %v1529_v17 = vpop.permute.xlu0 %1528 }
 0x654   : > { %v1536_v12 = vrot.slane %v1525_v16, %v3572_v33  ;;  %v1543_v13 = vrot.slane %v1529_v17, %v3572_v33  ;;  %v604_v16 = vld [vmem:[%s4926_s1 + $0x5c] sm:$0xf]  ;;  %v603_v17 = vld [vmem:[%s4926_s1 + $0x58] sm:$0xf] }
 0x656   : > { %v1547_v53 = vmul.f32 %v1536_v12, %v3577_v38  ;;  %v1546_v6 = vmul.f32 %v1536_v12, %v3575_v37  ;;  %v1549_v10 = vmul.f32 %v1543_v13, %v3584_v43  ;;  %v1548_v8 = vmul.f32 %v1543_v13, %v3582_v42 }
 0x657   : > { %v1551_v15 = vmul.f32 %v1536_v12, %v3590_v47  ;;  %v1550_v7 = vmul.f32 %v1536_v12, %v3588_v46 }
 0x658   : > { %1564 = vrot.lane.b32.xlu0 %v1547_v53, %s3371_s30  ;;  %1562 = vrot.lane.b32.xlu1 %v1546_v6, %s3371_s30  ;;  %v1553_v53 = vmul.f32 %v1543_v13, %v3599_v52  ;;  %v1552_v6 = vmul.f32 %v1543_v13, %v3597_v51 }
 0x65c   : > { %1568 = vrot.lane.b32.xlu0 %v1549_v10, %s3371_s30  ;;  %1566 = vrot.lane.b32.xlu1 %v1548_v8, %s3371_s30  ;;  %v654_v8 = vmul.f32 0.001, %v604_v16  ;;  %v653_v10 = vmul.f32 0.001, %v603_v17 }
 0x660   : > { %1572 = vrot.lane.b32.xlu0 %v1551_v15, %s3371_s30  ;;  %1570 = vrot.lane.b32.xlu1 %v1550_v7, %s3371_s30 }
 0x664   : > { %1576 = vrot.lane.b32.xlu0 %v1553_v53, %s3371_s30  ;;  %1574 = vrot.lane.b32.xlu1 %v1552_v6, %s3371_s30  ;;  %s139_s30 = scalar_lea.vmem [#allocation3], %s3177_s29 }
 0x668   : > { %1617 = vperm.xlu0 %3261, %v654_v8   ;;  %1613 = vperm.xlu1 %3262, %v653_v10  }
 0x6ca   : > { %v3894_v15 = vpop.permute.xlu1 %1562  ;;  %v3896_v7 = vpop.permute.xlu0 %1564 }
 0x6cb   : > { %5057 = vst [vmem:[#allocation45_spill] sm:$0xff] %v3894_v15  ;;  %5058 = vst [vmem:[#allocation46_spill] sm:$0xff] %v3896_v7 }
 0x6ce   : > { %v3898_v12 = vpop.permute.xlu1 %1566  ;;  %v3900_v14 = vpop.permute.xlu0 %1568 }
 0x6cf   : > { %5059 = vst [vmem:[#allocation47_spill] sm:$0xff] %v3898_v12  ;;  %5060 = vst [vmem:[#allocation48_spill] sm:$0xff] %v3900_v14 }
 0x6d2   : > { %v3902_v30 = vpop.permute.xlu1 %1570  ;;  %v3904_v9 = vpop.permute.xlu0 %1572 }
 0x6d3   : > { %5061 = vst [vmem:[#allocation49_spill] sm:$0xff] %v3902_v30  ;;  %5062 = vst [vmem:[#allocation50_spill] sm:$0xff] %v3904_v9 }
 0x6d6   : > { %v3906_v11 = vpop.permute.xlu1 %1574  ;;  %v3908_v13 = vpop.permute.xlu0 %1576 }
 0x6d7   : > { %5063 = vst [vmem:[#allocation51_spill] sm:$0xff] %v3906_v11  ;;  %5064 = vst [vmem:[#allocation52_spill] sm:$0xff] %v3908_v13 }
 0x6e7   : > { %v1614_v16 = vpop.permute.xlu1 %1613  ;;  %v1618_v17 = vpop.permute.xlu0 %1617 }
 0x6e8   : > { %v1625_v53 = vrot.slane %v1614_v16, %v3572_v33  ;;  %v1632_v6 = vrot.slane %v1618_v17, %v3572_v33  ;;  %v606_v16 = vld [vmem:[%s4926_s1 + $0x64] sm:$0xf]  ;;  %v605_v17 = vld [vmem:[%s4926_s1 + $0x60] sm:$0xf] }
 0x6ea   : > { %v1636_v8 = vmul.f32 %v1625_v53, %v3577_v38  ;;  %v1635_v10 = vmul.f32 %v1625_v53, %v3575_v37  ;;  %v1638_v30 = vmul.f32 %v1632_v6, %v3584_v43  ;;  %v1637_v9 = vmul.f32 %v1632_v6, %v3582_v42 }
 0x6eb   : > { %v1640_v13 = vmul.f32 %v1625_v53, %v3590_v47  ;;  %v1639_v11 = vmul.f32 %v1625_v53, %v3588_v46 }
 0x6ec   : > { %1653 = vrot.lane.b32.xlu0 %v1636_v8, %s3372_s7  ;;  %1651 = vrot.lane.b32.xlu1 %v1635_v10, %s3372_s7  ;;  %v1642_v8 = vmul.f32 %v1632_v6, %v3599_v52  ;;  %v1641_v10 = vmul.f32 %v1632_v6, %v3597_v51 }
 0x6f0   : > { %1657 = vrot.lane.b32.xlu0 %v1638_v30, %s3372_s7  ;;  %1655 = vrot.lane.b32.xlu1 %v1637_v9, %s3372_s7  ;;  %v656_v9 = vmul.f32 0.001, %v606_v16  ;;  %v655_v30 = vmul.f32 0.001, %v605_v17 }
 0x6f4   : > { %1661 = vrot.lane.b32.xlu0 %v1640_v13, %s3372_s7  ;;  %1659 = vrot.lane.b32.xlu1 %v1639_v11, %s3372_s7 }
 0x6f8   : > { %1665 = vrot.lane.b32.xlu0 %v1642_v8, %s3372_s7  ;;  %1663 = vrot.lane.b32.xlu1 %v1641_v10, %s3372_s7  ;;  %s4874_s7 = scalar_lea.hbm %s4927_s2, %s3178_s3 }
 0x6fc   : > { %1706 = vperm.xlu0 %3261, %v656_v9   ;;  %1702 = vperm.xlu1 %3262, %v655_v30  }
 0x75e   : > { %v3926_v13 = vpop.permute.xlu1 %1651  ;;  %v3928_v11 = vpop.permute.xlu0 %1653 }
 0x75f   : > { %5065 = vst [vmem:[#allocation53_spill] sm:$0xff] %v3926_v13  ;;  %5066 = vst [vmem:[#allocation54_spill] sm:$0xff] %v3928_v11 }
 0x762   : > { %v3930_v53 = vpop.permute.xlu1 %1655  ;;  %v3932_v14 = vpop.permute.xlu0 %1657 }
 0x763   : > { %5067 = vst [vmem:[#allocation55_spill] sm:$0xff] %v3930_v53  ;;  %5068 = vst [vmem:[#allocation56_spill] sm:$0xff] %v3932_v14 }
 0x766   : > { %v3934_v12 = vpop.permute.xlu1 %1659  ;;  %v3936_v7 = vpop.permute.xlu0 %1661 }
 0x767   : > { %5069 = vst [vmem:[#allocation57_spill] sm:$0xff] %v3934_v12  ;;  %5070 = vst [vmem:[#allocation58_spill] sm:$0xff] %v3936_v7 }
 0x76a   : > { %v3938_v15 = vpop.permute.xlu1 %1663  ;;  %v3940_v6 = vpop.permute.xlu0 %1665 }
 0x76b   : > { %5071 = vst [vmem:[#allocation59_spill] sm:$0xff] %v3938_v15  ;;  %5072 = vst [vmem:[#allocation60_spill] sm:$0xff] %v3940_v6 }
 0x77b   : > { %v1703_v16 = vpop.permute.xlu1 %1702  ;;  %v1707_v17 = vpop.permute.xlu0 %1706 }
 0x77c   : > { %v1714_v8 = vrot.slane %v1703_v16, %v3572_v33  ;;  %v1721_v10 = vrot.slane %v1707_v17, %v3572_v33 }
 0x77e   : > { %v1725_v9 = vmul.f32 %v1714_v8, %v3577_v38  ;;  %v1724_v30 = vmul.f32 %v1714_v8, %v3575_v37  ;;  %v1727_v7 = vmul.f32 %v1721_v10, %v3584_v43  ;;  %v1726_v15 = vmul.f32 %v1721_v10, %v3582_v42 }
 0x77f   : > { %v1729_v16 = vmul.f32 %v1714_v8, %v3590_v47  ;;  %v1728_v17 = vmul.f32 %v1714_v8, %v3588_v46 }
 0x780   : > { %1742 = vrot.lane.b32.xlu0 %v1725_v9, %s3356_s14  ;;  %1740 = vrot.lane.b32.xlu1 %v1724_v30, %s3356_s14  ;;  %v608_v9 = vld [vmem:[%s4926_s1 + $0x6c] sm:$0xf]  ;;  %v607_v30 = vld [vmem:[%s4926_s1 + $0x68] sm:$0xf] }
 0x781   : > { %v658_v8 = vmul.f32 0.001, %v608_v9 }
 0x784   : > { %1746 = vrot.lane.b32.xlu0 %v1727_v7, %s3356_s14  ;;  %1744 = vrot.lane.b32.xlu1 %v1726_v15, %s3356_s14  ;;  %v1731_v7 = vmul.f32 %v1721_v10, %v3599_v52  ;;  %v1730_v15 = vmul.f32 %v1721_v10, %v3597_v51 }
 0x788   : > { %1750 = vrot.lane.b32.xlu0 %v1729_v16, %s3356_s14  ;;  %1748 = vrot.lane.b32.xlu1 %v1728_v17, %s3356_s14  ;;  %v657_v16 = vmul.f32 0.001, %v607_v30 }
 0x78c   : > { %1754 = vrot.lane.b32.xlu0 %v1731_v7, %s3356_s14  ;;  %1752 = vrot.lane.b32.xlu1 %v1730_v15, %s3356_s14  ;;  %s3373_s14 = smov 85  }
 0x790   : > { %1795 = vperm.xlu0 %3261, %v658_v8   ;;  %1791 = vperm.xlu1 %3262, %v657_v16  }
 0x7f2   : > { %v3966_v17 = vpop.permute.xlu1 %1740  ;;  %v3968_v6 = vpop.permute.xlu0 %1742 }
 0x7f3   : > { %5073 = vst [vmem:[#allocation61_spill] sm:$0xff] %v3966_v17  ;;  %5074 = vst [vmem:[#allocation62_spill] sm:$0xff] %v3968_v6 }
 0x7f6   : > { %v3970_v12 = vpop.permute.xlu1 %1744  ;;  %v3972_v14 = vpop.permute.xlu0 %1746 }
 0x7f7   : > { %5075 = vst [vmem:[#allocation63_spill] sm:$0xff] %v3970_v12  ;;  %5076 = vst [vmem:[#allocation64_spill] sm:$0xff] %v3972_v14 }
 0x7fa   : > { %v3974_v53 = vpop.permute.xlu1 %1748  ;;  %v3976_v11 = vpop.permute.xlu0 %1750 }
 0x7fb   : > { %5077 = vst [vmem:[#allocation65_spill] sm:$0xff] %v3974_v53  ;;  %5078 = vst [vmem:[#allocation66_spill] sm:$0xff] %v3976_v11 }
 0x7fe   : > { %v3978_v10 = vpop.permute.xlu1 %1752  ;;  %v3980_v7 = vpop.permute.xlu0 %1754 }
 0x7ff   : > { %5079 = vst [vmem:[#allocation67_spill] sm:$0xff] %v3978_v10  ;;  %5080 = vst [vmem:[#allocation68_spill] sm:$0xff] %v3980_v7 }
 0x80f   : > { %v1792_v9 = vpop.permute.xlu1 %1791  ;;  %v1796_v30 = vpop.permute.xlu0 %1795 }
 0x810   : > { %v1803_v15 = vrot.slane %v1792_v9, %v3572_v33  ;;  %v1810_v8 = vrot.slane %v1796_v30, %v3572_v33  ;;  %v610_v9 = vld [vmem:[%s4926_s1 + $0x74] sm:$0xf] }
 0x812   : > { %v1814_v16 = vmul.f32 %v1803_v15, %v3577_v38  ;;  %v1813_v12 = vmul.f32 %v1803_v15, %v3575_v37  ;;  %v1816_v53 = vmul.f32 %v1810_v8, %v3584_v43  ;;  %v1815_v11 = vmul.f32 %v1810_v8, %v3582_v42 }
 0x813   : > { %v1818_v7 = vmul.f32 %v1803_v15, %v3590_v47  ;;  %v1817_v10 = vmul.f32 %v1803_v15, %v3588_v46  ;;  %v1820_v30 = vmul.f32 %v1810_v8, %v3599_v52 }
 0x814   : > { %1831 = vrot.lane.b32.xlu0 %v1814_v16, %s3373_s14  ;;  %1829 = vrot.lane.b32.xlu1 %v1813_v12, %s3373_s14  ;;  %v609_v12 = vld [vmem:[%s4926_s1 + $0x70] sm:$0xf]  ;;  %v1819_v16 = vmul.f32 %v1810_v8, %v3597_v51 }
 0x818   : > { %1835 = vrot.lane.b32.xlu0 %v1816_v53, %s3373_s14  ;;  %1833 = vrot.lane.b32.xlu1 %v1815_v11, %s3373_s14  ;;  %v660_v11 = vmul.f32 0.001, %v610_v9  ;;  %v659_v53 = vmul.f32 0.001, %v609_v12 }
 0x81c   : > { %1839 = vrot.lane.b32.xlu0 %v1818_v7, %s3373_s14  ;;  %1837 = vrot.lane.b32.xlu1 %v1817_v10, %s3373_s14 }
 0x820   : > { %1843 = vrot.lane.b32.xlu0 %v1820_v30, %s3373_s14  ;;  %1841 = vrot.lane.b32.xlu1 %v1819_v16, %s3373_s14  ;;  %s3381_s14 = smov 45  }
 0x824   : > { %1884 = vperm.xlu0 %3261, %v660_v11   ;;  %1880 = vperm.xlu1 %3262, %v659_v53  }
 0x886   : > { %v3998_v7 = vpop.permute.xlu1 %1829  ;;  %v4000_v10 = vpop.permute.xlu0 %1831 }
 0x887   : > { %5081 = vst [vmem:[#allocation69_spill] sm:$0xff] %v3998_v7  ;;  %5082 = vst [vmem:[#allocation70_spill] sm:$0xff] %v4000_v10 }
 0x88a   : > { %v4002_v15 = vpop.permute.xlu1 %1833  ;;  %v4004_v14 = vpop.permute.xlu0 %1835 }
 0x88b   : > { %5083 = vst [vmem:[#allocation71_spill] sm:$0xff] %v4002_v15  ;;  %5084 = vst [vmem:[#allocation72_spill] sm:$0xff] %v4004_v14 }
 0x88e   : > { %v4006_v6 = vpop.permute.xlu1 %1837  ;;  %v4008_v17 = vpop.permute.xlu0 %1839 }
 0x88f   : > { %5085 = vst [vmem:[#allocation73_spill] sm:$0xff] %v4006_v6  ;;  %5086 = vst [vmem:[#allocation74_spill] sm:$0xff] %v4008_v17 }
 0x892   : > { %v4010_v13 = vpop.permute.xlu1 %1841  ;;  %v4012_v8 = vpop.permute.xlu0 %1843 }
 0x893   : > { %5087 = vst [vmem:[#allocation75_spill] sm:$0xff] %v4010_v13  ;;  %5088 = vst [vmem:[#allocation76_spill] sm:$0xff] %v4012_v8 }
 0x8a3   : > { %v1881_v9 = vpop.permute.xlu1 %1880  ;;  %v1885_v12 = vpop.permute.xlu0 %1884 }
 0x8a4   : > { %v1892_v30 = vrot.slane %v1881_v9, %v3572_v33  ;;  %v1899_v16 = vrot.slane %v1885_v12, %v3572_v33  ;;  %v612_v9 = vld [vmem:[%s4926_s1 + $0x7c] sm:$0xf]  ;;  %v611_v12 = vld [vmem:[%s4926_s1 + $0x78] sm:$0xf] }
 0x8a6   : > { %v1903_v11 = vmul.f32 %v1892_v30, %v3577_v38  ;;  %v1902_v53 = vmul.f32 %v1892_v30, %v3575_v37  ;;  %v1905_v6 = vmul.f32 %v1899_v16, %v3584_v43  ;;  %v1904_v17 = vmul.f32 %v1899_v16, %v3582_v42 }
 0x8a7   : > { %v1907_v8 = vmul.f32 %v1892_v30, %v3590_v47  ;;  %v1906_v13 = vmul.f32 %v1892_v30, %v3588_v46 }
 0x8a8   : > { %1920 = vrot.lane.b32.xlu0 %v1903_v11, %s3374_s25  ;;  %1918 = vrot.lane.b32.xlu1 %v1902_v53, %s3374_s25  ;;  %v1909_v11 = vmul.f32 %v1899_v16, %v3599_v52  ;;  %v1908_v53 = vmul.f32 %v1899_v16, %v3597_v51 }
 0x8ac   : > { %1924 = vrot.lane.b32.xlu0 %v1905_v6, %s3374_s25  ;;  %1922 = vrot.lane.b32.xlu1 %v1904_v17, %s3374_s25  ;;  %v662_v6 = vmul.f32 0.001, %v612_v9  ;;  %v661_v17 = vmul.f32 0.001, %v611_v12 }
 0x8b0   : > { %1928 = vrot.lane.b32.xlu0 %v1907_v8, %s3374_s25  ;;  %1926 = vrot.lane.b32.xlu1 %v1906_v13, %s3374_s25 }
 0x8b4   : > { %1932 = vrot.lane.b32.xlu0 %v1909_v11, %s3374_s25  ;;  %1930 = vrot.lane.b32.xlu1 %v1908_v53, %s3374_s25  ;;  %s3102_s25 = sshll.u32 %s139_s30, 4  ;;  %s4877_s25 = int_to_ptr.vmem [resolvable:$true] %s3102_s25 }
 0x8b5   : > { %s3279_s8 = scalar_lea.vmem %s4877_s25, 192 }
 0x8b6   : > { %p3280_p11 = scmp.ne.s32.totalorder %s4877_s25, %s3279_s8 }
 0x8b8   : > { %1973 = vperm.xlu0 %3261, %v662_v6   ;;  %1969 = vperm.xlu1 %3262, %v661_v17   ;;  %p3281_p12 = pnand %p3280_p11, %p3440_p5 }
 0x8ba   : > { %p3282_p13 = pneg %p3281_p12 }
 0x91a   : > { %v4030_v8 = vpop.permute.xlu1 %1918  ;;  %v4032_v13 = vpop.permute.xlu0 %1920 }
 0x91b   : > { %5089 = vst [vmem:[#allocation77_spill] sm:$0xff] %v4030_v8  ;;  %5090 = vst [vmem:[#allocation78_spill] sm:$0xff] %v4032_v13  ;;  %v866_v13 = vrot.slane %v3638_v18, 4  ;;  %v867_v8 = vrot.slane %v3640_v19, 4 }
 0x91d   : > { %v874_v29 = vsel %vm149_vm0, %v866_v13, %v867_v8 }
 0x91e   : > { %v4034_v30 = vpop.permute.xlu1 %1922  ;;  %v4036_v14 = vpop.permute.xlu0 %1924 }
 0x91f   : > { %5091 = vst [vmem:[#allocation79_spill] sm:$0xff] %v4034_v30  ;;  %5092 = vst [vmem:[#allocation80_spill] sm:$0xff] %v4036_v14  ;;  %v780_v14 = vrot.slane %v3612_v61, 4  ;;  %v710_v30 = vrot.slane %v3567_v31, %v3572_v33  ;;  %v868_v31 = vrot.slane %v3642_v20, 4 }
 0x922   : > { %v4038_v15 = vpop.permute.xlu1 %1926  ;;  %v4040_v10 = vpop.permute.xlu0 %1928 }
 0x923   : > { %5093 = vst [vmem:[#allocation81_spill] sm:$0xff] %v4038_v15  ;;  %5094 = vst [vmem:[#allocation82_spill] sm:$0xff] %v4040_v10 }
 0x926   : > { %v4042_v7 = vpop.permute.xlu1 %1930  ;;  %v4044_v16 = vpop.permute.xlu0 %1932 }
 0x927   : > { %5095 = vst [vmem:[#allocation83_spill] sm:$0xff] %v4042_v7  ;;  %5096 = vst [vmem:[#allocation84_spill] sm:$0xff] %v4044_v16 }
 0x937   : > { %v1970_v9 = vpop.permute.xlu1 %1969  ;;  %v1974_v12 = vpop.permute.xlu0 %1973 }
 0x938   : > { %v1981_v11 = vrot.slane %v1970_v9, %v3572_v33  ;;  %v1988_v53 = vrot.slane %v1974_v12, %v3572_v33 }
 0x93a   : > { %v1992_v6 = vmul.f32 %v1981_v11, %v3577_v38  ;;  %v1991_v17 = vmul.f32 %v1981_v11, %v3575_v37  ;;  %v1994_v15 = vmul.f32 %v1988_v53, %v3584_v43  ;;  %v1993_v10 = vmul.f32 %v1988_v53, %v3582_v42  ;;  %v614_v38 = vld [vmem:[%s4926_s1 + $0x84] sm:$0xf]  ;;  %v613_v37 = vld [vmem:[%s4926_s1 + $0x80] sm:$0xf] }
 0x93b   : > { %v1996_v16 = vmul.f32 %v1981_v11, %v3590_v47  ;;  %v1995_v7 = vmul.f32 %v1981_v11, %v3588_v46  ;;  %v1998_v43 = vmul.f32 %v1988_v53, %v3599_v52  ;;  %v1997_v42 = vmul.f32 %v1988_v53, %v3597_v51 }
 0x93c   : > { %2009 = vrot.lane.b32.xlu0 %v1992_v6, %s3375_s16  ;;  %2007 = vrot.lane.b32.xlu1 %v1991_v17, %s3375_s16  ;;  %v663_v47 = vmul.f32 0.001, %v613_v37 }
 0x940   : > { %2013 = vrot.lane.b32.xlu0 %v1994_v15, %s3375_s16  ;;  %2011 = vrot.lane.b32.xlu1 %v1993_v10, %s3375_s16  ;;  %v664_v10 = vmul.f32 0.001, %v614_v38 }
 0x944   : > { %2017 = vrot.lane.b32.xlu0 %v1996_v16, %s3375_s16  ;;  %2015 = vrot.lane.b32.xlu1 %v1995_v7, %s3375_s16 }
 0x948   : > { %2021 = vrot.lane.b32.xlu0 %v1998_v43, %s3375_s16  ;;  %2019 = vrot.lane.b32.xlu1 %v1997_v42, %s3375_s16  ;;  %s3384_s16 = smov [#allocation3]  }
 0x949   : > { %s3283_s17 = sshll.u32 %s3384_s16, 4  ;;  %s3284_s17 = int_to_ptr.vmem [resolvable:$false] %s3283_s17 }
 0x94a   : > { %s3285_s21 = scalar_lea.vmem %s3284_s17, 384  ;;  %p3286_p0 = scmp.lt.s32.totalorder %s4877_s25, %s3284_s17 }
 0x94b   : > { %p3287_p1 = scmp.lt.s32.totalorder %s3285_s21, %s3279_s8 }
 0x94c   : > { %2062 = vperm.xlu0 %3261, %v664_v10   ;;  %2058 = vperm.xlu1 %3262, %v663_v47  }
 0x94d   : > { %p3288_p2 = por %p3287_p1, %p3286_p0 }
 0x94f   : > { %p3289_p3 = pnand %p3288_p2, %p3282_p13 }
 0x9ae   : > { %v2008_v46 = vpop.permute.xlu1 %2007  ;;  %v4062_v7 = vpop.permute.xlu0 %2009 }
 0x9af   : > { %5097 = vst [vmem:[#allocation85_spill] sm:$0xff] %v4062_v7  ;;  %v2023_v15 = vrot.slane %v2008_v46, 4  ;;  %v2024_v16 = vrot.slane %v4062_v7, 4  ;;  %v779_v7 = vrot.slane %v3610_v60, 4 }
 0x9b1   : > { %v2031_v9 = vsel %vm149_vm0, %v2023_v15, %v2024_v16 }
 0x9b2   : > { %v4067_v12 = vsel %vm2032_vm10, %v2008_v46, %v2031_v9  ;;  %v2012_v52 = vpop.permute.xlu1 %2011  ;;  %v4069_v51 = vpop.permute.xlu0 %2013 }
 0x9b3   : > { %5098 = vst [vmem:[#allocation86_spill] sm:$0xff] %v4067_v12  ;;  %5099 = vst [vmem:[#allocation87_spill] sm:$0xff] %v4069_v51  ;;  %v2025_v11 = vrot.slane %v2012_v52, 4  ;;  %v2026_v53 = vrot.slane %v4069_v51, 4  ;;  %v778_v12 = vrot.slane %v3608_v59, 4 }
 0x9b5   : > { %v2034_v6 = vsel %vm149_vm0, %v2025_v11, %v2026_v53 }
 0x9b6   : > { %v4074_v17 = vsel %vm2032_vm10, %v2012_v52, %v2034_v6  ;;  %v2016_v38 = vpop.permute.xlu1 %2015  ;;  %v4076_v37 = vpop.permute.xlu0 %2017 }
 0x9b7   : > { %5100 = vst [vmem:[#allocation88_spill] sm:$0xff] %v4074_v17  ;;  %5101 = vst [vmem:[#allocation89_spill] sm:$0xff] %v4076_v37  ;;  %v2027_v43 = vrot.slane %v2016_v38, 4  ;;  %v2028_v42 = vrot.slane %v4076_v37, 4  ;;  %v4119_v17 = vld [vmem:[#allocation2 + $0x30] sm:$0xff] }
 0x9b9   : > { %v2036_v10 = vsel %vm149_vm0, %v2027_v43, %v2028_v42  ;;  %v4092_v42 = vld [vmem:[#allocation2 + $0x8] sm:$0xf] }
 0x9ba   : > { %v4081_v47 = vsel %vm2032_vm10, %v2016_v38, %v2036_v10  ;;  %v2020_v46 = vpop.permute.xlu1 %2019  ;;  %v4083_v15 = vpop.permute.xlu0 %2021  ;;  %5105 = vst [vmem:[#allocation93_spill] sm:$0xff] %v4092_v42  ;;  %v4095_v10 = vld [vmem:[#allocation2] sm:$0xff] }
 0x9bb   : > { %5102 = vst [vmem:[#allocation90_spill] sm:$0xff] %v4081_v47  ;;  %5103 = vst [vmem:[#allocation91_spill] sm:$0xff] %v4083_v15  ;;  %v2029_v16 = vrot.slane %v2020_v46, 4  ;;  %v2030_v9 = vrot.slane %v4083_v15, 4 }
 0x9bc   : > { %5106 = vst [vmem:[#allocation94_spill] sm:$0xff] %v4095_v10 }
 0x9bd   : > { %v2038_v52 = vsel %vm149_vm0, %v2029_v16, %v2030_v9  ;;  %v4098_v16 = vld [vmem:[#allocation2 + $0x18] sm:$0xf]  ;;  %v4101_v9 = vld [vmem:[#allocation2 + $0x10] sm:$0xff] }
 0x9be   : > { %v4088_v11 = vsel %vm2032_vm10, %v2020_v46, %v2038_v52  ;;  %5107 = vst [vmem:[#allocation95_spill] sm:$0xff] %v4098_v16  ;;  %5108 = vst [vmem:[#allocation96_spill] sm:$0xff] %v4101_v9  ;;  %vm2121_vm10 = vcmask 547840  }
 0x9bf   : > { %5104 = vst [vmem:[#allocation92_spill] sm:$0xff] %v4088_v11  ;;  %v4107_v11 = vld [vmem:[#allocation2 + $0x20] sm:$0xff] }
 0x9cb   : > { %v2059_v53 = vpop.permute.xlu1 %2058  ;;  %v2063_v6 = vpop.permute.xlu0 %2062 }
 0x9cc   : > { %v2070_v37 = vrot.slane %v2059_v53, %v3572_v33  ;;  %v2077_v43 = vrot.slane %v2063_v6, %v3572_v33  ;;  %v4104_v53 = vld [vmem:[#allocation2 + $0x28] sm:$0xf] }
 0x9ce   : > { %v2081_v38 = vmul.f32 %v4092_v42, %v2070_v37  ;;  %v2080_v47 = vmul.f32 %v4095_v10, %v2070_v37  ;;  %v2083_v46 = vmul.f32 %v4098_v16, %v2077_v43  ;;  %v2082_v52 = vmul.f32 %v4101_v9, %v2077_v43 }
 0x9cf   : > { %v2085_v6 = vmul.f32 %v4104_v53, %v2070_v37  ;;  %v2084_v15 = vmul.f32 %v4107_v11, %v2070_v37  ;;  %v2086_v51 = vmul.f32 %v4119_v17, %v2077_v43 }
 0x9d0   : > { %2098 = vrot.lane.b32.xlu0 %v2081_v38, %s3376_s24  ;;  %2096 = vrot.lane.b32.xlu1 %v2080_v47, %s3376_s24  ;;  %v616_v47 = vld [vmem:[%s4926_s1 + $0x8c] sm:$0xf]  ;;  %v615_v38 = vld [vmem:[%s4926_s1 + $0x88] sm:$0xf] }
 0x9d1   : > { %v666_v37 = vmul.f32 0.001, %v616_v47  ;;  %v788_v47 = vsel %vm149_vm0, %v779_v7, %v780_v14 }
 0x9d2   : > { %v789_v50 = vsel %vm786_vm11, %v3610_v60, %v788_v47 }
 0x9d4   : > { %2102 = vrot.lane.b32.xlu0 %v2083_v46, %s3376_s24  ;;  %2100 = vrot.lane.b32.xlu1 %v2082_v52, %s3376_s24  ;;  %v4116_v46 = vld [vmem:[#allocation2 + $0x38] sm:$0xf] }
 0x9d5   : > { %v2087_v52 = vmul.f32 %v4116_v46, %v2077_v43  ;;  %v703_v43 = vrot.slane %v3569_v32, %v3572_v33  ;;  %v869_v32 = vrot.slane %v3644_v21, 4  ;;  %v716_v33 = vmul.f32 %v4098_v16, %v710_v30 }
 0x9d6   : > { %v719_v16 = vmul.f32 %v4119_v17, %v710_v30 }
 0x9d7   : > { %v713_v14 = vmul.f32 %v4095_v10, %v703_v43  ;;  %v714_v7 = vmul.f32 %v4092_v42, %v703_v43  ;;  %v870_v10 = vrot.slane %v3646_v22, 4  ;;  %v871_v42 = vrot.slane %v3648_v23, 4 }
 0x9d8   : > { %2106 = vrot.lane.b32.xlu0 %v2085_v6, %s3376_s24  ;;  %2104 = vrot.lane.b32.xlu1 %v2084_v15, %s3376_s24  ;;  %v665_v15 = vmul.f32 0.001, %v615_v38  ;;  %v777_v6 = vrot.slane %v3606_v58, 4  ;;  %v781_v38 = vrot.slane %v3614_v62, 4  ;;  %v717_v60 = vmul.f32 %v4107_v11, %v703_v43 }
 0x9d9   : > { %v718_v47 = vmul.f32 %v4104_v53, %v703_v43  ;;  %v803_v8 = vadd.f32 %v3608_v59, %v714_v7  ;;  %v955_v59 = vrot.slane %v3670_v54, 4 }
 0x9dc   : > { %2110 = vrot.lane.b32.xlu0 %v2087_v52, %s3376_s24  ;;  %2108 = vrot.lane.b32.xlu1 %v2086_v51, %s3376_s24  ;;  %v785_v51 = vsel %vm149_vm0, %v777_v6, %v778_v12  ;;  %v782_v52 = vrot.slane %v3616_v63, 4  ;;  %v715_v12 = vmul.f32 %v4101_v9, %v710_v30  ;;  %v877_v9 = vsel %vm149_vm0, %v868_v31, %v869_v32  ;;  %s3379_s24 = smov 48  }
 0x9dd   : > { %v787_v6 = vsel %vm786_vm11, %v3606_v58, %v785_v51  ;;  %v872_v58 = vrot.slane %v3650_v24, 4  ;;  %v873_v51 = vrot.slane %v3652_v25, 4  ;;  %v876_v32 = vsel %vm875_vm12, %v3638_v18, %v874_v29 }
 0x9de   : > { %v790_v49 = vsel %vm149_vm0, %v781_v38, %v782_v52  ;;  %v720_v38 = vmul.f32 %v4116_v46, %v710_v30  ;;  %v802_v52 = vadd.f32 %v787_v6, %v713_v14  ;;  %v804_v13 = vadd.f32 %v789_v50, %v715_v12 }
 0x9df   : > { %v878_v43 = vsel %vm875_vm12, %v3642_v20, %v877_v9  ;;  %v879_v30 = vsel %vm149_vm0, %v870_v10, %v871_v42  ;;  %v881_v14 = vsel %vm149_vm0, %v872_v58, %v873_v51  ;;  %v807_v29 = vadd.f32 %v3616_v63, %v718_v47 }
 0x9e0   : > { %2151 = vperm.xlu0 %3261, %v666_v37   ;;  %2147 = vperm.xlu1 %3262, %v665_v15   ;;  %v783_v37 = vrot.slane %v3618_v0, 4  ;;  %v784_v15 = vrot.slane %v3620_v1, 4  ;;  %v891_v50 = vadd.f32 %v876_v32, %v802_v52  ;;  %v892_v42 = vadd.f32 %v3640_v19, %v803_v8 }
 0x9e1   : > { %v893_v10 = vadd.f32 %v878_v43, %v804_v13  ;;  %v880_v12 = vsel %vm875_vm12, %v3646_v22, %v879_v30  ;;  %v882_v7 = vsel %vm875_vm12, %v3650_v24, %v881_v14  ;;  %v961_v6 = vrot.slane %v3682_v4, 4 }
 0x9e2   : > { %v792_v48 = vsel %vm149_vm0, %v783_v37, %v784_v15  ;;  %v805_v37 = vadd.f32 %v3612_v61, %v716_v33  ;;  %v791_v15 = vsel %vm786_vm11, %v3614_v62, %v790_v49  ;;  %v956_v33 = vrot.slane %v3672_v55, 4 }
 0x9e3   : > { %v793_v31 = vsel %vm786_vm11, %v3618_v0, %v792_v48  ;;  %v957_v61 = vrot.slane %v3674_v56, 4  ;;  %v958_v62 = vrot.slane %v3676_v57, 4  ;;  %v959_v0 = vrot.slane %v3678_v2, 4 }
 0x9e4   : > { %v960_v48 = vrot.slane %v3680_v3, 4  ;;  %v806_v18 = vadd.f32 %v791_v15, %v717_v60  ;;  %v808_v20 = vadd.f32 %v793_v31, %v719_v16  ;;  %v809_v49 = vadd.f32 %v3620_v1, %v720_v38 }
 0x9e5   : > { %v894_v9 = vadd.f32 %v3644_v21, %v805_v37  ;;  %v962_v58 = vrot.slane %v3684_v5, 4  ;;  %v963_v63 = vsel %vm149_vm0, %v955_v59, %v956_v33  ;;  %v966_v1 = vsel %vm149_vm0, %v957_v61, %v958_v62 }
 0x9e6   : > { %v968_v19 = vsel %vm149_vm0, %v959_v0, %v960_v48  ;;  %v1044_v16 = vrot.slane %v3702_v34, 4  ;;  %v1045_v21 = vrot.slane %v3704_v35, 4  ;;  %v1046_v22 = vrot.slane %v3706_v36, 4 }
 0x9e7   : > { %v1047_v51 = vrot.slane %v3708_v39, 4  ;;  %v895_v24 = vadd.f32 %v880_v12, %v806_v18  ;;  %v896_v60 = vadd.f32 %v3648_v23, %v807_v29  ;;  %v897_v47 = vadd.f32 %v882_v7, %v808_v20  ;;  %v5109_v29 = vld [vmem:[#allocation8_spill] sm:$0xff] }
 0x9e8   : > { %v898_v38 = vadd.f32 %v3652_v25, %v809_v49  ;;  %v965_v52 = vsel %vm964_vm13, %v3670_v54, %v963_v63  ;;  %v967_v8 = vsel %vm964_vm13, %v3674_v56, %v966_v1  ;;  %v969_v13 = vsel %vm964_vm13, %v3678_v2, %v968_v19  ;;  %v5110_v49 = vld [vmem:[#allocation9_spill] sm:$0xff]  ;;  %v5112_v63 = vld [vmem:[#allocation11_spill] sm:$0xff]  ;;  %v5113_v19 = vld [vmem:[#allocation12_spill] sm:$0xff] }
 0x9e9   : > { %v970_v37 = vsel %vm149_vm0, %v961_v6, %v962_v58  ;;  %v1048_v15 = vrot.slane %v3710_v40, 4  ;;  %v1049_v31 = vrot.slane %v3712_v41, 4  ;;  %v1050_v23 = vrot.slane %v3714_v44, 4 }
 0x9ea   : > { %v1051_v32 = vrot.slane %v3716_v45, 4  ;;  %v981_v25 = vadd.f32 %v3672_v55, %v892_v42  ;;  %v1052_v54 = vsel %vm149_vm0, %v1044_v16, %v1045_v21  ;;  %v1055_v56 = vsel %vm149_vm0, %v1046_v22, %v1047_v51 }
 0x9eb   : > { %v980_v43 = vadd.f32 %v965_v52, %v891_v50  ;;  %v983_v2 = vadd.f32 %v3676_v57, %v894_v9  ;;  %v1133_v30 = vrot.slane %v3734_v26, 4  ;;  %v1134_v14 = vrot.slane %v3736_v27, 4 }
 0x9ec   : > { %v982_v59 = vadd.f32 %v967_v8, %v893_v10  ;;  %v984_v33 = vadd.f32 %v969_v13, %v895_v24  ;;  %v985_v61 = vadd.f32 %v3680_v3, %v896_v60  ;;  %v971_v62 = vsel %vm964_vm13, %v3682_v4, %v970_v37  ;;  %v5111_v3 = vld [vmem:[#allocation10_spill] sm:$0xff]  ;;  %v5116_v60 = vld [vmem:[#allocation15_spill] sm:$0xff] }
 0x9ed   : > { %v1054_v55 = vsel %vm1053_vm14, %v3702_v34, %v1052_v54  ;;  %v1056_v0 = vsel %vm1053_vm14, %v3706_v36, %v1055_v56  ;;  %v1057_v48 = vsel %vm149_vm0, %v1048_v15, %v1049_v31  ;;  %v1059_v57 = vsel %vm149_vm0, %v1050_v23, %v1051_v32  ;;  %v5115_v24 = vld [vmem:[#allocation14_spill] sm:$0xff]  ;;  %v5118_v23 = vld [vmem:[#allocation17_spill] sm:$0xff]  ;;  %v5120_v56 = vld [vmem:[#allocation19_spill] sm:$0xff] }
 0x9ee   : > { %v1135_v18 = vrot.slane %v3738_v28, 4  ;;  %v1136_v20 = vrot.slane %v5109_v29, 4  ;;  %v1137_v50 = vrot.slane %v5110_v49, 4  ;;  %v1138_v42 = vrot.slane %v5111_v3, 4 }
 0x9ef   : > { %v986_v10 = vadd.f32 %v971_v62, %v897_v47  ;;  %v987_v4 = vadd.f32 %v3684_v5, %v898_v38  ;;  %v1141_v34 = vsel %vm149_vm0, %v1133_v30, %v1134_v14  ;;  %v1069_v9 = vadd.f32 %v1054_v55, %v980_v43  ;;  %v5122_v14 = vld [vmem:[#allocation21_spill] sm:$0xff]  ;;  %v5124_v62 = vld [vmem:[#allocation23_spill] sm:$0xff] }
 0x9f0   : > { %v1070_v36 = vadd.f32 %v3704_v35, %v981_v25  ;;  %v1071_v12 = vadd.f32 %v1056_v0, %v982_v59  ;;  %v1072_v7 = vadd.f32 %v3708_v39, %v983_v2  ;;  %v1058_v6 = vsel %vm1053_vm14, %v3710_v40, %v1057_v48  ;;  %v5114_v39 = vld [vmem:[#allocation13_spill] sm:$0xff]  ;;  %v5119_v25 = vld [vmem:[#allocation18_spill] sm:$0xff]  ;;  %v5121_v2 = vld [vmem:[#allocation20_spill] sm:$0xff] }
 0x9f1   : > { %v1060_v58 = vsel %vm1053_vm14, %v3714_v44, %v1059_v57  ;;  %v1139_v1 = vrot.slane %v5112_v63, 4  ;;  %v1140_v16 = vrot.slane %v5113_v19, 4  ;;  %v1074_v5 = vadd.f32 %v3712_v41, %v985_v61  ;;  %v5117_v44 = vld [vmem:[#allocation16_spill] sm:$0xff] }
 0x9f2   : > { %v1143_v21 = vsel %vm1142_vm15, %v3734_v26, %v1141_v34  ;;  %v1144_v35 = vsel %vm149_vm0, %v1135_v18, %v1136_v20  ;;  %v1146_v22 = vsel %vm149_vm0, %v1137_v50, %v1138_v42  ;;  %v1222_v51 = vrot.slane %v5114_v39, 4  ;;  %v5125_v0 = vld [vmem:[#allocation24_spill] sm:$0xff] }
 0x9f3   : > { %v1223_v40 = vrot.slane %v5115_v24, 4  ;;  %v1224_v47 = vrot.slane %v5116_v60, 4  ;;  %v1225_v38 = vrot.slane %v5117_v44, 4  ;;  %v1073_v52 = vadd.f32 %v1058_v6, %v984_v33  ;;  %v5123_v33 = vld [vmem:[#allocation22_spill] sm:$0xff] }
 0x9f4   : > { %v1075_v8 = vadd.f32 %v1060_v58, %v986_v10  ;;  %v1076_v13 = vadd.f32 %v3716_v45, %v987_v4  ;;  %v1159_v41 = vadd.f32 %v3736_v27, %v1070_v36  ;;  %v1158_v37 = vadd.f32 %v1143_v21, %v1069_v9  ;;  %v5126_v4 = vld [vmem:[#allocation25_spill] sm:$0xff]  ;;  %v5127_v9 = vld [vmem:[#allocation26_spill] sm:$0xff] }
 0x9f5   : > { %v1145_v26 = vsel %vm1142_vm15, %v3738_v28, %v1144_v35  ;;  %v1147_v15 = vsel %vm1142_vm15, %v5110_v49, %v1146_v22  ;;  %v1148_v31 = vsel %vm149_vm0, %v1139_v1, %v1140_v16  ;;  %v1226_v32 = vrot.slane %v5118_v23, 4 }
 0x9f6   : > { %v1227_v54 = vrot.slane %v5119_v25, 4  ;;  %v1228_v43 = vrot.slane %v5120_v56, 4  ;;  %v1229_v30 = vrot.slane %v5121_v2, 4  ;;  %v1161_v45 = vadd.f32 %v5109_v29, %v1072_v7 }
 0x9f7   : > { %v1230_v27 = vsel %vm149_vm0, %v1222_v51, %v1223_v40  ;;  %v1233_v28 = vsel %vm149_vm0, %v1224_v47, %v1225_v38  ;;  %v1311_v59 = vrot.slane %v5122_v14, 4  ;;  %v1312_v61 = vrot.slane %v5123_v33, 4 }
 0x9f8   : > { %v1313_v55 = vrot.slane %v5124_v62, 4  ;;  %v1314_v48 = vrot.slane %v5125_v0, 4  ;;  %v1160_v57 = vadd.f32 %v1145_v26, %v1071_v12  ;;  %v1162_v18 = vadd.f32 %v1147_v15, %v1073_v52  ;;  %v5128_v12 = vld [vmem:[#allocation27_spill] sm:$0xff]  ;;  %v5131_v52 = vld [vmem:[#allocation30_spill] sm:$0xff]  ;;  %v5134_v15 = vld [vmem:[#allocation33_spill] sm:$0xff] }
 0x9f9   : > { %v1163_v20 = vadd.f32 %v5111_v3, %v1074_v5  ;;  %v1149_v29 = vsel %vm1142_vm15, %v5112_v63, %v1148_v31  ;;  %v1232_v49 = vsel %vm1231_vm1, %v5114_v39, %v1230_v27  ;;  %v1234_v50 = vsel %vm1231_vm1, %v5116_v60, %v1233_v28  ;;  %v5129_v3 = vld [vmem:[#allocation28_spill] sm:$0xff] }
 0x9fa   : > { %v1235_v42 = vsel %vm149_vm0, %v1226_v32, %v1227_v54  ;;  %v1237_v10 = vsel %vm149_vm0, %v1228_v43, %v1229_v30  ;;  %v1315_v34 = vrot.slane %v5126_v4, 4  ;;  %v1316_v36 = vrot.slane %v5127_v9, 4 }
 0x9fb   : > { %v1317_v7 = vrot.slane %v5128_v12, 4  ;;  %v1318_v6 = vrot.slane %v5129_v3, 4  ;;  %v1165_v58 = vadd.f32 %v5113_v19, %v1076_v13  ;;  %v1319_v63 = vsel %vm149_vm0, %v1311_v59, %v1312_v61  ;;  %v5132_v13 = vld [vmem:[#allocation31_spill] sm:$0xff] }
 0x9fc   : > { %v1322_v1 = vsel %vm149_vm0, %v1313_v55, %v1314_v48  ;;  %v1164_v16 = vadd.f32 %v1149_v29, %v1075_v8  ;;  %v1247_v5 = vadd.f32 %v1232_v49, %v1158_v37  ;;  %v1248_v21 = vadd.f32 %v5115_v24, %v1159_v41  ;;  %v5133_v37 = vld [vmem:[#allocation32_spill] sm:$0xff]  ;;  %v5139_v29 = vld [vmem:[#allocation38_spill] sm:$0xff] }
 0x9fd   : > { %v1250_v35 = vadd.f32 %v5117_v44, %v1161_v45  ;;  %v1249_v22 = vadd.f32 %v1234_v50, %v1160_v57  ;;  %v1236_v39 = vsel %vm1231_vm1, %v5118_v23, %v1235_v42  ;;  %v1252_v51 = vadd.f32 %v5119_v25, %v1163_v20  ;;  %v5130_v44 = vld [vmem:[#allocation29_spill] sm:$0xff]  ;;  %v5135_v23 = vld [vmem:[#allocation34_spill] sm:$0xff]  ;;  %v5136_v25 = vld [vmem:[#allocation35_spill] sm:$0xff] }
 0x9fe   : > { %v1238_v19 = vsel %vm1231_vm1, %v5120_v56, %v1237_v10  ;;  %v1321_v40 = vsel %vm1320_vm2, %v5122_v14, %v1319_v63  ;;  %v1323_v60 = vsel %vm1320_vm2, %v5124_v62, %v1322_v1  ;;  %v1324_v47 = vsel %vm149_vm0, %v1315_v34, %v1316_v36  ;;  %v5137_v56 = vld [vmem:[#allocation36_spill] sm:$0xff]  ;;  %v5143_v36 = vld [vmem:[#allocation42_spill] sm:$0xff]  ;;  %v5146_v1 = vld [vmem:[#allocation45_spill] sm:$0xff] }
 0x9ff   : > { %v1326_v24 = vsel %vm149_vm0, %v1317_v7, %v1318_v6  ;;  %v1400_v38 = vrot.slane %v5130_v44, 4  ;;  %v1401_v8 = vrot.slane %v5131_v52, 4  ;;  %v1402_v41 = vrot.slane %v5132_v13, 4  ;;  %v5141_v42 = vld [vmem:[#allocation40_spill] sm:$0xff]  ;;  %v5144_v7 = vld [vmem:[#allocation43_spill] sm:$0xff] }
 0xa00   : > { %v1403_v26 = vrot.slane %v5133_v37, 4  ;;  %v1404_v31 = vrot.slane %v5134_v15, 4  ;;  %v1405_v32 = vrot.slane %v5135_v23, 4  ;;  %v1406_v54 = vrot.slane %v5136_v25, 4 }
 0xa01   : > { %v1407_v43 = vrot.slane %v5137_v56, 4  ;;  %v1251_v30 = vadd.f32 %v1236_v39, %v1162_v18  ;;  %v1253_v45 = vadd.f32 %v1238_v19, %v1164_v16  ;;  %v1254_v27 = vadd.f32 %v5121_v2, %v1165_v58  ;;  %v5145_v58 = vld [vmem:[#allocation44_spill] sm:$0xff] }
 0xa02   : > { %v1337_v28 = vadd.f32 %v5123_v33, %v1248_v21  ;;  %v1336_v14 = vadd.f32 %v1321_v40, %v1247_v5  ;;  %v1338_v59 = vadd.f32 %v1323_v60, %v1249_v22  ;;  %v1339_v61 = vadd.f32 %v5125_v0, %v1250_v35  ;;  %v5138_v33 = vld [vmem:[#allocation37_spill] sm:$0xff]  ;;  %v5140_v0 = vld [vmem:[#allocation39_spill] sm:$0xff]  ;;  %v5147_v5 = vld [vmem:[#allocation46_spill] sm:$0xff] }
 0xa03   : > { %v1325_v62 = vsel %vm1320_vm2, %v5126_v4, %v1324_v47  ;;  %v1327_v55 = vsel %vm1320_vm2, %v5128_v12, %v1326_v24  ;;  %v1408_v48 = vsel %vm149_vm0, %v1400_v38, %v1401_v8  ;;  %v1411_v57 = vsel %vm149_vm0, %v1402_v41, %v1403_v26  ;;  %v5142_v4 = vld [vmem:[#allocation41_spill] sm:$0xff]  ;;  %v5148_v8 = vld [vmem:[#allocation47_spill] sm:$0xff]  ;;  %v5149_v41 = vld [vmem:[#allocation48_spill] sm:$0xff] }
 0xa04   : > { %v1413_v18 = vsel %vm149_vm0, %v1404_v31, %v1405_v32  ;;  %v1415_v2 = vsel %vm149_vm0, %v1406_v54, %v1407_v43  ;;  %v1489_v20 = vrot.slane %v5138_v33, 4  ;;  %v1490_v49 = vrot.slane %v5139_v29, 4  ;;  %v5151_v32 = vld [vmem:[#allocation50_spill] sm:$0xff] }
 0xa05   : > { %v1491_v50 = vrot.slane %v5140_v0, 4  ;;  %v1492_v10 = vrot.slane %v5141_v42, 4  ;;  %v1493_v34 = vrot.slane %v5142_v4, 4  ;;  %v1494_v12 = vrot.slane %v5143_v36, 4 }
 0xa06   : > { %v1495_v6 = vrot.slane %v5144_v7, 4  ;;  %v1496_v63 = vrot.slane %v5145_v58, 4  ;;  %v1578_v16 = vrot.slane %v5146_v1, 4  ;;  %v1579_v21 = vrot.slane %v5147_v5, 4 }
 0xa07   : > { %v1340_v35 = vadd.f32 %v1325_v62, %v1251_v30  ;;  %v1341_v22 = vadd.f32 %v5127_v9, %v1252_v51  ;;  %v1342_v39 = vadd.f32 %v1327_v55, %v1253_v45  ;;  %v1343_v19 = vadd.f32 %v5129_v3, %v1254_v27 }
 0xa08   : > { %v1410_v40 = vsel %vm1409_vm3, %v5130_v44, %v1408_v48  ;;  %v1426_v60 = vadd.f32 %v5131_v52, %v1337_v28  ;;  %v1412_v47 = vsel %vm1409_vm3, %v5132_v13, %v1411_v57  ;;  %v1414_v24 = vsel %vm1409_vm3, %v5134_v15, %v1413_v18  ;;  %v5150_v15 = vld [vmem:[#allocation49_spill] sm:$0xff]  ;;  %v5153_v18 = vld [vmem:[#allocation52_spill] sm:$0xff] }
 0xa09   : > { %v1416_v38 = vsel %vm1409_vm3, %v5136_v25, %v1415_v2  ;;  %v1497_v9 = vsel %vm149_vm0, %v1489_v20, %v1490_v49  ;;  %v1500_v51 = vsel %vm149_vm0, %v1491_v50, %v1492_v10  ;;  %v1502_v3 = vsel %vm149_vm0, %v1493_v34, %v1494_v12  ;;  %v5155_v49 = vld [vmem:[#allocation54_spill] sm:$0xff]  ;;  %v5156_v50 = vld [vmem:[#allocation55_spill] sm:$0xff] }
 0xa0a   : > { %v1504_v44 = vsel %vm149_vm0, %v1495_v6, %v1496_v63  ;;  %v1586_v52 = vsel %vm149_vm0, %v1578_v16, %v1579_v21  ;;  %v1580_v13 = vrot.slane %v5148_v8, 4  ;;  %v1581_v26 = vrot.slane %v5149_v41, 4 }
 0xa0b   : > { %v1582_v31 = vrot.slane %v5150_v15, 4  ;;  %v1583_v25 = vrot.slane %v5151_v32, 4  ;;  %v1425_v54 = vadd.f32 %v1410_v40, %v1336_v14  ;;  %v1427_v43 = vadd.f32 %v1412_v47, %v1338_v59 }
 0xa0c   : > { %v1428_v30 = vadd.f32 %v5133_v37, %v1339_v61  ;;  %v1430_v45 = vadd.f32 %v5135_v23, %v1341_v22  ;;  %v1429_v27 = vadd.f32 %v1414_v24, %v1340_v35  ;;  %v1431_v28 = vadd.f32 %v1416_v38, %v1342_v39  ;;  %v5159_v24 = vld [vmem:[#allocation58_spill] sm:$0xff]  ;;  %v5160_v38 = vld [vmem:[#allocation59_spill] sm:$0xff] }
 0xa0d   : > { %v1432_v62 = vadd.f32 %v5137_v56, %v1343_v19  ;;  %v1499_v55 = vsel %vm1498_vm4, %v5138_v33, %v1497_v9  ;;  %v1501_v48 = vsel %vm1498_vm4, %v5140_v0, %v1500_v51  ;;  %v1503_v57 = vsel %vm1498_vm4, %v5142_v4, %v1502_v3  ;;  %v5152_v56 = vld [vmem:[#allocation51_spill] sm:$0xff]  ;;  %v5154_v33 = vld [vmem:[#allocation53_spill] sm:$0xff]  ;;  %v5157_v4 = vld [vmem:[#allocation56_spill] sm:$0xff] }
 0xa0e   : > { %v1505_v14 = vsel %vm1498_vm4, %v5144_v7, %v1504_v44  ;;  %v1588_v37 = vsel %vm1587_vm5, %v5146_v1, %v1586_v52  ;;  %v1589_v23 = vsel %vm149_vm0, %v1580_v13, %v1581_v26  ;;  %v1591_v59 = vsel %vm149_vm0, %v1582_v31, %v1583_v25  ;;  %v5162_v52 = vld [vmem:[#allocation61_spill] sm:$0xff]  ;;  %v5163_v13 = vld [vmem:[#allocation62_spill] sm:$0xff]  ;;  %v5164_v25 = vld [vmem:[#allocation63_spill] sm:$0xff] }
 0xa0f   : > { %v1584_v61 = vrot.slane %v5152_v56, 4  ;;  %v1585_v2 = vrot.slane %v5153_v18, 4  ;;  %v1667_v20 = vrot.slane %v5154_v33, 4  ;;  %v1668_v0 = vrot.slane %v5155_v49, 4 }
 0xa10   : > { %v1669_v10 = vrot.slane %v5156_v50, 4  ;;  %v1670_v34 = vrot.slane %v5157_v4, 4  ;;  %v1514_v12 = vadd.f32 %v1499_v55, %v1425_v54  ;;  %v1515_v7 = vadd.f32 %v5139_v29, %v1426_v60  ;;  %v5166_v55 = vld [vmem:[#allocation65_spill] sm:$0xff] }
 0xa11   : > { %v1516_v6 = vadd.f32 %v1501_v48, %v1427_v43  ;;  %v1517_v63 = vadd.f32 %v5141_v42, %v1428_v30  ;;  %v1518_v1 = vadd.f32 %v1503_v57, %v1429_v27  ;;  %v1519_v16 = vadd.f32 %v5143_v36, %v1430_v45  ;;  %v5158_v36 = vld [vmem:[#allocation57_spill] sm:$0xff]  ;;  %v5165_v43 = vld [vmem:[#allocation64_spill] sm:$0xff]  ;;  %v5167_v57 = vld [vmem:[#allocation66_spill] sm:$0xff] }
 0xa12   : > { %v1520_v21 = vadd.f32 %v1505_v14, %v1431_v28  ;;  %v1521_v35 = vadd.f32 %v5145_v58, %v1432_v62  ;;  %v1603_v22 = vadd.f32 %v1588_v37, %v1514_v12  ;;  %v1604_v39 = vadd.f32 %v5147_v5, %v1515_v7  ;;  %v5161_v5 = vld [vmem:[#allocation60_spill] sm:$0xff]  ;;  %v5170_v7 = vld [vmem:[#allocation71_spill] sm:$0xff] }
 0xa13   : > { %v1590_v19 = vsel %vm1587_vm5, %v5148_v8, %v1589_v23  ;;  %v1592_v40 = vsel %vm1587_vm5, %v5150_v15, %v1591_v59  ;;  %v1593_v29 = vsel %vm149_vm0, %v1584_v61, %v1585_v2  ;;  %v1675_v42 = vsel %vm149_vm0, %v1667_v20, %v1668_v0  ;;  %v5168_v0 = vld [vmem:[#allocation69_spill] sm:$0xff] }
 0xa14   : > { %v1678_v60 = vsel %vm149_vm0, %v1669_v10, %v1670_v34  ;;  %v1671_v47 = vrot.slane %v5158_v36, 4  ;;  %v1672_v58 = vrot.slane %v5159_v24, 4  ;;  %v1673_v9 = vrot.slane %v5160_v38, 4  ;;  %v5169_v10 = vld [vmem:[#allocation70_spill] sm:$0xff] }
 0xa15   : > { %v1674_v51 = vrot.slane %v5161_v5, 4  ;;  %v1605_v3 = vadd.f32 %v1590_v19, %v1516_v6  ;;  %v1606_v44 = vadd.f32 %v5149_v41, %v1517_v63  ;;  %v1756_v8 = vrot.slane %v5162_v52, 4 }
 0xa16   : > { %v1757_v26 = vrot.slane %v5163_v13, 4  ;;  %v1608_v15 = vadd.f32 %v5151_v32, %v1519_v16  ;;  %v1594_v31 = vsel %vm1587_vm5, %v5152_v56, %v1593_v29  ;;  %v1758_v54 = vrot.slane %v5164_v25, 4 }
 0xa17   : > { %v1759_v30 = vrot.slane %v5165_v43, 4  ;;  %v1607_v45 = vadd.f32 %v1592_v40, %v1518_v1  ;;  %v1610_v27 = vadd.f32 %v5153_v18, %v1521_v35  ;;  %v1677_v28 = vsel %vm1676_vm6, %v5154_v33, %v1675_v42 }
 0xa18   : > { %v1679_v41 = vsel %vm1676_vm6, %v5156_v50, %v1678_v60  ;;  %v1680_v62 = vsel %vm149_vm0, %v1671_v47, %v1672_v58  ;;  %v1682_v32 = vsel %vm149_vm0, %v1673_v9, %v1674_v51  ;;  %v1760_v48 = vrot.slane %v5166_v55, 4 }
 0xa19   : > { %v1761_v14 = vrot.slane %v5167_v57, 4  ;;  %v1609_v37 = vadd.f32 %v1594_v31, %v1520_v21  ;;  %v1693_v23 = vadd.f32 %v5155_v49, %v1604_v39  ;;  %v1764_v59 = vsel %vm149_vm0, %v1756_v8, %v1757_v26  ;;  %v5172_v21 = vld [vmem:[#allocation77_spill] sm:$0xff] }
 0xa1a   : > { %v1692_v56 = vadd.f32 %v1677_v28, %v1603_v22  ;;  %v1694_v61 = vadd.f32 %v1679_v41, %v1605_v3  ;;  %v1695_v18 = vadd.f32 %v5157_v4, %v1606_v44  ;;  %v1767_v2 = vsel %vm149_vm0, %v1758_v54, %v1759_v30  ;;  %v5171_v4 = vld [vmem:[#allocation72_spill] sm:$0xff]  ;;  %v5173_v22 = vld [vmem:[#allocation78_spill] sm:$0xff]  ;;  %v5178_v30 = vld [vmem:[#allocation73_spill] sm:$0xff] }
 0xa1b   : > { %v1681_v33 = vsel %vm1676_vm6, %v5158_v36, %v1680_v62  ;;  %v1683_v20 = vsel %vm1676_vm6, %v5160_v38, %v1682_v32  ;;  %v1845_v50 = vrot.slane %v5168_v0, 4  ;;  %v1846_v34 = vrot.slane %v5169_v10, 4  ;;  %v5175_v44 = vld [vmem:[#allocation80_spill] sm:$0xff]  ;;  %v5180_v32 = vld [vmem:[#allocation81_spill] sm:$0xff] }
 0xa1c   : > { %v1766_v49 = vsel %vm1765_vm7, %v5162_v52, %v1764_v59  ;;  %v1769_v12 = vsel %vm149_vm0, %v1760_v48, %v1761_v14  ;;  %v1847_v6 = vrot.slane %v5170_v7, 4  ;;  %v1848_v63 = vrot.slane %v5171_v4, 4  ;;  %v5181_v48 = vld [vmem:[#allocation82_spill] sm:$0xff] }
 0xa1d   : > { %v1697_v1 = vadd.f32 %v5159_v24, %v1608_v15  ;;  %v1768_v16 = vsel %vm1765_vm7, %v5164_v25, %v1767_v2  ;;  %v1934_v35 = vrot.slane %v5172_v21, 4  ;;  %v1935_v39 = vrot.slane %v5173_v22, 4  ;;  %v5177_v15 = vld [vmem:[#allocation68_spill] sm:$0xff] }
 0xa1e   : > { %v1696_v19 = vadd.f32 %v1681_v33, %v1607_v45  ;;  %v4416_v40 = vadd.f32 %v1683_v20, %v1609_v37  ;;  %v1699_v29 = vadd.f32 %v5161_v5, %v1610_v27  ;;  %v1782_v42 = vadd.f32 %v5163_v13, %v1693_v23  ;;  %v5174_v5 = vld [vmem:[#allocation79_spill] sm:$0xff]  ;;  %v5179_v27 = vld [vmem:[#allocation74_spill] sm:$0xff]  ;;  %v5183_v33 = vld [vmem:[#allocation76_spill] sm:$0xff] }
 0xa1f   : > { %v1781_v60 = vadd.f32 %v1766_v49, %v1692_v56  ;;  %v1770_v36 = vsel %vm1765_vm7, %v5166_v55, %v1769_v12  ;;  %v1853_v47 = vsel %vm149_vm0, %v1845_v50, %v1846_v34  ;;  %v1783_v24 = vadd.f32 %v1768_v16, %v1694_v61  ;;  %v5176_v13 = vld [vmem:[#allocation67_spill] sm:$0xff]  ;;  %v5184_v34 = vld [vmem:[#allocation85_spill] sm:$0xff] }
 0xa20   : > { %v1784_v58 = vadd.f32 %v5165_v43, %v1695_v18  ;;  %v1786_v38 = vadd.f32 %v5167_v57, %v1697_v1  ;;  %v1856_v9 = vsel %vm149_vm0, %v1847_v6, %v1848_v63  ;;  %v1942_v51 = vsel %vm149_vm0, %v1934_v35, %v1935_v39  ;;  %v5182_v18 = vld [vmem:[#allocation75_spill] sm:$0xff]  ;;  %v5186_v63 = vld [vmem:[#allocation84_spill] sm:$0xff] }
 0xa21   : > { %v1936_v3 = vrot.slane %v5174_v5, 4  ;;  %v1937_v52 = vrot.slane %v5175_v44, 4  ;;  %v1785_v8 = vadd.f32 %v1770_v36, %v1696_v19  ;;  %v1762_v26 = vrot.slane %v5176_v13, 4  ;;  %v5185_v6 = vld [vmem:[#allocation83_spill] sm:$0xff] }
 0xa22   : > { %v1763_v31 = vrot.slane %v5177_v15, 4  ;;  %v1855_v25 = vsel %vm1854_vm8, %v5168_v0, %v1853_v47  ;;  %v1871_v54 = vadd.f32 %v5169_v10, %v1782_v42  ;;  %v1857_v43 = vsel %vm1854_vm8, %v5170_v7, %v1856_v9  ;;  %v5187_v47 = vld [vmem:[#allocation86_spill] sm:$0xff] }
 0xa23   : > { %v1849_v45 = vrot.slane %v5178_v30, 4  ;;  %v1850_v28 = vrot.slane %v5179_v27, 4  ;;  %v1788_v41 = vadd.f32 %v5177_v15, %v1699_v29  ;;  %v1944_v62 = vsel %vm1943_vm9, %v5172_v21, %v1942_v51 }
 0xa24   : > { %v1938_v55 = vrot.slane %v5180_v32, 4  ;;  %v1939_v57 = vrot.slane %v5181_v48, 4  ;;  %v1870_v14 = vadd.f32 %v1855_v25, %v1781_v60  ;;  %v1873_v37 = vadd.f32 %v5171_v4, %v1784_v58  ;;  %v5188_v58 = vld [vmem:[#allocation87_spill] sm:$0xff] }
 0xa25   : > { %v1960_v23 = vadd.f32 %v5173_v22, %v1871_v54  ;;  %v1945_v59 = vsel %vm149_vm0, %v1936_v3, %v1937_v52  ;;  %v1771_v56 = vsel %vm149_vm0, %v1762_v26, %v1763_v31  ;;  %v1872_v61 = vadd.f32 %v1857_v43, %v1783_v24 }
 0xa26   : > { %v1851_v2 = vrot.slane %v5182_v18, 4  ;;  %v1852_v20 = vrot.slane %v5183_v33, 4  ;;  %v1858_v0 = vsel %vm149_vm0, %v1849_v45, %v1850_v28  ;;  %v1959_v50 = vadd.f32 %v1944_v62, %v1870_v14  ;;  %v5190_v62 = vld [vmem:[#allocation89_spill] sm:$0xff] }
 0xa27   : > { %v1962_v10 = vadd.f32 %v5175_v44, %v1873_v37  ;;  %v2049_v49 = vadd.f32 %v5184_v34, %v1960_v23  ;;  %v1946_v12 = vsel %vm1943_vm9, %v5174_v5, %v1945_v59  ;;  %v1947_v7 = vsel %vm149_vm0, %v1938_v55, %v1939_v57 }
 0xa28   : > { %v1940_v4 = vrot.slane %v5185_v6, 4  ;;  %v1941_v1 = vrot.slane %v5186_v63, 4  ;;  %v1772_v19 = vsel %vm1765_vm7, %v5176_v13, %v1771_v56  ;;  %v1859_v29 = vsel %vm1854_vm8, %v5178_v30, %v1858_v0 }
 0xa29   : > { %v1875_v42 = vadd.f32 %v5179_v27, %v1786_v38  ;;  %v1860_v60 = vsel %vm149_vm0, %v1851_v2, %v1852_v20  ;;  %v1961_v36 = vadd.f32 %v1946_v12, %v1872_v61  ;;  %v2048_v24 = vadd.f32 %v5187_v47, %v1959_v50  ;;  %v5189_v27 = vld [vmem:[#allocation88_spill] sm:$0xff] }
 0xa2a   : > { %v2051_v9 = vadd.f32 %v5188_v58, %v1962_v10  ;;  %v1948_v5 = vsel %vm1943_vm9, %v5180_v32, %v1947_v7  ;;  %v1949_v44 = vsel %vm149_vm0, %v1940_v4, %v1941_v1  ;;  %v1787_v54 = vadd.f32 %v1772_v19, %v4416_v40 }
 0xa2b   : > { %v1964_v3 = vadd.f32 %v5181_v48, %v1875_v42  ;;  %v1874_v43 = vadd.f32 %v1859_v29, %v1785_v8  ;;  %v1877_v30 = vadd.f32 %v5183_v33, %v1788_v41  ;;  %v1861_v45 = vsel %vm1854_vm8, %v5182_v18, %v1860_v60  ;;  %v5191_v18 = vld [vmem:[#allocation90_spill] sm:$0xff]  ;;  %v5192_v33 = vld [vmem:[#allocation91_spill] sm:$0xff] }
 0xa2c   : > { %v2050_v28 = vadd.f32 %v5189_v27, %v1961_v36  ;;  %v1950_v57 = vsel %vm1943_vm9, %v5185_v6, %v1949_v44  ;;  %v1876_v61 = vadd.f32 %v1861_v45, %v1787_v54  ;;  %v5194_v29 = vld [vmem:[#allocation7_spill] sm:$0xff]  ;;  %v5195_v36 = vld [vmem:[#allocation93_spill] sm:$0xff]  ;;  %v619_v54 = vld [vmem:[%s4926_s1 + $0x98] sm:$0xf]  ;;  %vm2210_vm11 = vcmask 539648  }
 0xa2d   : > { %v2053_v32 = vadd.f32 %v5190_v62, %v1964_v3  ;;  %v1963_v48 = vadd.f32 %v1948_v5, %v1874_v43  ;;  %v1966_v14 = vadd.f32 %v5186_v63, %v1877_v30  ;;  %v5193_v63 = vld [vmem:[#allocation92_spill] sm:$0xff]  ;;  %v617_v44 = vld [vmem:[%s4926_s1 + $0x90] sm:$0xf]  ;;  %v620_v43 = vld [vmem:[%s4926_s1 + $0x9c] sm:$0xf]  ;;  %vm2299_vm12 = vcmask 531456  }
 0xa2e   : > { %v1965_v50 = vadd.f32 %v1950_v57, %v1876_v61  ;;  %v5198_v5 = vld [vmem:[#allocation96_spill] sm:$0xff]  ;;  %v669_v30 = vmul.f32 0.001, %v619_v54  ;;  %v622_v45 = vld [vmem:[%s4926_s1 + $0xa4] sm:$0xf]  ;;  %vm2388_vm13 = vcmask 523264  }
 0xa2f   : > { %v2052_v2 = vadd.f32 %v5191_v18, %v1963_v48  ;;  %v2055_v20 = vadd.f32 %v5192_v33, %v1966_v14  ;;  %v623_v62 = vld [vmem:[%s4926_s1 + $0xa8] sm:$0xf]  ;;  %v625_v57 = vld [vmem:[%s4926_s1 + $0xb0] sm:$0xf]  ;;  %v626_v14 = vld [vmem:[%s4926_s1 + $0xb4] sm:$0xf] }
 0xa30   : > { %v2054_v1 = vadd.f32 %v5193_v63, %v1965_v50  ;;  %v629_v18 = vld [vmem:[%s4926_s1 + $0xc0] sm:$0xf]  ;;  %vm2485_vm14 = vcmask 392192   ;;  %vm2578_vm15 = vcmask 384000   ;;  %vm2671_vm1 = vcmask 375808  }
 0xa31   : > { %v679_v33 = vmul.f32 0.001, %v629_v18  ;;  %vm2764_vm2 = vcmask 367616   ;;  %vm2857_vm3 = vcmask 359424   ;;  %vm2911_vm4 = vcmask 519168  }
 0xa32   : > { %vm3080_vm5 = vcmask 1041408   ;;  %vm3081_vm6 = vcmask 1043458   ;;  %vm3065_vm7 = vcmask 1043459   ;;  %vm3083_vm9 = vcmask 521220  }
 0xa33   : > { %vm3082_vm8 = vmor %vm3081_vm6, %vm3080_vm5 }
 0xa42   : > { %v2097_v16 = vpop.permute.xlu1 %2096  ;;  %v2099_v21 = vpop.permute.xlu0 %2098 }
 0xa43   : > { %v2112_v35 = vrot.slane %v2097_v16, 4  ;;  %v2113_v22 = vrot.slane %v2099_v21, 4  ;;  %v4457_v39 = vadd.f32 %v2099_v21, %v2049_v49 }
 0xa45   : > { %v2120_v51 = vsel %vm149_vm0, %v2112_v35, %v2113_v22 }
 0xa46   : > { %v2122_v52 = vsel %vm2121_vm10, %v2097_v16, %v2120_v51  ;;  %v2101_v13 = vpop.permute.xlu1 %2100  ;;  %v2103_v38 = vpop.permute.xlu0 %2102 }
 0xa47   : > { %v4473_v26 = vadd.f32 %v2122_v52, %v2048_v24  ;;  %v2114_v15 = vrot.slane %v2101_v13, 4  ;;  %v2115_v31 = vrot.slane %v2103_v38, 4  ;;  %v4475_v25 = vadd.f32 %v2103_v38, %v2051_v9  ;;  %v5196_v24 = vld [vmem:[#allocation94_spill] sm:$0xff]  ;;  %v5197_v9 = vld [vmem:[#allocation95_spill] sm:$0xff]  ;;  %v618_v52 = vld [vmem:[%s4926_s1 + $0x94] sm:$0xf] }
 0xa49   : > { %v2123_v55 = vsel %vm149_vm0, %v2114_v15, %v2115_v31  ;;  %v667_v15 = vmul.f32 0.001, %v617_v44  ;;  %v668_v31 = vmul.f32 0.001, %v618_v52 }
 0xa4a   : > { %v2124_v40 = vsel %vm2121_vm10, %v2101_v13, %v2123_v55  ;;  %v2105_v8 = vpop.permute.xlu1 %2104  ;;  %v2107_v37 = vpop.permute.xlu0 %2106  ;;  %v673_v55 = vmul.f32 0.001, %v623_v62 }
 0xa4b   : > { %v4488_v41 = vadd.f32 %v2124_v40, %v2050_v28  ;;  %v2116_v23 = vrot.slane %v2105_v8, 4  ;;  %v2117_v59 = vrot.slane %v2107_v37, 4  ;;  %v4490_v56 = vadd.f32 %v2107_v37, %v2053_v32  ;;  %v624_v32 = vld [vmem:[%s4926_s1 + $0xac] sm:$0xf]  ;;  %v627_v37 = vld [vmem:[%s4926_s1 + $0xb8] sm:$0xf] }
 0xa4c   : > { %v672_v28 = vmul.f32 0.001, %v622_v45  ;;  %v674_v48 = vmul.f32 0.001, %v624_v32  ;;  %v675_v40 = vmul.f32 0.001, %v625_v57 }
 0xa4d   : > { %v2125_v0 = vsel %vm149_vm0, %v2116_v23, %v2117_v59  ;;  %v628_v23 = vld [vmem:[%s4926_s1 + $0xbc] sm:$0xf]  ;;  %v677_v59 = vmul.f32 0.001, %v627_v37  ;;  %v3276_v32 = vld [vmem:[#allocation2 + $0x20] sm:$0xff] }
 0xa4e   : > { %v2126_v10 = vsel %vm2121_vm10, %v2105_v8, %v2125_v0  ;;  %v2109_v34 = vpop.permute.xlu1 %2108  ;;  %v2111_v49 = vpop.permute.xlu0 %2110  ;;  %v676_v8 = vmul.f32 0.001, %v626_v14  ;;  %v678_v61 = vmul.f32 0.001, %v628_v23 }
 0xa4f   : > { %v4496_v12 = vadd.f32 %v2126_v10, %v2052_v2  ;;  %v2118_v7 = vrot.slane %v2109_v34, 4  ;;  %v2119_v6 = vrot.slane %v2111_v49, 4  ;;  %v4498_v4 = vadd.f32 %v2111_v49, %v2055_v20  ;;  %v630_v2 = vld [vmem:[%s4926_s1 + $0xc4] sm:$0xf] }
 0xa50   : > { %v680_v20 = vmul.f32 0.001, %v630_v2 }
 0xa51   : > { %v2127_v16 = vsel %vm149_vm0, %v2118_v7, %v2119_v6 }
 0xa52   : > { %v2128_v21 = vsel %vm2121_vm10, %v2109_v34, %v2127_v16  ;;  %vm3067_vm10 = vcmask 1045509  }
 0xa53   : > { %v4503_v35 = vadd.f32 %v2128_v21, %v2054_v1 }
 0xa5f   : > { %v2148_v22 = vpop.permute.xlu1 %2147  ;;  %v2152_v19 = vpop.permute.xlu0 %2151 }
 0xa60   : > { %v2159_v42 = vrot.slane %v2148_v22, %v5194_v29  ;;  %v2166_v60 = vrot.slane %v2152_v19, %v5194_v29 }
 0xa62   : > { %v2170_v47 = vmul.f32 %v5195_v36, %v2159_v42  ;;  %v2169_v58 = vmul.f32 %v5196_v24, %v2159_v42  ;;  %v2172_v51 = vmul.f32 %v5197_v9, %v2166_v60  ;;  %v2171_v3 = vmul.f32 %v5198_v5, %v2166_v60 }
 0xa63   : > { %v2174_v13 = vmul.f32 %v4104_v53, %v2159_v42  ;;  %v2173_v38 = vmul.f32 %v4107_v11, %v2159_v42  ;;  %v670_v53 = vmul.f32 0.001, %v620_v43  ;;  %v621_v11 = vld [vmem:[%s4926_s1 + $0xa0] sm:$0xf]  ;;  %v2176_v0 = vmul.f32 %v4116_v46, %v2166_v60 }
 0xa64   : > { %2187 = vrot.lane.b32.xlu0 %v2170_v47, %s3351_s4  ;;  %2185 = vrot.lane.b32.xlu1 %v2169_v58, %s3351_s4  ;;  %v671_v27 = vmul.f32 0.001, %v621_v11  ;;  %v2175_v50 = vmul.f32 %v4119_v17, %v2166_v60 }
 0xa68   : > { %2191 = vrot.lane.b32.xlu0 %v2172_v51, %s3351_s4  ;;  %2189 = vrot.lane.b32.xlu1 %v2171_v3, %s3351_s4 }
 0xa6c   : > { %2195 = vrot.lane.b32.xlu0 %v2174_v13, %s3351_s4  ;;  %2193 = vrot.lane.b32.xlu1 %v2173_v38, %s3351_s4 }
 0xa70   : > { %2236 = vperm.xlu0 %3261, %v667_v15   ;;  %2240 = vperm.xlu1 %3262, %v668_v31   ;;  %v3272_v31 = vld [vmem:[#allocation2] sm:$0xff] }
 0xa74   : > { %2325 = vperm.xlu0 %3261, %v669_v30   ;;  %2329 = vperm.xlu1 %3262, %v670_v53   ;;  %v3274_v30 = vld [vmem:[#allocation2 + $0x10] sm:$0xff] }
 0xa78   : > { %2422 = vperm.xlu0 %3261, %v671_v27   ;;  %2426 = vperm.xlu1 %3262, %v672_v28   ;;  %v3275_v28 = vld [vmem:[#allocation2 + $0x28] sm:$0xf] }
 0xa7c   : > { %2515 = vperm.xlu0 %3261, %v673_v55   ;;  %2519 = vperm.xlu1 %3262, %v674_v48  }
 0xa80   : > { %2608 = vperm.xlu0 %3261, %v675_v40   ;;  %2612 = vperm.xlu1 %3262, %v676_v8   ;;  %v3278_v8 = vld [vmem:[#allocation2 + $0x30] sm:$0xff] }
 0xa84   : > { %2701 = vperm.xlu0 %3261, %v677_v59   ;;  %2705 = vperm.xlu1 %3262, %v678_v61  }
 0xa88   : > { %2794 = vperm.xlu0 %3261, %v679_v33   ;;  %2798 = vperm.xlu1 %3262, %v680_v20   ;;  %v4596_v20 = vld [vmem:[#allocation2 + $0x18] sm:$0xff] }
 0xa8c   : > { %2199 = vrot.lane.b32.xlu0 %v2176_v0, %s3351_s4  ;;  %2197 = vrot.lane.b32.xlu1 %v2175_v50, %s3351_s4  ;;  %s3377_s4 = smov 65   ;;  %v4598_v0 = vld [vmem:[#allocation2 + $0x10] sm:$0xff] }
 0xad6   : > { %v2186_v10 = vpop.permute.xlu1 %2185  ;;  %v2188_v34 = vpop.permute.xlu0 %2187 }
 0xad7   : > { %v2201_v49 = vrot.slane %v2186_v10, 4  ;;  %v2202_v7 = vrot.slane %v2188_v34, 4  ;;  %v4566_v6 = vadd.f32 %v2188_v34, %v4457_v39 }
 0xad9   : > { %v2209_v63 = vsel %vm149_vm0, %v2201_v49, %v2202_v7  ;;  %v4602_v49 = vld [vmem:[#allocation2 + $0x38] sm:$0xff]  ;;  %v4604_v7 = vld [vmem:[#allocation2 + $0x30] sm:$0xff] }
 0xada   : > { %v2211_v1 = vsel %vm2210_vm11, %v2186_v10, %v2209_v63  ;;  %v2190_v16 = vpop.permute.xlu1 %2189  ;;  %v2192_v21 = vpop.permute.xlu0 %2191 }
 0xadb   : > { %v4571_v22 = vadd.f32 %v2211_v1, %v4473_v26  ;;  %v2203_v19 = vrot.slane %v2190_v16, 4  ;;  %v2204_v42 = vrot.slane %v2192_v21, 4  ;;  %v4574_v60 = vadd.f32 %v2192_v21, %v4475_v25  ;;  %v4609_v21 = vld [vmem:[#allocation2 + $0x8] sm:$0xff] }
 0xadd   : > { %v2212_v36 = vsel %vm149_vm0, %v2203_v19, %v2204_v42  ;;  %v4611_v19 = vld [vmem:[#allocation2] sm:$0xff] }
 0xade   : > { %v2213_v47 = vsel %vm2210_vm11, %v2190_v16, %v2212_v36  ;;  %v2194_v39 = vpop.permute.xlu1 %2193  ;;  %v2196_v24 = vpop.permute.xlu0 %2195 }
 0xadf   : > { %v4579_v58 = vadd.f32 %v2213_v47, %v4488_v41  ;;  %v2205_v9 = vrot.slane %v2194_v39, 4  ;;  %v2206_v51 = vrot.slane %v2196_v24, 4  ;;  %v4582_v5 = vadd.f32 %v2196_v24, %v4490_v56  ;;  %v3271_v41 = vld [vmem:[#allocation2 + $0x8] sm:$0xf]  ;;  %v3273_v56 = vld [vmem:[#allocation2 + $0x18] sm:$0xf] }
 0xae0   : > { %v4617_v24 = vld [vmem:[#allocation2 + $0x20] sm:$0xff] }
 0xae1   : > { %v2214_v26 = vsel %vm149_vm0, %v2205_v9, %v2206_v51 }
 0xae2   : > { %v2215_v3 = vsel %vm2210_vm11, %v2194_v39, %v2214_v26  ;;  %v4615_v39 = vld [vmem:[#allocation2 + $0x28] sm:$0xff] }
 0xae3   : > { %v4587_v25 = vadd.f32 %v2215_v3, %v4496_v12 }
 0xaef   : > { %v2241_v44 = vpop.permute.xlu1 %2240  ;;  %v2237_v52 = vpop.permute.xlu0 %2236 }
 0xaf0   : > { %v2248_v13 = vrot.slane %v2237_v52, %v5194_v29  ;;  %v2255_v38 = vrot.slane %v2241_v44, %v5194_v29 }
 0xaf2   : > { %v2259_v15 = vmul.f32 %v3271_v41, %v2248_v13  ;;  %v2258_v54 = vmul.f32 %v3272_v31, %v2248_v13  ;;  %v2261_v43 = vmul.f32 %v3273_v56, %v2255_v38  ;;  %v2260_v53 = vmul.f32 %v3274_v30, %v2255_v38 }
 0xaf3   : > { %v2265_v12 = vmul.f32 %v4116_v46, %v2255_v38  ;;  %v2264_v11 = vmul.f32 %v4119_v17, %v2255_v38  ;;  %v2330_v45 = vpop.permute.xlu1 %2329  ;;  %v2263_v62 = vmul.f32 %v3275_v28, %v2248_v13  ;;  %v2262_v55 = vmul.f32 %v3276_v32, %v2248_v13  ;;  %v2326_v14 = vpop.permute.xlu0 %2325  ;;  %v3277_v17 = vld [vmem:[#allocation2 + $0x38] sm:$0xf] }
 0xaf4   : > { %2276 = vrot.lane.b32.xlu0 %v2259_v15, %s3377_s4  ;;  %2274 = vrot.lane.b32.xlu1 %v2258_v54, %s3377_s4  ;;  %v2344_v27 = vrot.slane %v2330_v45, %v5194_v29  ;;  %v2337_v46 = vrot.slane %v2326_v14, %v5194_v29 }
 0xaf6   : > { %v2350_v48 = vmul.f32 %v3273_v56, %v2344_v27  ;;  %v2349_v57 = vmul.f32 %v3274_v30, %v2344_v27  ;;  %v2354_v40 = vmul.f32 %v3277_v17, %v2344_v27  ;;  %v2353_v37 = vmul.f32 %v3278_v8, %v2344_v27 }
 0xaf7   : > { %v2348_v23 = vmul.f32 %v3271_v41, %v2337_v46  ;;  %v2347_v59 = vmul.f32 %v3272_v31, %v2337_v46  ;;  %v2427_v61 = vpop.permute.xlu1 %2426  ;;  %v2352_v2 = vmul.f32 %v3275_v28, %v2337_v46  ;;  %v2351_v33 = vmul.f32 %v3276_v32, %v2337_v46  ;;  %v2423_v34 = vpop.permute.xlu0 %2422 }
 0xaf8   : > { %2280 = vrot.lane.b32.xlu0 %v2261_v43, %s3377_s4  ;;  %2278 = vrot.lane.b32.xlu1 %v2260_v53, %s3377_s4  ;;  %v2441_v18 = vrot.slane %v2427_v61, %v5194_v29  ;;  %v2434_v63 = vrot.slane %v2423_v34, %v5194_v29 }
 0xafa   : > { %v2447_v50 = vmul.f32 %v2441_v18, %v4596_v20  ;;  %v2446_v10 = vmul.f32 %v2441_v18, %v4598_v0  ;;  %v2451_v1 = vmul.f32 %v2441_v18, %v4602_v49  ;;  %v2450_v16 = vmul.f32 %v2441_v18, %v4604_v7 }
 0xafb   : > { %v2445_v42 = vmul.f32 %v2434_v63, %v4609_v21  ;;  %v2444_v36 = vmul.f32 %v2434_v63, %v4611_v19  ;;  %v2520_v47 = vpop.permute.xlu1 %2519  ;;  %v2449_v51 = vmul.f32 %v2434_v63, %v4615_v39  ;;  %v2448_v26 = vmul.f32 %v2434_v63, %v4617_v24  ;;  %v2516_v52 = vpop.permute.xlu0 %2515 }
 0xafc   : > { %2288 = vrot.lane.b32.xlu0 %v2265_v12, %s3377_s4  ;;  %2286 = vrot.lane.b32.xlu1 %v2264_v11, %s3377_s4  ;;  %v2534_v9 = vrot.slane %v2520_v47, %v5194_v29  ;;  %v2527_v13 = vrot.slane %v2516_v52, %v5194_v29 }
 0xafe   : > { %v2540_v3 = vmul.f32 %v2534_v9, %v4596_v20  ;;  %v2539_v44 = vmul.f32 %v2534_v9, %v4598_v0  ;;  %v2544_v38 = vmul.f32 %v2534_v9, %v4602_v49  ;;  %v2543_v41 = vmul.f32 %v2534_v9, %v4604_v7 }
 0xaff   : > { %v2538_v15 = vmul.f32 %v2527_v13, %v4609_v21  ;;  %v2537_v31 = vmul.f32 %v2527_v13, %v4611_v19  ;;  %v2613_v54 = vpop.permute.xlu1 %2612  ;;  %v2542_v43 = vmul.f32 %v2527_v13, %v4615_v39  ;;  %v2541_v30 = vmul.f32 %v2527_v13, %v4617_v24  ;;  %v2609_v11 = vpop.permute.xlu0 %2608 }
 0xb00   : > { %2284 = vrot.lane.b32.xlu0 %v2263_v62, %s3377_s4  ;;  %2282 = vrot.lane.b32.xlu1 %v2262_v55, %s3377_s4  ;;  %v2627_v56 = vrot.slane %v2613_v54, %v5194_v29  ;;  %v2620_v45 = vrot.slane %v2609_v11, %v5194_v29 }
 0xb02   : > { %v2633_v53 = vmul.f32 %v2627_v56, %v4596_v20  ;;  %v2632_v12 = vmul.f32 %v2627_v56, %v4598_v0  ;;  %v2637_v27 = vmul.f32 %v2627_v56, %v4602_v49  ;;  %v2636_v28 = vmul.f32 %v2627_v56, %v4604_v7 }
 0xb03   : > { %v2631_v62 = vmul.f32 %v2620_v45, %v4609_v21  ;;  %v2630_v32 = vmul.f32 %v2620_v45, %v4611_v19  ;;  %v2706_v55 = vpop.permute.xlu1 %2705  ;;  %v2634_v14 = vmul.f32 %v2620_v45, %v4617_v24 }
 0xb04   : > { %2369 = vrot.lane.b32.xlu0 %v2350_v48, %s3378_s23  ;;  %2367 = vrot.lane.b32.xlu1 %v2349_v57, %s3378_s23  ;;  %v2720_v48 = vrot.slane %v2706_v55, %v5194_v29  ;;  %v2635_v57 = vmul.f32 %v2620_v45, %v4615_v39 }
 0xb06   : > { %v2726_v46 = vmul.f32 %v2720_v48, %v4596_v20  ;;  %v2725_v17 = vmul.f32 %v2720_v48, %v4598_v0 }
 0xb07   : > { %v2799_v18 = vpop.permute.xlu1 %2798 }
 0xb08   : > { %2377 = vrot.lane.b32.xlu0 %v2354_v40, %s3378_s23  ;;  %2375 = vrot.lane.b32.xlu1 %v2353_v37, %s3378_s23  ;;  %v2702_v40 = vpop.permute.xlu0 %2701  ;;  %v2730_v37 = vmul.f32 %v2720_v48, %v4602_v49 }
 0xb09   : > { %v2713_v8 = vrot.slane %v2702_v40, %v5194_v29 }
 0xb0b   : > { %v2723_v61 = vmul.f32 %v2713_v8, %v4611_v19  ;;  %v2198_v9 = vpop.permute.xlu1 %2197 }
 0xb0c   : > { %2365 = vrot.lane.b32.xlu0 %v2348_v23, %s3378_s23  ;;  %2363 = vrot.lane.b32.xlu1 %v2347_v59, %s3378_s23  ;;  %v2729_v23 = vmul.f32 %v2720_v48, %v4604_v7  ;;  %v2724_v59 = vmul.f32 %v2713_v8, %v4609_v21  ;;  %v2795_v63 = vpop.permute.xlu0 %2794 }
 0xb10   : > { %2373 = vrot.lane.b32.xlu0 %v2352_v2, %s3378_s23  ;;  %2371 = vrot.lane.b32.xlu1 %v2351_v33, %s3378_s23  ;;  %v2813_v2 = vrot.slane %v2799_v18, %v5194_v29  ;;  %v2728_v33 = vmul.f32 %v2713_v8, %v4615_v39 }
 0xb12   : > { %v2818_v34 = vmul.f32 %v2813_v2, %v4598_v0 }
 0xb14   : > { %2466 = vrot.lane.b32.xlu0 %v2447_v50, %s3379_s24  ;;  %2464 = vrot.lane.b32.xlu1 %v2446_v10, %s3379_s24  ;;  %v2727_v50 = vmul.f32 %v2713_v8, %v4617_v24  ;;  %v2819_v10 = vmul.f32 %v2813_v2, %v4596_v20 }
 0xb18   : > { %2474 = vrot.lane.b32.xlu0 %v2451_v1, %s3379_s24  ;;  %2472 = vrot.lane.b32.xlu1 %v2450_v16, %s3379_s24  ;;  %v2806_v1 = vrot.slane %v2795_v63, %v5194_v29  ;;  %v2823_v16 = vmul.f32 %v2813_v2, %v4602_v49  ;;  %v2200_v29 = vpop.permute.xlu0 %2199 }
 0xb19   : > { %v2208_v49 = vrot.slane %v2200_v29, 4  ;;  %v2233_v54 = vadd.f32 %v2200_v29, %v4498_v4 }
 0xb1a   : > { %v2816_v47 = vmul.f32 %v2806_v1, %v4611_v19  ;;  %v2821_v20 = vmul.f32 %v2806_v1, %v4615_v39  ;;  %v2820_v0 = vmul.f32 %v2806_v1, %v4617_v24 }
 0xb1c   : > { %2462 = vrot.lane.b32.xlu0 %v2445_v42, %s3379_s24  ;;  %2460 = vrot.lane.b32.xlu1 %v2444_v36, %s3379_s24  ;;  %v2822_v42 = vmul.f32 %v2813_v2, %v4604_v7  ;;  %v2817_v36 = vmul.f32 %v2806_v1, %v4609_v21 }
 0xb20   : > { %2470 = vrot.lane.b32.xlu0 %v2449_v51, %s3379_s24  ;;  %2468 = vrot.lane.b32.xlu1 %v2448_v26, %s3379_s24  ;;  %v2207_v51 = vrot.slane %v2198_v9, 4 }
 0xb22   : > { %v2216_v52 = vsel %vm149_vm0, %v2207_v51, %v2208_v49 }
 0xb24   : > { %2559 = vrot.lane.b32.xlu0 %v2540_v3, %s3380_s26  ;;  %2557 = vrot.lane.b32.xlu1 %v2539_v44, %s3380_s26 }
 0xb28   : > { %2567 = vrot.lane.b32.xlu0 %v2544_v38, %s3380_s26  ;;  %2565 = vrot.lane.b32.xlu1 %v2543_v41, %s3380_s26 }
 0xb2c   : > { %2555 = vrot.lane.b32.xlu0 %v2538_v15, %s3380_s26  ;;  %2553 = vrot.lane.b32.xlu1 %v2537_v31, %s3380_s26 }
 0xb30   : > { %2563 = vrot.lane.b32.xlu0 %v2542_v43, %s3380_s26  ;;  %2561 = vrot.lane.b32.xlu1 %v2541_v30, %s3380_s26 }
 0xb34   : > { %2652 = vrot.lane.b32.xlu0 %v2633_v53, %s3346_s27  ;;  %2650 = vrot.lane.b32.xlu1 %v2632_v12, %s3346_s27 }
 0xb38   : > { %2660 = vrot.lane.b32.xlu0 %v2637_v27, %s3346_s27  ;;  %2658 = vrot.lane.b32.xlu1 %v2636_v28, %s3346_s27 }
 0xb3c   : > { %2648 = vrot.lane.b32.xlu0 %v2631_v62, %s3346_s27  ;;  %2646 = vrot.lane.b32.xlu1 %v2630_v32, %s3346_s27 }
 0xb40   : > { %2656 = vrot.lane.b32.xlu0 %v2635_v57, %s3346_s27  ;;  %2654 = vrot.lane.b32.xlu1 %v2634_v14, %s3346_s27  ;;  %s3382_s27 = smov 44  }
 0xb44   : > { %2745 = vrot.lane.b32.xlu0 %v2726_v46, %s3381_s14  ;;  %2743 = vrot.lane.b32.xlu1 %v2725_v17, %s3381_s14 }
 0xb48   : > { %2753 = vrot.lane.b32.xlu0 %v2730_v37, %s3381_s14  ;;  %2751 = vrot.lane.b32.xlu1 %v2729_v23, %s3381_s14 }
 0xb4c   : > { %2741 = vrot.lane.b32.xlu0 %v2724_v59, %s3381_s14  ;;  %2739 = vrot.lane.b32.xlu1 %v2723_v61, %s3381_s14 }
 0xb50   : > { %2749 = vrot.lane.b32.xlu0 %v2728_v33, %s3381_s14  ;;  %2747 = vrot.lane.b32.xlu1 %v2727_v50, %s3381_s14 }
 0xb54   : > { %2838 = vrot.lane.b32.xlu0 %v2819_v10, %s3382_s27  ;;  %2836 = vrot.lane.b32.xlu1 %v2818_v34, %s3382_s27 }
 0xb58   : > { %2846 = vrot.lane.b32.xlu0 %v2823_v16, %s3382_s27  ;;  %2844 = vrot.lane.b32.xlu1 %v2822_v42, %s3382_s27 }
 0xb5c   : > { %2834 = vrot.lane.b32.xlu0 %v2817_v36, %s3382_s27  ;;  %2832 = vrot.lane.b32.xlu1 %v2816_v47, %s3382_s27 }
 0xb60   : > { %2842 = vrot.lane.b32.xlu0 %v2821_v20, %s3382_s27  ;;  %2840 = vrot.lane.b32.xlu1 %v2820_v0, %s3382_s27 }
 0xb66   : > { %v2275_v26 = vpop.permute.xlu1 %2274  ;;  %v2277_v7 = vpop.permute.xlu0 %2276 }
 0xb67   : > { %v2290_v3 = vrot.slane %v2275_v26, 4  ;;  %v2291_v44 = vrot.slane %v2277_v7, 4  ;;  %v2316_v21 = vadd.f32 %v2277_v7, %v4566_v6  ;;  %v2217_v6 = vsel %vm2210_vm11, %v2198_v9, %v2216_v52 }
 0xb68   : > { %vm3069_vm11 = vcmask 1047559  }
 0xb69   : > { %v2298_v19 = vsel %vm149_vm0, %v2290_v3, %v2291_v44 }
 0xb6a   : > { %v2300_v39 = vsel %vm2299_vm12, %v2275_v26, %v2298_v19  ;;  %v2279_v24 = vpop.permute.xlu1 %2278  ;;  %v2281_v13 = vpop.permute.xlu0 %2280 }
 0xb6b   : > { %v2315_v38 = vadd.f32 %v2300_v39, %v4571_v22  ;;  %v2292_v41 = vrot.slane %v2279_v24, 4  ;;  %v2293_v15 = vrot.slane %v2281_v13, 4  ;;  %v2318_v31 = vadd.f32 %v2281_v13, %v4574_v60 }
 0xb6c   : > { %v2232_v22 = vadd.f32 %v2217_v6, %v4503_v35 }
 0xb6d   : > { %v2301_v56 = vsel %vm149_vm0, %v2292_v41, %v2293_v15 }
 0xb6e   : > { %v2302_v43 = vsel %vm2299_vm12, %v2279_v24, %v2301_v56  ;;  %v2287_v30 = vpop.permute.xlu1 %2286  ;;  %v2289_v53 = vpop.permute.xlu0 %2288 }
 0xb6f   : > { %v2317_v12 = vadd.f32 %v2302_v43, %v4579_v58  ;;  %v2296_v11 = vrot.slane %v2287_v30, 4  ;;  %v2297_v45 = vrot.slane %v2289_v53, 4  ;;  %v2322_v27 = vadd.f32 %v2289_v53, %v2233_v54 }
 0xb71   : > { %v2305_v28 = vsel %vm149_vm0, %v2296_v11, %v2297_v45 }
 0xb72   : > { %v2306_v60 = vsel %vm2299_vm12, %v2287_v30, %v2305_v28  ;;  %v2283_v4 = vpop.permute.xlu1 %2282  ;;  %v2285_v62 = vpop.permute.xlu0 %2284 }
 0xb73   : > { %v2321_v32 = vadd.f32 %v2306_v60, %v2232_v22  ;;  %v2294_v55 = vrot.slane %v2283_v4, 4  ;;  %v2295_v48 = vrot.slane %v2285_v62, 4  ;;  %v2320_v57 = vadd.f32 %v2285_v62, %v4582_v5 }
 0xb75   : > { %v2303_v14 = vsel %vm149_vm0, %v2294_v55, %v2295_v48 }
 0xb76   : > { %v2304_v58 = vsel %vm2299_vm12, %v2283_v4, %v2303_v14  ;;  %v2368_v46 = vpop.permute.xlu1 %2367  ;;  %v2370_v17 = vpop.permute.xlu0 %2369  ;;  %vm4858_vm12 = vmor %vm3083_vm9, %vm3082_vm8 }
 0xb77   : > { %v2319_v35 = vadd.f32 %v2304_v58, %v4587_v25  ;;  %v2381_v40 = vrot.slane %v2368_v46, 4  ;;  %v2382_v8 = vrot.slane %v2370_v17, 4  ;;  %v2407_v37 = vadd.f32 %v2370_v17, %v2318_v31 }
 0xb79   : > { %v2390_v23 = vsel %vm149_vm0, %v2381_v40, %v2382_v8 }
 0xb7a   : > { %v2391_v59 = vsel %vm2388_vm13, %v2368_v46, %v2390_v23  ;;  %v2376_v61 = vpop.permute.xlu1 %2375  ;;  %v2378_v18 = vpop.permute.xlu0 %2377 }
 0xb7b   : > { %v2406_v2 = vadd.f32 %v2391_v59, %v2317_v12  ;;  %v2385_v5 = vrot.slane %v2376_v61, 4  ;;  %v2386_v33 = vrot.slane %v2378_v18, 4  ;;  %v2411_v50 = vadd.f32 %v2378_v18, %v2322_v27 }
 0xb7d   : > { %v2394_v10 = vsel %vm149_vm0, %v2385_v5, %v2386_v33 }
 0xb7e   : > { %v2395_v34 = vsel %vm2388_vm13, %v2376_v61, %v2394_v10  ;;  %v2364_v63 = vpop.permute.xlu1 %2363  ;;  %v2366_v1 = vpop.permute.xlu0 %2365 }
 0xb7f   : > { %v2410_v25 = vadd.f32 %v2395_v34, %v2321_v32  ;;  %v2379_v16 = vrot.slane %v2364_v63, 4  ;;  %v2380_v42 = vrot.slane %v2366_v1, 4  ;;  %v4691_v36 = vadd.f32 %v2366_v1, %v2316_v21 }
 0xb81   : > { %v2387_v47 = vsel %vm149_vm0, %v2379_v16, %v2380_v42  ;;  %v3383_v42 = vmov 1983009808  }
 0xb82   : > { %v2389_v20 = vsel %vm2388_vm13, %v2364_v63, %v2387_v47  ;;  %v2372_v0 = vpop.permute.xlu1 %2371  ;;  %v2374_v9 = vpop.permute.xlu0 %2373  ;;  %v2996_v47 = vunpack.c.l.s4 %v3383_v42 }
 0xb83   : > { %v4695_v29 = vadd.f32 %v2389_v20, %v2315_v38  ;;  %v2383_v51 = vrot.slane %v2372_v0, 4  ;;  %v2384_v49 = vrot.slane %v2374_v9, 4  ;;  %v2409_v26 = vadd.f32 %v2374_v9, %v2320_v57 }
 0xb85   : > { %v2392_v7 = vsel %vm149_vm0, %v2383_v51, %v2384_v49 }
 0xb86   : > { %v2393_v3 = vsel %vm2388_vm13, %v2372_v0, %v2392_v7  ;;  %v2465_v44 = vpop.permute.xlu1 %2464  ;;  %v2467_v19 = vpop.permute.xlu0 %2466 }
 0xb87   : > { %v2408_v21 = vadd.f32 %v2393_v3, %v2319_v35  ;;  %v2478_v52 = vrot.slane %v2465_v44, 4  ;;  %v2479_v39 = vrot.slane %v2467_v19, 4 }
 0xb89   : > { %v2488_v24 = vsel %vm149_vm0, %v2478_v52, %v2479_v39  ;;  %v2490_v13 = vsel %vm2485_vm14, %v2467_v19, %v2479_v39 }
 0xb8a   : > { %v2489_v38 = vsel %vm2485_vm14, %v2465_v44, %v2488_v24  ;;  %v4702_v41 = vadd.f32 %v2490_v13, %v2407_v37  ;;  %v2473_v15 = vpop.permute.xlu1 %2472  ;;  %v2475_v31 = vpop.permute.xlu0 %2474  ;;  %v2997_v44 = vunpack.c.0.s8 %v2996_v47 }
 0xb8b   : > { %v4704_v54 = vadd.f32 %v2489_v38, %v2406_v2  ;;  %v2482_v56 = vrot.slane %v2473_v15, 4  ;;  %v2483_v6 = vrot.slane %v2475_v31, 4 }
 0xb8d   : > { %v2494_v43 = vsel %vm149_vm0, %v2482_v56, %v2483_v6  ;;  %v2496_v30 = vsel %vm2485_vm14, %v2475_v31, %v2483_v6 }
 0xb8e   : > { %v2495_v53 = vsel %vm2485_vm14, %v2473_v15, %v2494_v43  ;;  %v4709_v12 = vadd.f32 %v2496_v30, %v2411_v50  ;;  %v2461_v11 = vpop.permute.xlu1 %2460  ;;  %v2463_v45 = vpop.permute.xlu0 %2462 }
 0xb8f   : > { %v4711_v27 = vadd.f32 %v2495_v53, %v2410_v25  ;;  %v2476_v33 = vrot.slane %v2461_v11, 4  ;;  %v2477_v50 = vrot.slane %v2463_v45, 4 }
 0xb91   : > { %v2484_v20 = vsel %vm149_vm0, %v2476_v33, %v2477_v50 }
 0xb92   : > { %v2469_v22 = vpop.permute.xlu1 %2468  ;;  %v2471_v28 = vpop.permute.xlu0 %2470  ;;  %v2486_v19 = vsel %vm2485_vm14, %v2461_v11, %v2484_v20 }
 0xb93   : > { %v2480_v60 = vrot.slane %v2469_v22, 4  ;;  %v2481_v4 = vrot.slane %v2471_v28, 4  ;;  %v2505_v30 = vadd.f32 %v2486_v19, %v4695_v29 }
 0xb95   : > { %v2491_v62 = vsel %vm149_vm0, %v2480_v60, %v2481_v4  ;;  %v2493_v32 = vsel %vm2485_vm14, %v2471_v28, %v2481_v4 }
 0xb96   : > { %v2492_v55 = vsel %vm2485_vm14, %v2469_v22, %v2491_v62  ;;  %v4716_v48 = vadd.f32 %v2493_v32, %v2409_v26  ;;  %v2558_v57 = vpop.permute.xlu1 %2557  ;;  %v2560_v14 = vpop.permute.xlu0 %2559  ;;  %v2487_v26 = vsel %vm2485_vm14, %v2463_v45, %v2477_v50  ;;  %v5199_v22 = vld [vmem:[#allocation6_spill] sm:$0xff] }
 0xb97   : > { %v4718_v58 = vadd.f32 %v2492_v55, %v2408_v21  ;;  %v2571_v10 = vrot.slane %v2558_v57, 4  ;;  %v2572_v34 = vrot.slane %v2560_v14, 4  ;;  %v2506_v53 = vadd.f32 %v2487_v26, %v4691_v36 }
 0xb98   : > { %v4760_v28 = vsub.s32 %v2997_v44, %v5199_v22 }
 0xb99   : > { %v2581_v0 = vsel %vm149_vm0, %v2571_v10, %v2572_v34  ;;  %v2583_v52 = vsel %vm2578_vm15, %v2560_v14, %v2572_v34 }
 0xb9a   : > { %v2566_v46 = vpop.permute.xlu1 %2565  ;;  %v2568_v17 = vpop.permute.xlu0 %2567  ;;  %v2582_v21 = vsel %vm2578_vm15, %v2558_v57, %v2581_v0  ;;  %v2601_v4 = vadd.f32 %v2583_v52, %v4702_v41 }
 0xb9b   : > { %v2575_v63 = vrot.slane %v2566_v46, 4  ;;  %v2576_v1 = vrot.slane %v2568_v17, 4  ;;  %v2600_v60 = vadd.f32 %v2582_v21, %v4704_v54 }
 0xb9d   : > { %v2587_v49 = vsel %vm149_vm0, %v2575_v63, %v2576_v1  ;;  %v2589_v39 = vsel %vm2578_vm15, %v2568_v17, %v2576_v1 }
 0xb9e   : > { %v2554_v35 = vpop.permute.xlu1 %2553  ;;  %v2556_v40 = vpop.permute.xlu0 %2555  ;;  %v2588_v24 = vsel %vm2578_vm15, %v2566_v46, %v2587_v49  ;;  %v2605_v32 = vadd.f32 %v2589_v39, %v4709_v12 }
 0xb9f   : > { %v2569_v9 = vrot.slane %v2554_v35, 4  ;;  %v2570_v51 = vrot.slane %v2556_v40, 4  ;;  %v2604_v62 = vadd.f32 %v2588_v24, %v4711_v27 }
 0xba1   : > { %v2577_v13 = vsel %vm149_vm0, %v2569_v9, %v2570_v51  ;;  %v2580_v29 = vsel %vm2578_vm15, %v2556_v40, %v2570_v51 }
 0xba2   : > { %v4720_v8 = vpop.permute.xlu1 %2561  ;;  %v2564_v37 = vpop.permute.xlu0 %2563  ;;  %v2579_v55 = vsel %vm2578_vm15, %v2554_v35, %v2577_v13  ;;  %v2599_v10 = vadd.f32 %v2580_v29, %v2506_v53 }
 0xba3   : > { %v2573_v38 = vrot.slane %v4720_v8, 4  ;;  %v2574_v15 = vrot.slane %v2564_v37, 4  ;;  %v2598_v50 = vadd.f32 %v2579_v55, %v2505_v30 }
 0xba5   : > { %v2584_v14 = vsel %vm149_vm0, %v2573_v38, %v2574_v15  ;;  %v2586_v46 = vsel %vm2578_vm15, %v2564_v37, %v2574_v15 }
 0xba6   : > { %v4722_v23 = vpop.permute.xlu1 %2650  ;;  %v4724_v59 = vpop.permute.xlu0 %2652  ;;  %v2585_v37 = vsel %vm2578_vm15, %v4720_v8, %v2584_v14  ;;  %v2603_v1 = vadd.f32 %v2586_v46, %v4716_v48 }
 0xba7   : > { %v2664_v31 = vrot.slane %v4722_v23, 4  ;;  %v2665_v56 = vrot.slane %v4724_v59, 4 }
 0xba9   : > { %v2674_v54 = vsel %vm149_vm0, %v2664_v31, %v2665_v56  ;;  %v2676_v42 = vsel %vm2671_vm1, %v4724_v59, %v2665_v56 }
 0xbaa   : > { %v4726_v61 = vpop.permute.xlu1 %2658  ;;  %v4728_v18 = vpop.permute.xlu0 %2660  ;;  %v2675_v20 = vsel %vm2671_vm1, %v4722_v23, %v2674_v54  ;;  %v2602_v23 = vadd.f32 %v2585_v37, %v4718_v58  ;;  %v2694_v19 = vadd.f32 %v2676_v42, %v2601_v4 }
 0xbab   : > { %v2668_v6 = vrot.slane %v4726_v61, 4  ;;  %v2669_v43 = vrot.slane %v4728_v18, 4  ;;  %v2693_v21 = vadd.f32 %v2675_v20, %v2600_v60 }
 0xbad   : > { %v2680_v41 = vsel %vm149_vm0, %v2668_v6, %v2669_v43  ;;  %v2682_v9 = vsel %vm2671_vm1, %v4728_v18, %v2669_v43 }
 0xbae   : > { %v4730_v2 = vpop.permute.xlu1 %2646  ;;  %v4732_v5 = vpop.permute.xlu0 %2648  ;;  %v2681_v0 = vsel %vm2671_vm1, %v4726_v61, %v2680_v41 }
 0xbaf   : > { %v2662_v36 = vrot.slane %v4730_v2, 4  ;;  %v2663_v57 = vrot.slane %v4732_v5, 4  ;;  %v2697_v52 = vadd.f32 %v2681_v0, %v2604_v62 }
 0xbb1   : > { %v2670_v47 = vsel %vm149_vm0, %v2662_v36, %v2663_v57  ;;  %v2673_v51 = vsel %vm2671_vm1, %v4732_v5, %v2663_v57  ;;  %v2698_v5 = vadd.f32 %v2682_v9, %v2605_v32 }
 0xbb2   : > { %v4734_v25 = vpop.permute.xlu1 %2654  ;;  %v4736_v16 = vpop.permute.xlu0 %2656  ;;  %v2672_v61 = vsel %vm2671_vm1, %v4730_v2, %v2670_v47  ;;  %v2692_v39 = vadd.f32 %v2673_v51, %v2599_v10 }
 0xbb3   : > { %v2666_v27 = vrot.slane %v4734_v25, 4  ;;  %v2667_v12 = vrot.slane %v4736_v16, 4  ;;  %v2691_v15 = vadd.f32 %v2672_v61, %v2598_v50 }
 0xbb5   : > { %v2677_v48 = vsel %vm149_vm0, %v2666_v27, %v2667_v12  ;;  %v2679_v13 = vsel %vm2671_vm1, %v4736_v16, %v2667_v12 }
 0xbb6   : > { %v4742_v7 = vpop.permute.xlu1 %2743  ;;  %v4744_v3 = vpop.permute.xlu0 %2745  ;;  %v2678_v24 = vsel %vm2671_vm1, %v4734_v25, %v2677_v48  ;;  %v4811_v60 = vadd.f32 %v2679_v13, %v2603_v1 }
 0xbb7   : > { %v2757_v17 = vrot.slane %v4742_v7, 4  ;;  %v2758_v35 = vrot.slane %v4744_v3, 4  ;;  %v4809_v16 = vadd.f32 %v2678_v24, %v2602_v23 }
 0xbb9   : > { %v2767_v8 = vsel %vm149_vm0, %v2757_v17, %v2758_v35  ;;  %v2769_v58 = vsel %vm2764_vm2, %v4744_v3, %v2758_v35 }
 0xbba   : > { %v2752_v11 = vpop.permute.xlu1 %2751  ;;  %v2754_v45 = vpop.permute.xlu0 %2753  ;;  %v2768_v38 = vsel %vm2764_vm2, %v4742_v7, %v2767_v8  ;;  %v2787_v4 = vadd.f32 %v2769_v58, %v2694_v19 }
 0xbbb   : > { %v2761_v34 = vrot.slane %v2752_v11, 4  ;;  %v2762_v63 = vrot.slane %v2754_v45, 4  ;;  %v2786_v7 = vadd.f32 %v2768_v38, %v2693_v21 }
 0xbbd   : > { %v2773_v18 = vsel %vm149_vm0, %v2761_v34, %v2762_v63  ;;  %v2775_v31 = vsel %vm2764_vm2, %v2754_v45, %v2762_v63 }
 0xbbe   : > { %v2740_v40 = vpop.permute.xlu1 %2739  ;;  %v2742_v33 = vpop.permute.xlu0 %2741  ;;  %v2774_v2 = vsel %vm2764_vm2, %v2752_v11, %v2773_v18  ;;  %v2791_v55 = vadd.f32 %v2775_v31, %v2698_v5 }
 0xbbf   : > { %v2755_v59 = vrot.slane %v2740_v40, 4  ;;  %v2756_v49 = vrot.slane %v2742_v33, 4  ;;  %v2790_v32 = vadd.f32 %v2774_v2, %v2697_v52 }
 0xbc1   : > { %v2763_v56 = vsel %vm149_vm0, %v2755_v59, %v2756_v49  ;;  %v2766_v11 = vsel %vm2764_vm2, %v2742_v33, %v2756_v49 }
 0xbc2   : > { %v2748_v26 = vpop.permute.xlu1 %2747  ;;  %v2750_v44 = vpop.permute.xlu0 %2749  ;;  %v2765_v3 = vsel %vm2764_vm2, %v2740_v40, %v2763_v56  ;;  %v2785_v17 = vadd.f32 %v2766_v11, %v2692_v39 }
 0xbc3   : > { %v2759_v30 = vrot.slane %v2748_v26, 4  ;;  %v2760_v25 = vrot.slane %v2750_v44, 4  ;;  %v2784_v12 = vadd.f32 %v2765_v3, %v2691_v15 }
 0xbc5   : > { %v2770_v46 = vsel %vm149_vm0, %v2759_v30, %v2760_v25  ;;  %v2772_v35 = vsel %vm2764_vm2, %v2750_v44, %v2760_v25 }
 0xbc6   : > { %v2837_v6 = vpop.permute.xlu1 %2836  ;;  %v2839_v43 = vpop.permute.xlu0 %2838  ;;  %v4824_v63 = vsel %vm2764_vm2, %v2748_v26, %v2770_v46 }
 0xbc7   : > { %v2850_v53 = vrot.slane %v2837_v6, 4  ;;  %v2851_v22 = vrot.slane %v2839_v43, 4 }
 0xbc9   : > { %v2860_v45 = vsel %vm149_vm0, %v2850_v53, %v2851_v22  ;;  %v2862_v62 = vsel %vm2857_vm3, %v2839_v43, %v2851_v22 }
 0xbca   : > { %v2861_v29 = vsel %vm2857_vm3, %v2837_v6, %v2860_v45  ;;  %v2880_v36 = vadd.f32 %v2862_v62, %v2787_v4  ;;  %v2845_v57 = vpop.permute.xlu1 %2844  ;;  %v2847_v14 = vpop.permute.xlu0 %2846  ;;  %v2789_v4 = vadd.f32 %v2772_v35, %v4811_v60 }
 0xbcb   : > { %v2879_v54 = vadd.f32 %v2861_v29, %v2786_v7  ;;  %v2854_v41 = vrot.slane %v2845_v57, 4  ;;  %v2855_v27 = vrot.slane %v2847_v14, 4 }
 0xbcc   : > { %v2933_v40 = vsel %vm2911_vm4, %v2880_v36, 0.0 }
 0xbcd   : > { %v2890_v33 = vcombine.high %v2879_v54, %v2879_v54  ;;  %v2919_v50 = vsel %vm149_vm0, %v2879_v54, 0.0  ;;  %v2934_v10 = vrot.slane %v2933_v40, 4  ;;  %v2866_v34 = vsel %vm149_vm0, %v2854_v41, %v2855_v27 }
 0xbce   : > { %v2920_v37 = vrot.slane %v2919_v50, 4  ;;  %v2867_v1 = vsel %vm2857_vm3, %v2845_v57, %v2866_v34  ;;  %v2868_v42 = vsel %vm2857_vm3, %v2847_v14, %v2855_v27  ;;  %v2833_v47 = vpop.permute.xlu1 %2832  ;;  %v2835_v20 = vpop.permute.xlu0 %2834 }
 0xbcf   : > { %v2926_v0 = vsel %vm149_vm0, %v2890_v33, 0.0  ;;  %v2935_v9 = vadd.f32 %v2934_v10, %v2933_v40  ;;  %v2883_v51 = vadd.f32 %v2867_v1, %v2790_v32  ;;  %v2884_v48 = vadd.f32 %v2868_v42, %v2791_v55 }
 0xbd0   : > { %v2921_v8 = vadd.f32 %v2920_v37, %v2919_v50  ;;  %v2927_v59 = vrot.slane %v2926_v0, 4  ;;  %v2848_v49 = vrot.slane %v2833_v47, 4  ;;  %v2849_v44 = vrot.slane %v2835_v20, 4 }
 0xbd1   : > { %v2936_v23 = vrot.slane %v2935_v9, 2  ;;  %v2892_v19 = vcombine.high %v2883_v51, %v2883_v51  ;;  %v2961_v26 = vsel %vm149_vm0, %v2883_v51, 0.0  ;;  %v2975_v61 = vsel %vm2911_vm4, %v2884_v48, 0.0 }
 0xbd2   : > { %v2922_v18 = vrot.slane %v2921_v8, 2  ;;  %v2928_v21 = vadd.f32 %v2927_v59, %v2926_v0  ;;  %v2962_v52 = vrot.slane %v2961_v26, 4  ;;  %v2976_v5 = vrot.slane %v2975_v61, 4  ;;  %v2841_v36 = vpop.permute.xlu1 %2840  ;;  %v2843_v33 = vpop.permute.xlu0 %2842 }
 0xbd3   : > { %v2937_v39 = vadd.f32 %v2936_v23, %v2935_v9  ;;  %v2968_v24 = vsel %vm149_vm0, %v2892_v19, 0.0  ;;  %v2856_v13 = vsel %vm149_vm0, %v2848_v49, %v2849_v44  ;;  %v2859_v38 = vsel %vm2857_vm3, %v2835_v20, %v2849_v44 }
 0xbd4   : > { %v2923_v58 = vadd.f32 %v2922_v18, %v2921_v8  ;;  %v2929_v15 = vrot.slane %v2928_v21, 2  ;;  %v2963_v2 = vadd.f32 %v2962_v52, %v2961_v26  ;;  %v2969_v31 = vrot.slane %v2968_v24, 4 }
 0xbd5   : > { %v2938_v56 = vrot.slane %v2937_v39, 1  ;;  %v2977_v6 = vadd.f32 %v2976_v5, %v2975_v61  ;;  %v2858_v43 = vsel %vm2857_vm3, %v2833_v47, %v2856_v13  ;;  %v2878_v30 = vadd.f32 %v2859_v38, %v2785_v17 }
 0xbd6   : > { %v2924_v25 = vrot.slane %v2923_v58, 1  ;;  %v2930_v53 = vadd.f32 %v2929_v15, %v2928_v21  ;;  %v2964_v22 = vrot.slane %v2963_v2, 2  ;;  %v2970_v7 = vadd.f32 %v2969_v31, %v2968_v24 }
 0xbd7   : > { %v2939_v3 = vadd.f32 %v2938_v56, %v2937_v39  ;;  %v2978_v11 = vrot.slane %v2977_v6, 2  ;;  %v2877_v45 = vadd.f32 %v2858_v43, %v2784_v12  ;;  %v2912_v29 = vsel %vm2911_vm4, %v2878_v30, 0.0 }
 0xbd8   : > { %v2931_v62 = vrot.slane %v2930_v53, 1  ;;  %v2965_v32 = vadd.f32 %v2964_v22, %v2963_v2  ;;  %v2971_v55 = vrot.slane %v2970_v7, 2  ;;  %v2925_v57 = vadd.f32 %v2924_v25, %v2923_v58 }
 0xbd9   : > { %v2979_v14 = vadd.f32 %v2978_v11, %v2977_v6  ;;  %v2889_v46 = vcombine.high %v2877_v45, %v2877_v45  ;;  %v2897_v54 = vsel %vm149_vm0, %v2877_v45, 0.0  ;;  %v2913_v12 = vrot.slane %v2912_v29, 4 }
 0xbda   : > { %v2932_v41 = vadd.f32 %v2931_v62, %v2930_v53  ;;  %v2966_v27 = vrot.slane %v2965_v32, 1  ;;  %v2972_v17 = vadd.f32 %v2971_v55, %v2970_v7  ;;  %v2898_v40 = vrot.slane %v2897_v54, 4 }
 0xbdb   : > { %v2980_v60 = vrot.slane %v2979_v14, 1  ;;  %v2904_v35 = vsel %vm149_vm0, %v2889_v46, 0.0  ;;  %v2852_v50 = vrot.slane %v2841_v36, 4  ;;  %v3024_v34 = vrot.slane %v2939_v3, %v4760_v28 }
 0xbdc   : > { %v3010_v10 = vcombine.low %v2925_v57, %v2932_v41  ;;  %v2973_v37 = vrot.slane %v2972_v17, 1  ;;  %v2899_v1 = vadd.f32 %v2898_v40, %v2897_v54  ;;  %v2967_v42 = vadd.f32 %v2966_v27, %v2965_v32 }
 0xbdd   : > { %v2905_v47 = vrot.slane %v2904_v35, 4  ;;  %v2914_v20 = vadd.f32 %v2913_v12, %v2912_v29  ;;  %v2853_v0 = vrot.slane %v2843_v33, 4  ;;  %v2981_v48 = vadd.f32 %v2980_v60, %v2979_v14 }
 0xbde   : > { %v3017_v9 = vrot.slane %v3010_v10, %v4760_v28  ;;  %v2974_v51 = vadd.f32 %v2973_v37, %v2972_v17  ;;  %v2900_v8 = vrot.slane %v2899_v1, 2  ;;  %v2788_v59 = vadd.f32 %v4824_v63, %v4809_v16 }
 0xbdf   : > { %v2906_v49 = vadd.f32 %v2905_v47, %v2904_v35  ;;  %v2915_v44 = vrot.slane %v2914_v20, 2  ;;  %v2863_v23 = vsel %vm149_vm0, %v2852_v50, %v2853_v0  ;;  %v2865_v5 = vsel %vm2857_vm3, %v2843_v33, %v2853_v0 }
 0xbe0   : > { %v3025_v19 = vcombine.low %v3017_v9, %v3024_v34  ;;  %v3042_v26 = vcombine.low %v2967_v42, %v2974_v51  ;;  %v2901_v61 = vadd.f32 %v2900_v8, %v2899_v1  ;;  %v2864_v18 = vsel %vm2857_vm3, %v2841_v36, %v2863_v23 }
 0xbe1   : > { %v2907_v21 = vrot.slane %v2906_v49, 2  ;;  %v2916_v52 = vadd.f32 %v2915_v44, %v2914_v20  ;;  %v2881_v39 = vadd.f32 %v2864_v18, %v2788_v59  ;;  %v3056_v13 = vrot.slane %v2981_v48, %v4760_v28 }
 0xbe2   : > { %v3049_v24 = vrot.slane %v3042_v26, %v4760_v28  ;;  %v2902_v38 = vrot.slane %v2901_v61, 1  ;;  %v2882_v16 = vadd.f32 %v2865_v5, %v2789_v4  ;;  %v3062_v27 = vrot.slane %v3025_v19, 7 }
 0xbe3   : > { %v2908_v63 = vadd.f32 %v2907_v21, %v2906_v49  ;;  %v2917_v58 = vrot.slane %v2916_v52, 1  ;;  %v2891_v15 = vcombine.high %v2881_v39, %v2881_v39  ;;  %v2940_v2 = vsel %vm149_vm0, %v2881_v39, 0.0 }
 0xbe4   : > { %v3057_v31 = vcombine.low %v3049_v24, %v3056_v13  ;;  %v2941_v56 = vrot.slane %v2940_v2, 4  ;;  %v2954_v6 = vsel %vm2911_vm4, %v2882_v16, 0.0  ;;  %v2903_v7 = vadd.f32 %v2902_v38, %v2901_v61 }
 0xbe5   : > { %v2909_v43 = vrot.slane %v2908_v63, 1  ;;  %v2947_v30 = vsel %vm149_vm0, %v2891_v15, 0.0  ;;  %v2955_v25 = vrot.slane %v2954_v6, 4  ;;  %v2918_v11 = vadd.f32 %v2917_v58, %v2916_v52 }
 0xbe6   : > { %v2942_v53 = vadd.f32 %v2941_v56, %v2940_v2  ;;  %v2948_v22 = vrot.slane %v2947_v30, 4  ;;  %vm3063_vm0 = vcmask 1041409   ;;  %v3073_v0 = vrot.slane %v3057_v31, 7 }
 0xbe7   : > { %v2910_v3 = vadd.f32 %v2909_v43, %v2908_v63  ;;  %v2956_v4 = vadd.f32 %v2955_v25, %v2954_v6  ;;  %v3008_v14 = vrot.slane %v2918_v11, %v4760_v28 }
 0xbe8   : > { %v2943_v45 = vrot.slane %v2942_v53, 2  ;;  %v2949_v62 = vadd.f32 %v2948_v22, %v2947_v30 }
 0xbe9   : > { %v2994_v32 = vcombine.low %v2903_v7, %v2910_v3  ;;  %v2957_v55 = vrot.slane %v2956_v4, 2 }
 0xbea   : > { %v2944_v29 = vadd.f32 %v2943_v45, %v2942_v53  ;;  %v2950_v36 = vrot.slane %v2949_v62, 2 }
 0xbeb   : > { %v3001_v57 = vrot.slane %v2994_v32, %v4760_v28  ;;  %v2958_v46 = vadd.f32 %v2957_v55, %v2956_v4 }
 0xbec   : > { %v2945_v54 = vrot.slane %v2944_v29, 1  ;;  %v2951_v41 = vadd.f32 %v2950_v36, %v2949_v62 }
 0xbed   : > { %v3009_v17 = vcombine.low %v3001_v57, %v3008_v14  ;;  %v2959_v40 = vrot.slane %v2958_v46, 1 }
 0xbee   : > { %v2952_v33 = vrot.slane %v2951_v41, 1  ;;  %v2946_v35 = vadd.f32 %v2945_v54, %v2944_v29 }
 0xbef   : > { %v3064_v60 = vsel %vm3063_vm0, %v3062_v27, %v3009_v17  ;;  %v2960_v50 = vadd.f32 %v2959_v40, %v2958_v46 }
 0xbf0   : > { %v2953_v12 = vadd.f32 %v2952_v33, %v2951_v41  ;;  %v3066_v10 = vsel %vm3065_vm7, %v3062_v27, %v3064_v60 }
 0xbf1   : > { %v3068_v37 = vsel %vm3067_vm10, %v3062_v27, %v3066_v10  ;;  %v3040_v20 = vrot.slane %v2960_v50, %v4760_v28 }
 0xbf2   : > { %v3026_v1 = vcombine.low %v2946_v35, %v2953_v12  ;;  %v3070_v42 = vsel %vm3069_vm11, %v3062_v27, %v3068_v37 }
 0xbf3   : > { %3085 = vst.msk [vmem:[%s139_s30] sm:$0x3f] %vm4858_vm12, %v3070_v42 }
 0xbf4   : > { %v3033_v47 = vrot.slane %v3026_v1, %v4760_v28 }
 0xbf6   : > { %v3041_v9 = vcombine.low %v3033_v47, %v3040_v20 }
 0xbf8   : > { %v3074_v51 = vsel %vm3063_vm0, %v3073_v0, %v3041_v9 }
 0xbf9   : > { %v3075_v48 = vsel %vm3065_vm7, %v3073_v0, %v3074_v51 }
 0xbfa   : > { %v3076_v8 = vsel %vm3067_vm10, %v3073_v0, %v3075_v48 }
 0xbfb   : > { %v3077_v28 = vsel %vm3069_vm11, %v3073_v0, %v3076_v8 }
 0xbfc   : > { %3086 = vst.msk [vmem:[%s139_s30 + $0x6] sm:$0x3f] %vm4858_vm12, %v3077_v28 }
 0xbfd   : > { %3292 = shalt.err (!%p3289_p3)
}
 0xbfe   : > { %s3293_s22 = scalar_lea.hbm %s4874_s7, 192  ;;  %s3297_s24 = scalar_lea.hbm %s4927_s2, 384 }
 0xbff   : > { %p3294_p4 = scmp.ne.s32.totalorder %s4874_s7, %s3293_s22  ;;  %p3298_p9 = scmp.lt.u32.totalorder %s4874_s7, %s4927_s2 }
 0xc00   : > { %p3299_p10 = scmp.lt.u32.totalorder %s3297_s24, %s3293_s22  ;;  %p3301_p12 = scmp.lt.u32.totalorder %s3293_s22, %s4874_s7 }
 0xc01   : > { %p3295_p7 = pnand %p3294_p4, %p3440_p5 }
 0xc02   : > { %p3300_p11 = por %p3299_p10, %p3298_p9 }
 0xc03   : > { %p3296_p8 = pneg %p3295_p7 }
 0xc04   : > { %p3302_p13 = por %p3301_p12, %p3300_p11 }
 0xc06   : > { %p3303_p0 = pnand %p3302_p13, %p3296_p8 }
 0xc08   : > { %3306 = shalt.err (!%p3303_p0)
}
 0xc09   : > { %s3385_s27 = smov 96   ;;  %s3386_s28 = smov 6  }
 0xc0a   : > { %3179 = dma.vmem_to_hbm [thread:$0]  (%p3440_p5), %s4877_s25, 192, %s4874_s7, %s4884_s13, %s3385_s27, %s3385_s27, %s3386_s28  }
 0xc0b PF: > { %p3185_p1 = scmp.ge.s32.totalorder %s3341_s12, 2  ;;  %s3117_s29 = sand.u32 1, %s3329_s9  }
 0xc0c   : > { %s3118_s30 = scalar_lea.sflag [#allocation4], %s3117_s29 }
 0xc0d   : > { %p3182_p2 = pnand %p3185_p1, %p3444_p6 }
 0xc0f   : > { %3324 = dma.done.wait (!%p3182_p2), %s3118_s30, 192  }
 0xc10   : > { %3326 = vsyncadd (!%p3182_p2), %s3118_s30, 4294967104  ;;  %p12_p3 = scmp.ge.s32.totalorder %s3427_s15, 4   ;;  %s5202_s9 = smov %s3333_s10 }
 0xc11   : > { %s5203_s10 = smov %s3337_s11  ;;  %s5204_s11 = smov %s3438_s18 }
 0xc12   : > { %s5205_s12 = smov %s3427_s15  ;;  %14 = sbr.rel (!%p12_p3) target bundleno = 3 (0x3), region = 63 }
 0xc19   :  { %3123 = vsyncpa [#allocation4], 1 }
 0xc1a   :  { %3125 = vsyncpa [#allocation4 + $0x1], 1 }

</bundles_post_ra>
